<compile_context>
chip_gen: v5e
topology: v5e:2x2
jax: 0.10.0
libtpu: 0.0.40
codegen_flags: <defaults>
</compile_context>

<pallas_src>
import math
import functools

import jax
import jax.numpy as jnp
from jax.experimental import pallas as pl
from jax.experimental.pallas import tpu as pltpu

EPS = 1e-5          # LayerNorm eps over the channel dim
LANE = 128


def _ceil_to(x, m):
    return (x + m - 1) // m * m


def _layer_norm_tc(z, g, b, cmask, inv_c):
    """LayerNorm over the real channels of a lane-padded (..., Cp) tensor, fp32.

    Invariant: padded lanes of z are exactly zero, g/b are zero-padded, so the
    output keeps padded lanes at zero (mean uses sum/real_C; var masks pads).
    """
    mu = jnp.sum(z, axis=-1, keepdims=True) * inv_c
    d = (z - mu) * cmask
    var = jnp.sum(d * d, axis=-1, keepdims=True) * inv_c
    return d * jax.lax.rsqrt(var + EPS) * g + b


# ---------------------------------------------------------------------------
# Kernel: ONE transformer layer per grid step (grid = (num_layers,)).
# The activation is carried across layers in the resident output block.
# ---------------------------------------------------------------------------
def transformer_kernel(*args, n_heads, kernel_size, real_c, has_g, matmul_dtype):
    if has_g:
        (x_ref, mt_ref, mtr_ref, g_ref,
         qkv_w_ref, qkv_b_ref, out_w_ref, out_b_ref, ln1_g_ref, ln1_b_ref,
         w1_ref, b1_ref, w2_ref, b2_ref, ln2_g_ref, ln2_b_ref, o_ref) = args
    else:
        (x_ref, mt_ref, mtr_ref,
         qkv_w_ref, qkv_b_ref, out_w_ref, out_b_ref, ln1_g_ref, ln1_b_ref,
         w1_ref, b1_ref, w2_ref, b2_ref, ln2_g_ref, ln2_b_ref, o_ref) = args
        g_ref = None

    B, T, Cp = o_ref.shape
    H = n_heads
    dp = Cp // H                       # lane-padded per-head width
    K = kernel_size
    padT = K // 2
    scale = 1.0 / math.sqrt(real_c // H)
    inv_c = 1.0 / real_c
    cdt = matmul_dtype

    # ---- layer-0: load the input activation into the resident output block ----
    @pl.when(pl.program_id(0) == 0)
    def _():
        o_ref[...] = x_ref[...]

    # ---- masks (tiny; rebuilt per grid step, no (T,T) HBM DMA) ----
    mt = mt_ref[...]                                   # (B, T, 1)  per-timestep mask
    mtr = mtr_ref[...]                                 # (B, 1, T)  same mask, row form
    mtf = mt.reshape(B * T, 1)
    pm = mt * mtr                                      # (B, T, T)  attn_mask product
    pmh = jnp.broadcast_to(pm[:, None, :, :], (B, H, T, T)).reshape(B * H, T, T)
    cmask = (jax.lax.broadcasted_iota(jnp.int32, (1, 1, Cp), 2) < real_c
             ).astype(jnp.float32)                     # real-channel lane mask

    x = o_ref[...]                                     # (B, T, Cp) f32, carried
    if has_g:
        x = x + g_ref[...]

    # ---------------- multi-head self attention ----------------
    qkv = jnp.dot(x.reshape(B * T, Cp).astype(cdt), qkv_w_ref[0],
                  preferred_element_type=jnp.float32) + qkv_b_ref[0]   # (B*T, 3Cp)
    qkv_c = qkv.astype(cdt)                            # cast once per layer

    def to_heads(t):                                   # (B*T, Cp) -> (B*H, T, dp)
        return jnp.swapaxes(t.reshape(B, T, H, dp), 1, 2).reshape(B * H, T, dp)

    qh = to_heads(qkv_c[:, 0:Cp])                      # head-strided padded columns
    kh = to_heads(qkv_c[:, Cp:2 * Cp])
    vh = to_heads(qkv_c[:, 2 * Cp:3 * Cp])

    s = jnp.einsum("ntd,nsd->nts", qh, kh,
                   preferred_element_type=jnp.float32) * scale         # (B*H, T, T)
    s = jnp.where(pmh == 0.0, -10000.0, s)                              # masked_fill
    m = jnp.max(s, axis=-1, keepdims=True)
    p = jnp.exp(s - m)
    p = p * pl.reciprocal(jnp.sum(p, axis=-1, keepdims=True), approx=True)

    o = jnp.einsum("nts,nsd->ntd", p.astype(cdt), vh,
                   preferred_element_type=jnp.float32)                  # (B*H, T, dp)
    o = jnp.swapaxes(o.reshape(B, H, T, dp), 1, 2).reshape(B * T, Cp)   # merge heads

    y = jnp.dot(o.astype(cdt), out_w_ref[0],
                preferred_element_type=jnp.float32) + out_b_ref[0]      # (B*T, Cp)

    x1 = _layer_norm_tc(x + y.reshape(B, T, Cp),
                        ln1_g_ref[0], ln1_b_ref[0], cmask, inv_c)

    # ---------------- FFN: conv1d(K) -> relu -> conv1d(1), masked ----------------
    xm = x1 * mt                                                        # (B, T, Cp)
    if padT > 0:
        zpad = jnp.zeros((B, padT, Cp), jnp.float32)
        xpad = jnp.concatenate([zpad, xm, zpad], axis=1)                # (B, T+2p, Cp)
    else:
        xpad = xm
    if K > 1:
        # K taps folded into ONE matmul; lane concat offsets are 128-aligned.
        xcat = jnp.concatenate([xpad[:, j:j + T, :] for j in range(K)], axis=2)
    else:
        xcat = xpad                                                     # (B, T, K*Cp)
    h = jnp.dot(xcat.reshape(B * T, K * Cp).astype(cdt), w1_ref[0],
                preferred_element_type=jnp.float32) + b1_ref[0]         # (B*T, Csp)
    h = jnp.maximum(h, 0.0) * mtf                                       # ReLU + mask
    y2 = jnp.dot(h.astype(cdt), w2_ref[0],
                 preferred_element_type=jnp.float32) + b2_ref[0]        # (B*T, Cp)
    y2 = y2 * mtf

    x2 = _layer_norm_tc(x1 + y2.reshape(B, T, Cp),
                        ln2_g_ref[0], ln2_b_ref[0], cmask, inv_c) * mt  # FFNLayer mask
    o_ref[...] = x2


def _const_spec(arr):
    nd = arr.ndim
    return pl.BlockSpec(tuple(arr.shape), lambda l, _n=nd: (0,) * _n)


def _layer_spec(arr):
    nd = arr.ndim
    blk = (1,) + tuple(arr.shape[1:])
    return pl.BlockSpec(blk, lambda l, _n=nd: (l,) + (0,) * (_n - 1))


def transformer_forward(x_bct, mask_b1t, layer_params, *, n_heads, kernel_size,
                        g_bct=None, matmul_dtype=jnp.bfloat16):
    """Mirrors Transformer.forward (use_rel=False). x: (B, C, T), mask: (B, 1, T)."""
    assert kernel_size % 2 == 1, "even kernel_size not supported (length mismatch)"
    B, C, T = x_bct.shape
    L = len(layer_params)
    K = kernel_size
    H = n_heads
    assert C % H == 0
    d = C // H
    Cs = layer_params[0]["ffn_w2"].shape[0]
    Cp = _ceil_to(C, LANE)
    Csp = _ceil_to(Cs, LANE)
    assert Cp % H == 0, "n_heads must divide the lane-padded channel count"
    dp = Cp // H
    has_g = g_bct is not None
    wdt = matmul_dtype

    # ---- activations: (B, C, T) -> (B, T, Cp), zero-padded channels ----
    # TODO(synk): drop these transposes if the caller can carry time-major tensors.
    x = jnp.pad(jnp.transpose(x_bct, (0, 2, 1)).astype(jnp.float32),
                ((0, 0), (0, 0), (0, Cp - C)))
    mt = jnp.transpose(mask_b1t, (0, 2, 1)).astype(jnp.float32)      # (B, T, 1)
    mtr = mask_b1t.astype(jnp.float32)                               # (B, 1, T)

    # ---- weights: pad to 128-lane multiples; q/k/v columns packed head-strided ----
    stk = lambda n: jnp.stack([p[n] for p in layer_params], axis=0)

    qkv_w = stk("qkv_w").reshape(L, C, 3, H, d)
    qkv_w = jnp.pad(qkv_w, ((0, 0), (0, Cp - C), (0, 0), (0, 0), (0, dp - d)))
    qkv_w = qkv_w.reshape(L, Cp, 3 * Cp).astype(wdt)
    qkv_b = stk("qkv_b").reshape(L, 1, 3, H, d)
    qkv_b = jnp.pad(qkv_b, ((0, 0), (0, 0), (0, 0), (0, 0), (0, dp - d)))
    qkv_b = qkv_b.reshape(L, 1, 3 * Cp)

    out_w = stk("out_w").reshape(L, H, d, C)                         # rows head-strided
    out_w = jnp.pad(out_w, ((0, 0), (0, 0), (0, dp - d), (0, Cp - C)))
    out_w = out_w.reshape(L, Cp, Cp).astype(wdt)
    out_b = jnp.pad(stk("out_b"), ((0, 0), (0, 0), (0, Cp - C)))

    ln1_g = jnp.pad(stk("ln1_g"), ((0, 0), (0, 0), (0, Cp - C)))
    ln1_b = jnp.pad(stk("ln1_b"), ((0, 0), (0, 0), (0, Cp - C)))
    ln2_g = jnp.pad(stk("ln2_g"), ((0, 0), (0, 0), (0, Cp - C)))
    ln2_b = jnp.pad(stk("ln2_b"), ((0, 0), (0, 0), (0, Cp - C)))

    ffn_w1 = jnp.pad(stk("ffn_w1"), ((0, 0), (0, 0), (0, Cp - C), (0, Csp - Cs)))
    ffn_w1 = ffn_w1.reshape(L, K * Cp, Csp).astype(wdt)              # fused-tap weight
    ffn_b1 = jnp.pad(stk("ffn_b1"), ((0, 0), (0, 0), (0, Csp - Cs)))
    ffn_w2 = jnp.pad(stk("ffn_w2"), ((0, 0), (0, Csp - Cs), (0, Cp - C))).astype(wdt)
    ffn_b2 = jnp.pad(stk("ffn_b2"), ((0, 0), (0, 0), (0, Cp - C)))

    in_arrays = [x, mt, mtr]
    in_specs = [_const_spec(x), _const_spec(mt), _const_spec(mtr)]
    if has_g:
        g = jnp.pad(jnp.transpose(g_bct, (0, 2, 1)).astype(jnp.float32),
                    ((0, 0), (0, 0), (0, Cp - C)))
        in_arrays.append(g)
        in_specs.append(_const_spec(g))

    weights = [qkv_w, qkv_b, out_w, out_b, ln1_g, ln1_b,
               ffn_w1, ffn_b1, ffn_w2, ffn_b2, ln2_g, ln2_b]
    in_arrays += weights
    in_specs += [_layer_spec(w) for w in weights]   # one layer's weights per grid step

    kern = functools.partial(
        transformer_kernel, n_heads=H, kernel_size=K, real_c=C,
        has_g=has_g, matmul_dtype=matmul_dtype)

    flops = int(2 * L * B * T * (Cp * 3 * Cp + Cp * Cp + K * Cp * Csp + Csp * Cp)
                + 4 * L * B * H * T * T * dp)
    transc = int(L * B * H * T * T)
    bytes_acc = int(sum(a.size * a.dtype.itemsize for a in in_arrays)
                    + B * T * Cp * 4)

    out = pl.pallas_call(
        kern,
        out_shape=jax.ShapeDtypeStruct((B, T, Cp), jnp.float32),
        grid=(L,),                         # layer axis: sequential, weights streamed
        in_specs=in_specs,
        out_specs=pl.BlockSpec((B, T, Cp), lambda l: (0, 0, 0)),  # resident accumulator
        compiler_params=pltpu.CompilerParams(
            dimension_semantics=("arbitrary",)),
        cost_estimate=pl.CostEstimate(flops=flops, transcendentals=transc,
                                      bytes_accessed=bytes_acc),
    )(*in_arrays)
    return jnp.transpose(out[:, :, :C], (0, 2, 1))                  # back to (B, C, T)


# ---------------------------------------------------------------------------
# Deterministic synthetic parameter init (shapes match the nn.Module __init__)
# ---------------------------------------------------------------------------
def init_params(key, num_layers, C, ffn_scale, kernel_size):
    params = []
    Cs = C * ffn_scale
    for layer in range(num_layers):
        ks = jax.random.split(jax.random.fold_in(key, layer), 8)
        params.append({
            # MultiHeadAttention: qkv = Conv1d(C, 3C, 1), out = Conv1d(C, C, 1)
            "qkv_w": 0.05 * jax.random.normal(ks[0], (C, 3 * C), jnp.float32),
            "qkv_b": 0.01 * jax.random.normal(ks[1], (1, 3 * C), jnp.float32),
            "out_w": 0.05 * jax.random.normal(ks[2], (C, C), jnp.float32),
            "out_b": 0.01 * jax.random.normal(ks[3], (1, C), jnp.float32),
            "ln1_g": jnp.ones((1, C), jnp.float32),
            "ln1_b": jnp.zeros((1, C), jnp.float32),
            # FFN: conv1 = Conv1d(C, C*scale, k, pad=k//2), conv2 = Conv1d(C*scale, C, 1)
            # stored as (k, C_in, C_out) so each tap is a matmul (cross-correlation)
            "ffn_w1": 0.05 * jax.random.normal(ks[4], (kernel_size, C, Cs), jnp.float32),
            "ffn_b1": 0.01 * jax.random.normal(ks[5], (1, Cs), jnp.float32),
            "ffn_w2": 0.05 * jax.random.normal(ks[6], (Cs, C), jnp.float32),
            "ffn_b2": 0.01 * jax.random.normal(ks[7], (1, C), jnp.float32),
            "ln2_g": jnp.ones((1, C), jnp.float32),
            "ln2_b": jnp.zeros((1, C), jnp.float32),
        })
    return params


# ---------------------------------------------------------------------------
# Pure-JAX reference (same math, unpadded) for a correctness check
# ---------------------------------------------------------------------------
def _layer_norm(z, g, b):
    mu = jnp.mean(z, axis=-1, keepdims=True)
    var = jnp.mean((z - mu) ** 2, axis=-1, keepdims=True)
    return (z - mu) * jax.lax.rsqrt(var + EPS) * g + b


def reference_forward(x_bct, mask_b1t, layer_params, *, n_heads, kernel_size, g_bct=None):
    x = jnp.transpose(x_bct, (0, 2, 1))
    mask_t = jnp.transpose(mask_b1t, (0, 2, 1))
    attn_mask = mask_t * jnp.transpose(mask_t, (0, 2, 1))
    B, T, C = x.shape
    H = n_heads
    d = C // H
    scale = 1.0 / math.sqrt(d)
    pad = kernel_size // 2
    for p in layer_params:
        if g_bct is not None:
            x = x + jnp.transpose(g_bct, (0, 2, 1))
        qkv = jnp.einsum("btc,cf->btf", x, p["qkv_w"]) + p["qkv_b"]
        q, k, v = qkv[..., :C], qkv[..., C:2 * C], qkv[..., 2 * C:]
        qh = q.reshape(B, T, H, d).transpose(0, 2, 1, 3)
        kh = k.reshape(B, T, H, d).transpose(0, 2, 1, 3)
        vh = v.reshape(B, T, H, d).transpose(0, 2, 1, 3)
        s = jnp.einsum("bhtd,bhsd->bhts", qh, kh) * scale
        s = jnp.where(attn_mask[:, None, :, :] == 0.0, -10000.0, s)
        a = jax.nn.softmax(s, axis=-1)
        o = jnp.einsum("bhts,bhsd->bhtd", a, vh).transpose(0, 2, 1, 3).reshape(B, T, C)
        y = jnp.einsum("btc,cf->btf", o, p["out_w"]) + p["out_b"]
        x = _layer_norm(x + y, p["ln1_g"], p["ln1_b"])
        xm = x * mask_t
        xm_pad = jnp.pad(xm, ((0, 0), (pad, pad), (0, 0)))
        h = sum(jnp.einsum("btc,cf->btf", xm_pad[:, j:j + T, :], p["ffn_w1"][j])
                for j in range(kernel_size)) + p["ffn_b1"]
        h = jnp.maximum(h, 0.0)
        y2 = (jnp.einsum("btc,cf->btf", h * mask_t, p["ffn_w2"]) + p["ffn_b2"]) * mask_t
        x = _layer_norm(x + y2, p["ln2_g"], p["ln2_b"]) * mask_t
    return jnp.transpose(x, (0, 2, 1))


if __name__ == "__main__":
    B, C, T = 2, 32, 16
    n_heads, num_layers, kernel_size, ffn_scale = 4, 2, 3, 4

    key = jax.random.PRNGKey(0)
    kx, kp = jax.random.split(key, 2)

    # inputs in PyTorch layout: x (B, C, T), mask (B, 1, T)
    x_bct = jax.random.normal(kx, (B, C, T), dtype=jnp.float32)
    lengths = jnp.array([T, T - 5])
    mask_b1t = (jnp.arange(T)[None, :] < lengths[:, None]).astype(jnp.float32)[:, None, :]

    layer_params = init_params(kp, num_layers, C, ffn_scale, kernel_size)

    ref = jax.block_until_ready(
        reference_forward(x_bct, mask_b1t, layer_params,
                          n_heads=n_heads, kernel_size=kernel_size))

    # strict fp32 MXU path (approx-reciprocal softmax is the only approximation)
    out_f32 = jax.block_until_ready(
        transformer_forward(x_bct, mask_b1t, layer_params,
                            n_heads=n_heads, kernel_size=kernel_size,
                            matmul_dtype=jnp.float32))
    assert out_f32.shape == (B, C, T)
    max_err = float(jnp.max(jnp.abs(out_f32 - ref)))
    assert max_err < 2e-2, f"fp32 mismatch vs reference: {max_err}"

    # default bf16 MXU path: bf16 weights/operands, f32 accumulation, f32
    # elementwise math -> loose tolerance vs the fp32 reference.
    out_bf16 = jax.block_until_ready(
        transformer_forward(x_bct, mask_b1t, layer_params,
                            n_heads=n_heads, kernel_size=kernel_size))
    max_err_bf16 = float(jnp.max(jnp.abs(out_bf16 - ref)))
    assert max_err_bf16 < 1.5e-1, f"bf16 mismatch vs reference: {max_err_bf16}"

    print("KERNEL_OK")
</pallas_src>

<mosaic_0001>
module attributes {stable_mosaic.version = 11 : i64} {
  func.func @transformer_kernel(%arg0: i32, %arg1: memref<2x16x128xf32, #tpu.memory_space<vmem>>, %arg2: memref<2x16x1xf32, #tpu.memory_space<vmem>>, %arg3: memref<2x1x16xf32, #tpu.memory_space<vmem>>, %arg4: memref<1x128x384xf32, #tpu.memory_space<vmem>>, %arg5: memref<1x1x384xf32, #tpu.memory_space<vmem>>, %arg6: memref<1x128x128xf32, #tpu.memory_space<vmem>>, %arg7: memref<1x1x128xf32, #tpu.memory_space<vmem>>, %arg8: memref<1x1x128xf32, #tpu.memory_space<vmem>>, %arg9: memref<1x1x128xf32, #tpu.memory_space<vmem>>, %arg10: memref<1x384x128xf32, #tpu.memory_space<vmem>>, %arg11: memref<1x1x128xf32, #tpu.memory_space<vmem>>, %arg12: memref<1x128x128xf32, #tpu.memory_space<vmem>>, %arg13: memref<1x1x128xf32, #tpu.memory_space<vmem>>, %arg14: memref<1x1x128xf32, #tpu.memory_space<vmem>>, %arg15: memref<1x1x128xf32, #tpu.memory_space<vmem>>, %arg16: memref<2x16x128xf32, #tpu.memory_space<vmem>>) attributes {dimension_semantics = [#tpu.dimension_semantics<arbitrary>], iteration_bounds = array<i64: 2>, scalar_prefetch = 0 : i64, scratch_operands = 0 : i64, tpu.core_type = #tpu.core_type<tc>, window_params = [{pipeline_mode = #tpu.pipeline_mode<synchronous>, transform_indices = @transform_0, window_bounds = array<i64: 2, 16, 128>}, {pipeline_mode = #tpu.pipeline_mode<synchronous>, transform_indices = @transform_1, window_bounds = array<i64: 2, 16, 1>}, {pipeline_mode = #tpu.pipeline_mode<synchronous>, transform_indices = @transform_2, window_bounds = array<i64: 2, 1, 16>}, {transform_indices = @transform_3, window_bounds = array<i64: 1, 128, 384>}, {transform_indices = @transform_4, window_bounds = array<i64: 1, 1, 384>}, {transform_indices = @transform_5, window_bounds = array<i64: 1, 128, 128>}, {transform_indices = @transform_6, window_bounds = array<i64: 1, 1, 128>}, {transform_indices = @transform_7, window_bounds = array<i64: 1, 1, 128>}, {transform_indices = @transform_8, window_bounds = array<i64: 1, 1, 128>}, {transform_indices = @transform_9, window_bounds = array<i64: 1, 384, 128>}, {transform_indices = @transform_10, window_bounds = array<i64: 1, 1, 128>}, {transform_indices = @transform_11, window_bounds = array<i64: 1, 128, 128>}, {transform_indices = @transform_12, window_bounds = array<i64: 1, 1, 128>}, {transform_indices = @transform_13, window_bounds = array<i64: 1, 1, 128>}, {transform_indices = @transform_14, window_bounds = array<i64: 1, 1, 128>}, {pipeline_mode = #tpu.pipeline_mode<synchronous>, transform_indices = @transform_15, window_bounds = array<i64: 2, 16, 128>}]} {
    %c0_i32 = arith.constant 0 : i32
    %0 = arith.cmpi eq, %arg0, %c0_i32 : i32
    %1 = arith.extui %0 : i1 to i32
    %c0_i32_0 = arith.constant 0 : i32
    %2 = arith.cmpi ne, %1, %c0_i32_0 : i32
    scf.if %2 {
      %c0_70 = arith.constant 0 : index
      %c0_71 = arith.constant 0 : index
      %c0_72 = arith.constant 0 : index
      %159 = vector.load %arg1[%c0_70, %c0_71, %c0_72] : memref<2x16x128xf32, #tpu.memory_space<vmem>>, vector<2x16x128xf32>
      %c0_73 = arith.constant 0 : index
      %c0_74 = arith.constant 0 : index
      %c0_75 = arith.constant 0 : index
      %160 = vector.load %arg16[%c0_73, %c0_74, %c0_75] : memref<2x16x128xf32, #tpu.memory_space<vmem>>, vector<2x16x128xf32>
      tpu.vector_store %arg16[%c0_73, %c0_74, %c0_75], %159 {strides = array<i32>} : memref<2x16x128xf32, #tpu.memory_space<vmem>>, vector<2x16x128xf32>,
    } else {
    }
    %c0 = arith.constant 0 : index
    %c0_1 = arith.constant 0 : index
    %c0_2 = arith.constant 0 : index
    %3 = vector.load %arg2[%c0, %c0_1, %c0_2] : memref<2x16x1xf32, #tpu.memory_space<vmem>>, vector<2x16x1xf32>
    %c0_3 = arith.constant 0 : index
    %c0_4 = arith.constant 0 : index
    %c0_5 = arith.constant 0 : index
    %4 = vector.load %arg3[%c0_3, %c0_4, %c0_5] : memref<2x1x16xf32, #tpu.memory_space<vmem>>, vector<2x1x16xf32>
    %5 = vector.shape_cast %3 : vector<2x16x1xf32> to vector<32x1xf32>
    %6 = vector.broadcast %3 : vector<2x16x1xf32> to vector<2x16x16xf32>
    %7 = vector.broadcast %4 : vector<2x1x16xf32> to vector<2x16x16xf32>
    %8 = arith.mulf %6, %7 : vector<2x16x16xf32>
    %9 = vector.shape_cast %8 : vector<2x16x16xf32> to vector<2x1x16x16xf32>
    %10 = vector.shape_cast %9 : vector<2x1x16x16xf32> to vector<2x1x16x16xf32>
    %11 = vector.broadcast %10 : vector<2x1x16x16xf32> to vector<2x4x16x16xf32>
    %12 = vector.shape_cast %11 : vector<2x4x16x16xf32> to vector<8x16x16xf32>
    %13 = tpu.iota {dimensions = array<i32: 2>} : vector<1x1x128xi32>
    %c32_i32 = arith.constant 32 : i32
    %14 = vector.broadcast %c32_i32 : i32 to vector<1x1x128xi32>
    %15 = arith.cmpi slt, %13, %14 : vector<1x1x128xi32>
    %16 = arith.extui %15 : vector<1x1x128xi1> to vector<1x1x128xi32>
    %17 = arith.sitofp %16 : vector<1x1x128xi32> to vector<1x1x128xf32>
    %c0_6 = arith.constant 0 : index
    %c0_7 = arith.constant 0 : index
    %c0_8 = arith.constant 0 : index
    %18 = vector.load %arg16[%c0_6, %c0_7, %c0_8] : memref<2x16x128xf32, #tpu.memory_space<vmem>>, vector<2x16x128xf32>
    %19 = vector.shape_cast %18 : vector<2x16x128xf32> to vector<32x128xf32>
    %c0_9 = arith.constant 0 : index
    %c0_10 = arith.constant 0 : index
    %c0_11 = arith.constant 0 : index
    %20 = vector.load %arg4[%c0_9, %c0_10, %c0_11] : memref<1x128x384xf32, #tpu.memory_space<vmem>>, vector<1x128x384xf32>
    %21 = vector.shape_cast %20 : vector<1x128x384xf32> to vector<128x384xf32>
    %cst = arith.constant dense<0.000000e+00> : vector<32x384xf32>
    %22 = tpu.matmul %19, %21, %cst {dimension_numbers = #tpu.dot_dimension_numbers<[1], [0], [0], [1], [0, 0, 1, 1], [], []>} : vector<32x128xf32>, vector<128x384xf32>, vector<32x384xf32> -> vector<32x384xf32>
    %c0_12 = arith.constant 0 : index
    %c0_13 = arith.constant 0 : index
    %c0_14 = arith.constant 0 : index
    %23 = vector.load %arg5[%c0_12, %c0_13, %c0_14] : memref<1x1x384xf32, #tpu.memory_space<vmem>>, vector<1x1x384xf32>
    %24 = vector.shape_cast %23 : vector<1x1x384xf32> to vector<1x384xf32>
    %25 = vector.broadcast %24 : vector<1x384xf32> to vector<32x384xf32>
    %26 = arith.addf %22, %25 : vector<32x384xf32>
    %27 = vector.extract_strided_slice %26 {offsets = [0, 0], sizes = [32, 128], strides = [1, 1]} : vector<32x384xf32> to vector<32x128xf32>
    %28 = vector.shape_cast %27 : vector<32x128xf32> to vector<2x16x4x32xf32>
    %29 = tpu.transpose %28, [0, 2, 1, 3] : vector<2x16x4x32xf32> -> vector<2x4x16x32xf32>
    %30 = vector.shape_cast %29 : vector<2x4x16x32xf32> to vector<8x16x32xf32>
    %31 = vector.extract_strided_slice %26 {offsets = [0, 128], sizes = [32, 128], strides = [1, 1]} : vector<32x384xf32> to vector<32x128xf32>
    %32 = vector.shape_cast %31 : vector<32x128xf32> to vector<2x16x4x32xf32>
    %33 = tpu.transpose %32, [0, 2, 1, 3] : vector<2x16x4x32xf32> -> vector<2x4x16x32xf32>
    %34 = vector.shape_cast %33 : vector<2x4x16x32xf32> to vector<8x16x32xf32>
    %35 = vector.extract_strided_slice %26 {offsets = [0, 256], sizes = [32, 128], strides = [1, 1]} : vector<32x384xf32> to vector<32x128xf32>
    %36 = vector.shape_cast %35 : vector<32x128xf32> to vector<2x16x4x32xf32>
    %37 = tpu.transpose %36, [0, 2, 1, 3] : vector<2x16x4x32xf32> -> vector<2x4x16x32xf32>
    %38 = vector.shape_cast %37 : vector<2x4x16x32xf32> to vector<8x16x32xf32>
    "tpu.trace_start"() <{level = 10 : i32, message = "ntd,nsd->nts"}> : () -> ()
    %cst_15 = arith.constant dense<0.000000e+00> : vector<8x16x16xf32>
    %39 = tpu.matmul %30, %34, %cst_15 {dimension_numbers = #tpu.dot_dimension_numbers<[2], [2], [1], [1], [0, 0, 0, 1, 1, 1], [0], [0]>} : vector<8x16x32xf32>, vector<8x16x32xf32>, vector<8x16x16xf32> -> vector<8x16x16xf32>
    "tpu.trace_stop"() : () -> ()
    %cst_16 = arith.constant 0.353553385 : f32
    %40 = vector.broadcast %cst_16 : f32 to vector<8x16x16xf32>
    %41 = arith.mulf %39, %40 : vector<8x16x16xf32>
    %cst_17 = arith.constant 0.000000e+00 : f32
    %42 = vector.broadcast %cst_17 : f32 to vector<8x16x16xf32>
    %43 = arith.cmpf oeq, %12, %42 : vector<8x16x16xf32>
    %cst_18 = arith.constant -1.000000e+04 : f32
    %44 = vector.broadcast %cst_18 : f32 to vector<8x16x16xf32>
    %45 = arith.select %43, %44, %41 : vector<8x16x16xi1>, vector<8x16x16xf32>
    %cst_19 = arith.constant dense<0xFF800000> : vector<8x16xf32>
    %46 = vector.multi_reduction <maximumf>, %45, %cst_19 [2] : vector<8x16x16xf32> to vector<8x16xf32>
    %47 = vector.shape_cast %46 : vector<8x16xf32> to vector<8x16x1xf32>
    %48 = vector.broadcast %47 : vector<8x16x1xf32> to vector<8x16x16xf32>
    %49 = arith.subf %45, %48 : vector<8x16x16xf32>
    %50 = math.exp %49 : vector<8x16x16xf32>
    %cst_20 = arith.constant dense<0.000000e+00> : vector<8x16xf32>
    %51 = vector.multi_reduction <add>, %50, %cst_20 [2] : vector<8x16x16xf32> to vector<8x16xf32>
    %52 = vector.shape_cast %51 : vector<8x16xf32> to vector<8x16x1xf32>
    %53 = tpu.reciprocal %52 {approx = true} : vector<8x16x1xf32> -> vector<8x16x1xf32>
    %54 = vector.broadcast %53 : vector<8x16x1xf32> to vector<8x16x16xf32>
    %55 = arith.mulf %50, %54 : vector<8x16x16xf32>
    "tpu.trace_start"() <{level = 10 : i32, message = "nts,nsd->ntd"}> : () -> ()
    %cst_21 = arith.constant dense<0.000000e+00> : vector<8x16x32xf32>
    %56 = tpu.matmul %55, %38, %cst_21 {dimension_numbers = #tpu.dot_dimension_numbers<[2], [1], [1], [2], [0, 0, 0, 1, 1, 2], [0], [0]>} : vector<8x16x16xf32>, vector<8x16x32xf32>, vector<8x16x32xf32> -> vector<8x16x32xf32>
    "tpu.trace_stop"() : () -> ()
    %57 = vector.shape_cast %56 : vector<8x16x32xf32> to vector<2x4x16x32xf32>
    %58 = tpu.transpose %57, [0, 2, 1, 3] : vector<2x4x16x32xf32> -> vector<2x16x4x32xf32>
    %59 = vector.shape_cast %58 : vector<2x16x4x32xf32> to vector<32x128xf32>
    %c0_22 = arith.constant 0 : index
    %c0_23 = arith.constant 0 : index
    %c0_24 = arith.constant 0 : index
    %60 = vector.load %arg6[%c0_22, %c0_23, %c0_24] : memref<1x128x128xf32, #tpu.memory_space<vmem>>, vector<1x128x128xf32>
    %61 = vector.shape_cast %60 : vector<1x128x128xf32> to vector<128x128xf32>
    %cst_25 = arith.constant dense<0.000000e+00> : vector<32x128xf32>
    %62 = tpu.matmul %59, %61, %cst_25 {dimension_numbers = #tpu.dot_dimension_numbers<[1], [0], [0], [1], [0, 0, 1, 1], [], []>} : vector<32x128xf32>, vector<128x128xf32>, vector<32x128xf32> -> vector<32x128xf32>
    %c0_26 = arith.constant 0 : index
    %c0_27 = arith.constant 0 : index
    %c0_28 = arith.constant 0 : index
    %63 = vector.load %arg7[%c0_26, %c0_27, %c0_28] : memref<1x1x128xf32, #tpu.memory_space<vmem>>, vector<1x1x128xf32>
    %64 = vector.shape_cast %63 : vector<1x1x128xf32> to vector<1x128xf32>
    %65 = vector.broadcast %64 : vector<1x128xf32> to vector<32x128xf32>
    %66 = arith.addf %62, %65 : vector<32x128xf32>
    %67 = vector.shape_cast %66 : vector<32x128xf32> to vector<2x16x128xf32>
    %68 = arith.addf %18, %67 : vector<2x16x128xf32>
    %c0_29 = arith.constant 0 : index
    %c0_30 = arith.constant 0 : index
    %c0_31 = arith.constant 0 : index
    %69 = vector.load %arg8[%c0_29, %c0_30, %c0_31] : memref<1x1x128xf32, #tpu.memory_space<vmem>>, vector<1x1x128xf32>
    %70 = vector.shape_cast %69 : vector<1x1x128xf32> to vector<1x128xf32>
    %c0_32 = arith.constant 0 : index
    %c0_33 = arith.constant 0 : index
    %c0_34 = arith.constant 0 : index
    %71 = vector.load %arg9[%c0_32, %c0_33, %c0_34] : memref<1x1x128xf32, #tpu.memory_space<vmem>>, vector<1x1x128xf32>
    %72 = vector.shape_cast %71 : vector<1x1x128xf32> to vector<1x128xf32>
    %cst_35 = arith.constant dense<0.000000e+00> : vector<2x16xf32>
    %73 = vector.multi_reduction <add>, %68, %cst_35 [2] : vector<2x16x128xf32> to vector<2x16xf32>
    %74 = vector.shape_cast %73 : vector<2x16xf32> to vector<2x16x1xf32>
    %cst_36 = arith.constant 3.125000e-02 : f32
    %75 = vector.broadcast %cst_36 : f32 to vector<2x16x1xf32>
    %76 = arith.mulf %74, %75 : vector<2x16x1xf32>
    %77 = vector.broadcast %76 : vector<2x16x1xf32> to vector<2x16x128xf32>
    %78 = arith.subf %68, %77 : vector<2x16x128xf32>
    %79 = vector.broadcast %17 : vector<1x1x128xf32> to vector<2x16x128xf32>
    %80 = arith.mulf %78, %79 : vector<2x16x128xf32>
    %81 = arith.mulf %80, %80 : vector<2x16x128xf32>
    %cst_37 = arith.constant dense<0.000000e+00> : vector<2x16xf32>
    %82 = vector.multi_reduction <add>, %81, %cst_37 [2] : vector<2x16x128xf32> to vector<2x16xf32>
    %83 = vector.shape_cast %82 : vector<2x16xf32> to vector<2x16x1xf32>
    %cst_38 = arith.constant 3.125000e-02 : f32
    %84 = vector.broadcast %cst_38 : f32 to vector<2x16x1xf32>
    %85 = arith.mulf %83, %84 : vector<2x16x1xf32>
    %cst_39 = arith.constant 9.99999974E-6 : f32
    %86 = vector.broadcast %cst_39 : f32 to vector<2x16x1xf32>
    %87 = arith.addf %85, %86 : vector<2x16x1xf32>
    %88 = math.rsqrt %87 : vector<2x16x1xf32>
    %89 = vector.broadcast %88 : vector<2x16x1xf32> to vector<2x16x128xf32>
    %90 = arith.mulf %80, %89 : vector<2x16x128xf32>
    %91 = vector.shape_cast %70 : vector<1x128xf32> to vector<1x1x128xf32>
    %92 = vector.broadcast %91 : vector<1x1x128xf32> to vector<2x16x128xf32>
    %93 = arith.mulf %90, %92 : vector<2x16x128xf32>
    %94 = vector.shape_cast %72 : vector<1x128xf32> to vector<1x1x128xf32>
    %95 = vector.broadcast %94 : vector<1x1x128xf32> to vector<2x16x128xf32>
    %96 = arith.addf %93, %95 : vector<2x16x128xf32>
    %97 = vector.broadcast %3 : vector<2x16x1xf32> to vector<2x16x128xf32>
    %98 = arith.mulf %96, %97 : vector<2x16x128xf32>
    %cst_40 = arith.constant 0.000000e+00 : f32
    %99 = vector.broadcast %cst_40 : f32 to vector<2x1x128xf32>
    %100 = tpu.concatenate %99, %98, %99 in 1 : vector<2x1x128xf32>, vector<2x16x128xf32>, vector<2x1x128xf32> -> vector<2x18x128xf32>
    %101 = vector.extract_strided_slice %100 {offsets = [0, 0, 0], sizes = [2, 16, 128], strides = [1, 1, 1]} : vector<2x18x128xf32> to vector<2x16x128xf32>
    %102 = vector.extract_strided_slice %100 {offsets = [0, 1, 0], sizes = [2, 16, 128], strides = [1, 1, 1]} : vector<2x18x128xf32> to vector<2x16x128xf32>
    %103 = vector.extract_strided_slice %100 {offsets = [0, 2, 0], sizes = [2, 16, 128], strides = [1, 1, 1]} : vector<2x18x128xf32> to vector<2x16x128xf32>
    %104 = tpu.concatenate %101, %102, %103 in 2 : vector<2x16x128xf32>, vector<2x16x128xf32>, vector<2x16x128xf32> -> vector<2x16x384xf32>
    %105 = vector.shape_cast %104 : vector<2x16x384xf32> to vector<32x384xf32>
    %c0_41 = arith.constant 0 : index
    %c0_42 = arith.constant 0 : index
    %c0_43 = arith.constant 0 : index
    %106 = vector.load %arg10[%c0_41, %c0_42, %c0_43] : memref<1x384x128xf32, #tpu.memory_space<vmem>>, vector<1x384x128xf32>
    %107 = vector.shape_cast %106 : vector<1x384x128xf32> to vector<384x128xf32>
    %cst_44 = arith.constant dense<0.000000e+00> : vector<32x128xf32>
    %108 = tpu.matmul %105, %107, %cst_44 {dimension_numbers = #tpu.dot_dimension_numbers<[1], [0], [0], [1], [0, 0, 1, 1], [], []>} : vector<32x384xf32>, vector<384x128xf32>, vector<32x128xf32> -> vector<32x128xf32>
    %c0_45 = arith.constant 0 : index
    %c0_46 = arith.constant 0 : index
    %c0_47 = arith.constant 0 : index
    %109 = vector.load %arg11[%c0_45, %c0_46, %c0_47] : memref<1x1x128xf32, #tpu.memory_space<vmem>>, vector<1x1x128xf32>
    %110 = vector.shape_cast %109 : vector<1x1x128xf32> to vector<1x128xf32>
    %111 = vector.broadcast %110 : vector<1x128xf32> to vector<32x128xf32>
    %112 = arith.addf %108, %111 : vector<32x128xf32>
    %cst_48 = arith.constant 0.000000e+00 : f32
    %113 = vector.broadcast %cst_48 : f32 to vector<32x128xf32>
    %114 = arith.maximumf %112, %113 : vector<32x128xf32>
    %115 = vector.broadcast %5 : vector<32x1xf32> to vector<32x128xf32>
    %116 = arith.mulf %114, %115 : vector<32x128xf32>
    %c0_49 = arith.constant 0 : index
    %c0_50 = arith.constant 0 : index
    %c0_51 = arith.constant 0 : index
    %117 = vector.load %arg12[%c0_49, %c0_50, %c0_51] : memref<1x128x128xf32, #tpu.memory_space<vmem>>, vector<1x128x128xf32>
    %118 = vector.shape_cast %117 : vector<1x128x128xf32> to vector<128x128xf32>
    %cst_52 = arith.constant dense<0.000000e+00> : vector<32x128xf32>
    %119 = tpu.matmul %116, %118, %cst_52 {dimension_numbers = #tpu.dot_dimension_numbers<[1], [0], [0], [1], [0, 0, 1, 1], [], []>} : vector<32x128xf32>, vector<128x128xf32>, vector<32x128xf32> -> vector<32x128xf32>
    %c0_53 = arith.constant 0 : index
    %c0_54 = arith.constant 0 : index
    %c0_55 = arith.constant 0 : index
    %120 = vector.load %arg13[%c0_53, %c0_54, %c0_55] : memref<1x1x128xf32, #tpu.memory_space<vmem>>, vector<1x1x128xf32>
    %121 = vector.shape_cast %120 : vector<1x1x128xf32> to vector<1x128xf32>
    %122 = vector.broadcast %121 : vector<1x128xf32> to vector<32x128xf32>
    %123 = arith.addf %119, %122 : vector<32x128xf32>
    %124 = vector.broadcast %5 : vector<32x1xf32> to vector<32x128xf32>
    %125 = arith.mulf %123, %124 : vector<32x128xf32>
    %126 = vector.shape_cast %125 : vector<32x128xf32> to vector<2x16x128xf32>
    %127 = arith.addf %96, %126 : vector<2x16x128xf32>
    %c0_56 = arith.constant 0 : index
    %c0_57 = arith.constant 0 : index
    %c0_58 = arith.constant 0 : index
    %128 = vector.load %arg14[%c0_56, %c0_57, %c0_58] : memref<1x1x128xf32, #tpu.memory_space<vmem>>, vector<1x1x128xf32>
    %129 = vector.shape_cast %128 : vector<1x1x128xf32> to vector<1x128xf32>
    %c0_59 = arith.constant 0 : index
    %c0_60 = arith.constant 0 : index
    %c0_61 = arith.constant 0 : index
    %130 = vector.load %arg15[%c0_59, %c0_60, %c0_61] : memref<1x1x128xf32, #tpu.memory_space<vmem>>, vector<1x1x128xf32>
    %131 = vector.shape_cast %130 : vector<1x1x128xf32> to vector<1x128xf32>
    %cst_62 = arith.constant dense<0.000000e+00> : vector<2x16xf32>
    %132 = vector.multi_reduction <add>, %127, %cst_62 [2] : vector<2x16x128xf32> to vector<2x16xf32>
    %133 = vector.shape_cast %132 : vector<2x16xf32> to vector<2x16x1xf32>
    %cst_63 = arith.constant 3.125000e-02 : f32
    %134 = vector.broadcast %cst_63 : f32 to vector<2x16x1xf32>
    %135 = arith.mulf %133, %134 : vector<2x16x1xf32>
    %136 = vector.broadcast %135 : vector<2x16x1xf32> to vector<2x16x128xf32>
    %137 = arith.subf %127, %136 : vector<2x16x128xf32>
    %138 = vector.broadcast %17 : vector<1x1x128xf32> to vector<2x16x128xf32>
    %139 = arith.mulf %137, %138 : vector<2x16x128xf32>
    %140 = arith.mulf %139, %139 : vector<2x16x128xf32>
    %cst_64 = arith.constant dense<0.000000e+00> : vector<2x16xf32>
    %141 = vector.multi_reduction <add>, %140, %cst_64 [2] : vector<2x16x128xf32> to vector<2x16xf32>
    %142 = vector.shape_cast %141 : vector<2x16xf32> to vector<2x16x1xf32>
    %cst_65 = arith.constant 3.125000e-02 : f32
    %143 = vector.broadcast %cst_65 : f32 to vector<2x16x1xf32>
    %144 = arith.mulf %142, %143 : vector<2x16x1xf32>
    %cst_66 = arith.constant 9.99999974E-6 : f32
    %145 = vector.broadcast %cst_66 : f32 to vector<2x16x1xf32>
    %146 = arith.addf %144, %145 : vector<2x16x1xf32>
    %147 = math.rsqrt %146 : vector<2x16x1xf32>
    %148 = vector.broadcast %147 : vector<2x16x1xf32> to vector<2x16x128xf32>
    %149 = arith.mulf %139, %148 : vector<2x16x128xf32>
    %150 = vector.shape_cast %129 : vector<1x128xf32> to vector<1x1x128xf32>
    %151 = vector.broadcast %150 : vector<1x1x128xf32> to vector<2x16x128xf32>
    %152 = arith.mulf %149, %151 : vector<2x16x128xf32>
    %153 = vector.shape_cast %131 : vector<1x128xf32> to vector<1x1x128xf32>
    %154 = vector.broadcast %153 : vector<1x1x128xf32> to vector<2x16x128xf32>
    %155 = arith.addf %152, %154 : vector<2x16x128xf32>
    %156 = vector.broadcast %3 : vector<2x16x1xf32> to vector<2x16x128xf32>
    %157 = arith.mulf %155, %156 : vector<2x16x128xf32>
    %c0_67 = arith.constant 0 : index
    %c0_68 = arith.constant 0 : index
    %c0_69 = arith.constant 0 : index
    %158 = vector.load %arg16[%c0_67, %c0_68, %c0_69] : memref<2x16x128xf32, #tpu.memory_space<vmem>>, vector<2x16x128xf32>
    tpu.vector_store %arg16[%c0_67, %c0_68, %c0_69], %157 {strides = array<i32>} : memref<2x16x128xf32, #tpu.memory_space<vmem>>, vector<2x16x128xf32>,
    return
  }
  func.func @transform_0(%arg0: i32) -> (i32, i32, i32) {
    %c0_i32 = arith.constant 0 : i32
    %c0_i32_0 = arith.constant 0 : i32
    %c0_i32_1 = arith.constant 0 : i32
    %c0_i32_2 = arith.constant 0 : i32
    return %c0_i32, %c0_i32_0, %c0_i32_1 : i32, i32, i32
  }
  func.func @transform_1(%arg0: i32) -> (i32, i32, i32) {
    %c0_i32 = arith.constant 0 : i32
    %c0_i32_0 = arith.constant 0 : i32
    %c0_i32_1 = arith.constant 0 : i32
    %c0_i32_2 = arith.constant 0 : i32
    return %c0_i32, %c0_i32_0, %c0_i32_1 : i32, i32, i32
  }
  func.func @transform_2(%arg0: i32) -> (i32, i32, i32) {
    %c0_i32 = arith.constant 0 : i32
    %c0_i32_0 = arith.constant 0 : i32
    %c0_i32_1 = arith.constant 0 : i32
    %c0_i32_2 = arith.constant 0 : i32
    return %c0_i32, %c0_i32_0, %c0_i32_1 : i32, i32, i32
  }
  func.func @transform_3(%arg0: i32) -> (i32, i32, i32) {
    %c0_i32 = arith.constant 0 : i32
    %c0_i32_0 = arith.constant 0 : i32
    %c0_i32_1 = arith.constant 0 : i32
    return %arg0, %c0_i32, %c0_i32_0 : i32, i32, i32
  }
  func.func @transform_4(%arg0: i32) -> (i32, i32, i32) {
    %c0_i32 = arith.constant 0 : i32
    %c0_i32_0 = arith.constant 0 : i32
    %c0_i32_1 = arith.constant 0 : i32
    return %arg0, %c0_i32, %c0_i32_0 : i32, i32, i32
  }
  func.func @transform_5(%arg0: i32) -> (i32, i32, i32) {
    %c0_i32 = arith.constant 0 : i32
    %c0_i32_0 = arith.constant 0 : i32
    %c0_i32_1 = arith.constant 0 : i32
    return %arg0, %c0_i32, %c0_i32_0 : i32, i32, i32
  }
  func.func @transform_6(%arg0: i32) -> (i32, i32, i32) {
    %c0_i32 = arith.constant 0 : i32
    %c0_i32_0 = arith.constant 0 : i32
    %c0_i32_1 = arith.constant 0 : i32
    return %arg0, %c0_i32, %c0_i32_0 : i32, i32, i32
  }
  func.func @transform_7(%arg0: i32) -> (i32, i32, i32) {
    %c0_i32 = arith.constant 0 : i32
    %c0_i32_0 = arith.constant 0 : i32
    %c0_i32_1 = arith.constant 0 : i32
    return %arg0, %c0_i32, %c0_i32_0 : i32, i32, i32
  }
  func.func @transform_8(%arg0: i32) -> (i32, i32, i32) {
    %c0_i32 = arith.constant 0 : i32
    %c0_i32_0 = arith.constant 0 : i32
    %c0_i32_1 = arith.constant 0 : i32
    return %arg0, %c0_i32, %c0_i32_0 : i32, i32, i32
  }
  func.func @transform_9(%arg0: i32) -> (i32, i32, i32) {
    %c0_i32 = arith.constant 0 : i32
    %c0_i32_0 = arith.constant 0 : i32
    %c0_i32_1 = arith.constant 0 : i32
    return %arg0, %c0_i32, %c0_i32_0 : i32, i32, i32
  }
  func.func @transform_10(%arg0: i32) -> (i32, i32, i32) {
    %c0_i32 = arith.constant 0 : i32
    %c0_i32_0 = arith.constant 0 : i32
    %c0_i32_1 = arith.constant 0 : i32
    return %arg0, %c0_i32, %c0_i32_0 : i32, i32, i32
  }
  func.func @transform_11(%arg0: i32) -> (i32, i32, i32) {
    %c0_i32 = arith.constant 0 : i32
    %c0_i32_0 = arith.constant 0 : i32
    %c0_i32_1 = arith.constant 0 : i32
    return %arg0, %c0_i32, %c0_i32_0 : i32, i32, i32
  }
  func.func @transform_12(%arg0: i32) -> (i32, i32, i32) {
    %c0_i32 = arith.constant 0 : i32
    %c0_i32_0 = arith.constant 0 : i32
    %c0_i32_1 = arith.constant 0 : i32
    return %arg0, %c0_i32, %c0_i32_0 : i32, i32, i32
  }
  func.func @transform_13(%arg0: i32) -> (i32, i32, i32) {
    %c0_i32 = arith.constant 0 : i32
    %c0_i32_0 = arith.constant 0 : i32
    %c0_i32_1 = arith.constant 0 : i32
    return %arg0, %c0_i32, %c0_i32_0 : i32, i32, i32
  }
  func.func @transform_14(%arg0: i32) -> (i32, i32, i32) {
    %c0_i32 = arith.constant 0 : i32
    %c0_i32_0 = arith.constant 0 : i32
    %c0_i32_1 = arith.constant 0 : i32
    return %arg0, %c0_i32, %c0_i32_0 : i32, i32, i32
  }
  func.func @transform_15(%arg0: i32) -> (i32, i32, i32) {
    %c0_i32 = arith.constant 0 : i32
    %c0_i32_0 = arith.constant 0 : i32
    %c0_i32_1 = arith.constant 0 : i32
    %c0_i32_2 = arith.constant 0 : i32
    return %c0_i32, %c0_i32_0, %c0_i32_1 : i32, i32, i32
  }
}

</mosaic_0001>

<bundles_post_ra>
// kernel: tpu_custom_call.1
= control target key start
LH: loop header
LB: loop body
LE: loop exit
PB: predicated region body
PF: predicated region fallthrough
CT: control target
= control target key end

     0   :  { %s7157_s0 = inlined_call_operand.vmem [shape: f32[2,16,128], index: 0, kind: input, shape index: {}]   ;;  %s7158_s1 = inlined_call_operand.vmem [shape: f32[2,16,1], index: 1, kind: input, shape index: {}]   ;;  %s7159_s2 = inlined_call_operand.vmem [shape: f32[2,1,16], index: 2, kind: input, shape index: {}]   ;;  %s7160_s3 = inlined_call_operand.hbm [shape: f32[2,128,384], index: 3, kind: input, shape index: {}]   ;;  %s7161_s4 = inlined_call_operand.hbm [shape: f32[2,1,384], index: 4, kind: input, shape index: {}]   ;;  %s7162_s5 = inlined_call_operand.hbm [shape: f32[2,128,128], index: 5, kind: input, shape index: {}]   ;;  %s7163_s6 = inlined_call_operand.vmem [shape: f32[2,1,128], index: 6, kind: input, shape index: {}]   ;;  %s7164_s7 = inlined_call_operand.vmem [shape: f32[2,1,128], index: 7, kind: input, shape index: {}]   ;;  %s7165_s8 = inlined_call_operand.vmem [shape: f32[2,1,128], index: 8, kind: input, shape index: {}]   ;;  %s7166_s9 = inlined_call_operand.hbm [shape: f32[2,384,128], index: 9, kind: input, shape index: {}]   ;;  %s7167_s10 = inlined_call_operand.vmem [shape: f32[2,1,128], index: 10, kind: input, shape index: {}]   ;;  %s7168_s11 = inlined_call_operand.hbm [shape: f32[2,128,128], index: 11, kind: input, shape index: {}]   ;;  %s7169_s12 = inlined_call_operand.vmem [shape: f32[2,1,128], index: 12, kind: input, shape index: {}]   ;;  %s7170_s13 = inlined_call_operand.vmem [shape: f32[2,1,128], index: 13, kind: input, shape index: {}]   ;;  %s7171_s14 = inlined_call_operand.hbm [shape: f32[2,1,128], index: 14, kind: input, shape index: {}]   ;;  %s7172_s15 = inlined_call_operand.hbm [shape: f32[2,16,128], index: 15, kind: output, shape index: {}]  }
   0x1   :  { %7184 = sst [smem:[#allocation22_spill]] %s7157_s0 }
   0x2   :  { %7185 = sst [smem:[#allocation23_spill]] %s7158_s1 }
   0x3   :  { %7186 = sst [smem:[#allocation24_spill]] %s7159_s2 }
   0x4   :  { %7187 = sst [smem:[#allocation25_spill]] %s7160_s3 }
   0x5   :  { %7188 = sst [smem:[#allocation26_spill]] %s7161_s4 }
   0x6   :  { %7189 = sst [smem:[#allocation27_spill]] %s7162_s5 }
   0x7   :  { %7190 = sst [smem:[#allocation28_spill]] %s7164_s7 }
   0x8   :  { %7191 = sst [smem:[#allocation29_spill]] %s7165_s8 }
   0x9   :  { %7192 = sst [smem:[#allocation30_spill]] %s7166_s9 }
   0xa   :  { %7193 = sst [smem:[#allocation31_spill]] %s7167_s10 }
   0xb   :  { %7194 = sst [smem:[#allocation32_spill]] %s7168_s11 }
   0xc   :  { %7195 = sst [smem:[#allocation33_spill]] %s7169_s12 }
   0xd   :  { %7196 = sst [smem:[#allocation34_spill]] %s7170_s13 }
   0xe   :  { %7197 = sst [smem:[#allocation35_spill]] %s7172_s15 }
   0xf   :  { %20 = vsyncpa [#allocation3], 0 }
  0x10   :  { %22 = vsyncpa [#allocation3 + $0x1], 0 }
  0x11   :  { %23 = vsyncpa [#allocation6], 0 }
  0x12   :  { %25 = vsyncpa [#allocation6 + $0x1], 0 }
  0x13   :  { %26 = vsyncpa [#allocation9], 0 }
  0x14   :  { %28 = vsyncpa [#allocation9 + $0x1], 0 }
  0x15   :  { %29 = vsyncpa [#allocation12], 0 }
  0x16   :  { %31 = vsyncpa [#allocation12 + $0x1], 0 }
  0x17   :  { %32 = vsyncpa [#allocation4], 0  ;;  %s5047_s18 = smov 0   ;;  %s5049_s19 = smov 0  }
  0x18   :  { %s5051_s20 = smov 0   ;;  %s5053_s21 = smov 0  }
  0x19 LB: > { %7198 = sst [smem:[#allocation19_spill]] %s4947_s20  ;;  %s5066_s22 = sadd.s32 4294967295, %s4951_s21   ;;  %s4951_s21 = sphi %s5053_s21, %s7240_s21   ;;  %s4947_s20 = sphi %s5051_s20, %s7242_s20   ;;  %s4943_s19 = sphi %s5049_s19, %s7244_s19   ;;  %s4939_s18 = sphi %s5047_s18, %s7243_s18  }
  0x1a   : > { %s5069_s23 = sadd.s32 1, %s4951_s21   ;;  %s108_s25 = sadd.s32 1, %s4947_s20 }
  0x1b   : > { %7199 = sst [smem:[#allocation20_spill]] %s5069_s23  ;;  %s105_s24 = ssub.s32 %s4951_s21, %s5069_s23 }
  0x1c   : > { %p106_p0 = scmp.eq.s32.totalorder %s105_s24, 0  ;;  %p115_p1 = scmp.ne.s32.totalorder %s4947_s20, %s4943_s19 }
  0x1d   : > { %p116_p2 = scmp.eq.s32.totalorder %s4951_s21, 0  ;;  %p121_p3 = scmp.ne.s32.totalorder %s4943_s19, %s4939_s18 }
  0x1e   : > { %s5079_s26 = scalar_select %p106_p0, %s4947_s20, %s108_s25  }
  0x1f   : > { %p117_p4 = por %p116_p2, %p115_p1  ;;  %p122_p5 = scmp.eq.s32.totalorder %s5066_s22, 0 }
  0x20   : > { %7200 = sst [smem:[#allocation21_spill]] %s5079_s26  ;;  %p4513_p6 = scmp.lt.s32.totalorder %s4951_s21, 2 }
  0x21   : > { %p5083_p7 = por %p122_p5, %p121_p3  ;;  %s5088_s28 = sand.u32 1, %s4947_s20  }
  0x22   : > { %p5090_p8 = pnand %p4513_p6, %p117_p4  ;;  %s7179_s30 = sand.u32 1, %s4951_s21  }
  0x23   : > { %s4472_s16 = smul.u32 3, %s5088_s28  ;;  %s7203_s4 = sld [smem:[#allocation26_spill]] }
  0x24   : > { %s4473_s17 = smul.u32 3, %s4951_s21  ;;  %p4405_p9 = scmp.ge.s32.totalorder %s4951_s21, 1 }
  0x25   : > { %s487_s26 = scalar_lea.vmem [#allocation5], %s4472_s16  ;;  %s5103_s20 = scalar_lea.sflag [#allocation6], %s7179_s30 }
  0x26   : > { %s495_s23 = sshll.u32 %s487_s26, 4  ;;  %p5107_p11 = pneg %p5090_p8  ;;  %s496_s23 = int_to_ptr.vmem [resolvable:$true] %s495_s23 }
  0x29   : > { %s491_s25 = scalar_lea.hbm %s7203_s4, %s4473_s17  ;;  %s4700_s17 = scalar_lea.hbm %s7203_s4, 6 }
  0x2a   : > { %s493_s15 = sshll.u32 %s491_s25, 4  ;;  %s494_s15 = int_to_ptr.hbm [resolvable:$true] %s493_s15 }
  0x2b   : > { %s4693_s2 = sshra.s32 %s494_s15, 4  ;;  %s4694_s2 = int_to_ptr.hbm [resolvable:$true] %s4693_s2 }
  0x2c   : > { %s4695_s1 = scalar_lea.hbm %s4694_s2, 3  ;;  %p4701_p0 = scmp.lt.s32.totalorder %s4694_s2, %s7203_s4 }
  0x2d   : > { %p4696_p10 = scmp.ne.s32.totalorder %s4694_s2, %s4695_s1  ;;  %p4702_p1 = scmp.lt.s32.totalorder %s4700_s17, %s4695_s1 }
  0x2f   : > { %p4698_p12 = pnand %p5107_p11, %p4696_p10  ;;  %p4703_p2 = por %p4702_p1, %p4701_p0 }
  0x31   : > { %p4699_p13 = pneg %p4698_p12 }
  0x33   : > { %p4704_p3 = pnand %p4703_p2, %p4699_p13 }
  0x35   : > { %4707 = shalt.err (!%p4704_p3)
}
  0x36   : > { %4500 = dma.hbm_to_vmem [thread:$0]  (!%p5090_p8), %s494_s15, 48, %s496_s23, %s5103_s20  }
  0x37   : > { %p619_p4 = scmp.lt.s32.totalorder %s4951_s21, 3  ;;  %s4470_s25 = smul.u32 384, %s5088_s28 }
  0x38   : > { %s4471_s26 = smul.u32 384, %s4951_s21  ;;  %s7206_s9 = sld [smem:[#allocation30_spill]] }
  0x39   : > { %p5127_p5 = pnand %p4405_p9, %p619_p4  ;;  %s546_s24 = scalar_lea.vmem [#allocation8], %s4470_s25 }
  0x3a   : > { %s554_s30 = sshll.u32 %s546_s24, 4  ;;  %s7207_s15 = sand.u32 1, %s4951_s21   ;;  %s555_s30 = int_to_ptr.vmem [resolvable:$true] %s554_s30 }
  0x3b   : > { %s5138_s23 = scalar_lea.sflag [#allocation9], %s7207_s15 }
  0x3e   : > { %s551_s17 = scalar_lea.hbm %s7206_s9, %s4471_s26  ;;  %s4730_s2 = scalar_lea.hbm %s7206_s9, 768 }
  0x3f   : > { %s552_s18 = sshll.u32 %s551_s17, 4  ;;  %s553_s18 = int_to_ptr.hbm [resolvable:$true] %s552_s18 }
  0x40   : > { %s4723_s4 = sshra.s32 %s553_s18, 4  ;;  %s4724_s4 = int_to_ptr.hbm [resolvable:$true] %s4723_s4 }
  0x41   : > { %s4725_s13 = scalar_lea.hbm %s4724_s4, 384  ;;  %p4731_p12 = scmp.lt.s32.totalorder %s4724_s4, %s7206_s9 }
  0x42   : > { %p4726_p6 = scmp.ne.s32.totalorder %s4724_s4, %s4725_s13  ;;  %p4732_p13 = scmp.lt.s32.totalorder %s4730_s2, %s4725_s13 }
  0x44   : > { %p4728_p9 = pnand %p4726_p6, %p5107_p11  ;;  %p4733_p0 = por %p4732_p13, %p4731_p12 }
  0x46   : > { %p4729_p10 = pneg %p4728_p9 }
  0x48   : > { %p4734_p1 = pnand %p4733_p0, %p4729_p10 }
  0x4a   : > { %4737 = shalt.err (!%p4734_p1)
}
  0x4b   : > { %s7180_s24 = smov 128   ;;  %s7182_s15 = smov 8  }
  0x4c   : > { %4506 = dma.hbm_to_vmem [thread:$0]  (!%p5090_p8), %s553_s18, 6144, %s555_s30, %s5138_s23, %s7180_s24, %s7180_s24, %s7182_s15  }
  0x4d   : > { %s7208_s3 = sld [smem:[#allocation25_spill]]  ;;  %s465_s13 = scalar_lea.vmem [#allocation2], %s4470_s25 }
  0x4e   : > { %s473_s2 = sshll.u32 %s465_s13, 4  ;;  %s4398_s17 = sshll.u32 %s5088_s28, 7  ;;  %s474_s2 = int_to_ptr.vmem [resolvable:$true] %s473_s2 }
  0x4f   : > { %s462_s9 = scalar_lea.sflag [#allocation3], %s5088_s28 }
  0x53   : > { %s470_s4 = scalar_lea.hbm %s7208_s3, %s4471_s26  ;;  %s4760_s10 = scalar_lea.hbm %s7208_s3, 768 }
  0x54   : > { %s471_s16 = sshll.u32 %s470_s4, 4  ;;  %s472_s16 = int_to_ptr.hbm [resolvable:$true] %s471_s16 }
  0x55   : > { %s4753_s8 = sshra.s32 %s472_s16, 4  ;;  %s4754_s8 = int_to_ptr.hbm [resolvable:$true] %s4753_s8 }
  0x56   : > { %s4755_s7 = scalar_lea.hbm %s4754_s8, 384  ;;  %p4761_p6 = scmp.lt.s32.totalorder %s4754_s8, %s7208_s3 }
  0x57   : > { %p4756_p2 = scmp.ne.s32.totalorder %s4754_s8, %s4755_s7  ;;  %p4762_p9 = scmp.lt.s32.totalorder %s4760_s10, %s4755_s7 }
  0x59   : > { %p4758_p3 = pnand %p4756_p2, %p5107_p11  ;;  %p4763_p10 = por %p4762_p9, %p4761_p6 }
  0x5b   : > { %p4759_p4 = pneg %p4758_p3 }
  0x5d   : > { %p4764_p12 = pnand %p4763_p10, %p4759_p4 }
  0x5f   : > { %4767 = shalt.err (!%p4764_p12)
}
  0x60   : > { %s4955_s25 = smov 384   ;;  %s4956_s4 = smov 24  }
  0x61   : > { %4497 = dma.hbm_to_vmem [thread:$0]  (!%p5090_p8), %s472_s16, 6144, %s474_s2, %s462_s9, %s4955_s25, %s4955_s25, %s4956_s4  }
  0x62   : > { %s4466_s13 = sshll.u32 %s4951_s21, 7  ;;  %s7209_s5 = sld [smem:[#allocation27_spill]] }
  0x63   : > { %s506_s26 = scalar_lea.vmem [#allocation7], %s4398_s17 }
  0x64   : > { %s514_s8 = sshll.u32 %s506_s26, 4  ;;  %s515_s8 = int_to_ptr.vmem [resolvable:$true] %s514_s8 }
  0x68   : > { %s511_s18 = scalar_lea.hbm %s7209_s5, %s4466_s13  ;;  %s4790_s2 = scalar_lea.hbm %s7209_s5, 256 }
  0x69   : > { %s512_s7 = sshll.u32 %s511_s18, 4  ;;  %s513_s7 = int_to_ptr.hbm [resolvable:$true] %s512_s7 }
  0x6a   : > { %s4783_s10 = sshra.s32 %s513_s7, 4  ;;  %s4784_s10 = int_to_ptr.hbm [resolvable:$true] %s4783_s10 }
  0x6b   : > { %s4785_s12 = scalar_lea.hbm %s4784_s10, 128  ;;  %p4791_p2 = scmp.lt.s32.totalorder %s4784_s10, %s7209_s5 }
  0x6c   : > { %p4786_p13 = scmp.ne.s32.totalorder %s4784_s10, %s4785_s12  ;;  %p4792_p3 = scmp.lt.s32.totalorder %s4790_s2, %s4785_s12 }
  0x6e   : > { %p4788_p0 = pnand %p4786_p13, %p5107_p11  ;;  %p4793_p4 = por %p4792_p3, %p4791_p2 }
  0x70   : > { %p4789_p1 = pneg %p4788_p0 }
  0x72   : > { %p4794_p6 = pnand %p4793_p4, %p4789_p1 }
  0x74   : > { %4797 = shalt.err (!%p4794_p6)
}
  0x75   : > { %s7210_s25 = smov 8   ;;  %s7211_s4 = smov 128  }
  0x76   : > { %4503 = dma.hbm_to_vmem [thread:$0]  (!%p5090_p8), %s513_s7, 2048, %s515_s8, %s5103_s20, %s7211_s4, %s7211_s4, %s7210_s25  }
  0x77   : > { %s7212_s11 = sld [smem:[#allocation32_spill]]  ;;  %s574_s26 = scalar_lea.vmem [#allocation10], %s4398_s17 }
  0x78   : > { %s582_s10 = sshll.u32 %s574_s26, 4  ;;  %s583_s10 = int_to_ptr.vmem [resolvable:$true] %s582_s10 }
  0x7d   : > { %s579_s18 = scalar_lea.hbm %s7212_s11, %s4466_s13  ;;  %s4820_s20 = scalar_lea.hbm %s7212_s11, 256 }
  0x7e   : > { %s580_s12 = sshll.u32 %s579_s18, 4  ;;  %s581_s12 = int_to_ptr.hbm [resolvable:$true] %s580_s12 }
  0x7f   : > { %s4813_s9 = sshra.s32 %s581_s12, 4  ;;  %s4814_s9 = int_to_ptr.hbm [resolvable:$true] %s4813_s9 }
  0x80   : > { %s4815_s2 = scalar_lea.hbm %s4814_s9, 128  ;;  %p4821_p13 = scmp.lt.s32.totalorder %s4814_s9, %s7212_s11 }
  0x81   : > { %p4816_p9 = scmp.ne.s32.totalorder %s4814_s9, %s4815_s2  ;;  %p4822_p0 = scmp.lt.s32.totalorder %s4820_s20, %s4815_s2 }
  0x83   : > { %p4818_p10 = pnand %p4816_p9, %p5107_p11  ;;  %p4823_p1 = por %p4822_p0, %p4821_p13 }
  0x85   : > { %p4819_p12 = pneg %p4818_p10 }
  0x87   : > { %p4824_p2 = pnand %p4823_p1, %p4819_p12 }
  0x89   : > { %4827 = shalt.err (!%p4824_p2)
}
  0x8a   : > { %4509 = dma.hbm_to_vmem [thread:$0]  (!%p5090_p8), %s581_s12, 2048, %s583_s10, %s5138_s23, %s7211_s4, %s7211_s4, %s7210_s25  }
  0x8b   : > { %s610_s30 = scalar_lea.hbm %s7171_s14, %s4951_s21  ;;  %s607_s18 = scalar_lea.vmem [#allocation11], %s5088_s28 }
  0x8c   : > { %s612_s15 = sshll.u32 %s610_s30, 4  ;;  %s614_s26 = sshll.u32 %s607_s18, 4  ;;  %s613_s15 = int_to_ptr.hbm [resolvable:$true] %s612_s15  ;;  %s615_s26 = int_to_ptr.vmem [resolvable:$true] %s614_s26 }
  0x8d   : > { %s605_s9 = scalar_lea.sflag [#allocation12], %s5088_s28  ;;  %s4843_s2 = sshra.s32 %s613_s15, 4  ;;  %s4844_s2 = int_to_ptr.hbm [resolvable:$true] %s4843_s2 }
  0x8e   : > { %s4845_s16 = scalar_lea.hbm %s4844_s2, 1  ;;  %s4850_s23 = scalar_lea.hbm %s7171_s14, 2 }
  0x8f   : > { %p4846_p3 = scmp.ne.s32.totalorder %s4844_s2, %s4845_s16  ;;  %p4851_p9 = scmp.lt.s32.totalorder %s4844_s2, %s7171_s14 }
  0x90   : > { %p4852_p10 = scmp.lt.s32.totalorder %s4850_s23, %s4845_s16 }
  0x91   : > { %p4848_p4 = pnand %p4846_p3, %p5107_p11 }
  0x92   : > { %p4853_p12 = por %p4852_p10, %p4851_p9 }
  0x93   : > { %p4849_p6 = pneg %p4848_p4 }
  0x95   : > { %p4854_p13 = pnand %p4853_p12, %p4849_p6 }
  0x97   : > { %4857 = shalt.err (!%p4854_p13)
}
  0x98   : > { %4512 = dma.hbm_to_vmem [thread:$0]  (!%p5090_p8), %s613_s15, 16, %s615_s26, %s605_s9  }
  0x99   : > { %623 = sbr.rel (%p5127_p5) target bundleno = 2281 (0x8e9), region = 80  ;;  %s5229_s0 = sand.u32 (!%p5127_p5), 1, %s4943_s19  }
  0x9a   : > { %s4476_s21 = smul.u32 (!%p5127_p5), 384, %s5229_s0  ;;  %s626_s28 = scalar_lea.sflag (!%p5127_p5), [#allocation3], %s5229_s0 }
  0x9c   : > { %s5233_s10 = scalar_lea.vmem (!%p5127_p5), [#allocation2], %s4476_s21 }
  0x9e   : > { %4918 = dma.done.wait (%p5083_p7), %s626_s28, 6144  }
  0x9f   : > { %4920 = vsyncadd (%p5083_p7), %s626_s28, 4294961152  ;;  %s635_s29 = sand.u32 1, %s5066_s22   ;;  %s4477_s1 = smul.u32 3, %s5229_s0 }
  0xa0   : > { %s636_s12 = scalar_lea.sflag [#allocation6], %s635_s29 }
  0xa1   : > { %s5241_s8 = scalar_lea.vmem [#allocation5], %s4477_s1 }
  0xa2   : > { %4922 = dma.done.wait (%p5083_p7), %s636_s12, 2096  }
  0xa3   : > { %4924 = vsyncadd (%p5083_p7), %s636_s12, 4294965200  ;;  %s4406_s7 = sshll.u32 %s5229_s0, 7  ;;  %s656_s13 = scalar_lea.sflag [#allocation9], %s635_s29 }
  0xa4   : > { %s5248_s17 = scalar_lea.vmem [#allocation7], %s4406_s7  ;;  %s5250_s30 = scalar_lea.vmem [#allocation8], %s4476_s21 }
  0xa5   : > { %4926 = dma.done.wait (%p5083_p7), %s656_s13, 8192  }
  0xa6   : > { %4928 = vsyncadd (%p5083_p7), %s656_s13, 4294959104  ;;  %s5256_s15 = scalar_lea.vmem [#allocation10], %s4406_s7  ;;  %s676_s18 = scalar_lea.sflag [#allocation12], %s5229_s0 }
  0xa7   : > { %4930 = dma.done.wait (%p5083_p7), %s676_s18, 16  }
  0xa8   : > { %4932 = vsyncadd (%p5083_p7), %s676_s18, 4294967280  ;;  %p763_p8 = scmp.lt.s32.totalorder %s5066_s22, 1  ;;  %s7213_s25 = sld [smem:[#allocation28_spill]] }
  0xa9   : > { %s7214_s28 = sld [smem:[#allocation29_spill]]  ;;  %p4408_p7 = scmp.ne.s32.totalorder %s5066_s22, 0 }
  0xaa   : > { %s5266_s9 = scalar_select %p763_p8, %s5066_s22, 1 }
  0xab   : > { %s7215_s7 = sld [smem:[#allocation31_spill]] }
  0xac   : > { %s7216_s16 = sld [smem:[#allocation33_spill]] }
  0xad   : > { %s7217_s11 = sld [smem:[#allocation34_spill]] }
  0xae   : > { %s768_s27 = scalar_lea.vmem %s7213_s25, %s5266_s9  ;;  %s7218_s25 = sld [smem:[#allocation22_spill]] (!%p4408_p7) }
  0xaf   : > { %s771_s29 = scalar_lea.vmem %s7214_s28, %s5266_s9  ;;  %784 = sbr.rel (%p4408_p7) target bundleno = 185 (0xb9), region = 108 }
  0xb1   : > { %s774_s13 = scalar_lea.vmem %s7215_s7, %s5266_s9 }
  0xb2   : > { %s777_s26 = scalar_lea.vmem %s7216_s16, %s5266_s9 }
  0xb3   : > { %s780_s24 = scalar_lea.vmem %s7217_s11, %s5266_s9 }
  0xb4   : > { %v785_v0 = vld [vmem:[%s7218_s25] sm:$0xff]  ;;  %v786_v1 = vld [vmem:[%s7218_s25 + $0x8] sm:$0xff]  ;;  %v787_v2 = vld [vmem:[%s7218_s25 + $0x10] sm:$0xff] }
  0xb5   : > { %789 = vst [vmem:[#allocation13] sm:$0xff] %v785_v0  ;;  %v788_v3 = vld [vmem:[%s7218_s25 + $0x18] sm:$0xff] }
  0xb6   : > { %790 = vst [vmem:[#allocation13 + $0x8] sm:$0xff] %v786_v1 }
  0xb7   : > { %791 = vst [vmem:[#allocation13 + $0x10] sm:$0xff] %v787_v2 }
  0xb8   : > { %792 = vst [vmem:[#allocation13 + $0x18] sm:$0xff] %v788_v3 }
  0xb9 PF: > { %v884_v4 = vld [vmem:[%s5233_s10 + $0x170] sm:$0xff]  ;;  %v881_v5 = vld [vmem:[%s5233_s10 + $0x158] sm:$0xff]  ;;  %v878_v6 = vld [vmem:[%s5233_s10 + $0x140] sm:$0xff]  ;;  %s4957_s3 = smov 64   ;;  %s4958_s5 = smov 96   ;;  %vm1022_vm0 = vcmask 1047556  }
  0xba   : > { %923 = vmatpush.msra.mxu1 %v884_v4  ;;  %v883_v7 = vld [vmem:[%s5233_s10 + $0x168] sm:$0xff]  ;;  %v880_v8 = vld [vmem:[%s5233_s10 + $0x150] sm:$0xff]  ;;  %v877_v10 = vld [vmem:[%s5233_s10 + $0x138] sm:$0xff]  ;;  %s4959_s11 = smov 32   ;;  %s7219_s18 = sld [smem:[#allocation23_spill]]  ;;  %vm2422_vm1 = vcmask 261120  }
  0xbb   : > { %894 = vmatpush.msra.mxu0 %v883_v7  ;;  %v875_v9 = vld [vmem:[%s5233_s10 + $0x128] sm:$0xff]  ;;  %v872_v11 = vld [vmem:[%s5233_s10 + $0x110] sm:$0xff]  ;;  %v874_v12 = vld [vmem:[%s5233_s10 + $0x120] sm:$0xff]  ;;  %s7229_s7 = sld [smem:[#allocation24_spill]]  ;;  %vm2739_vm3 = vcmask 130048   ;;  %vm3640_vm7 = vcmask 523264  }
  0xbc   : > { %924 = vmatpush.msra.mxu1 %v881_v5  ;;  %v869_v13 = vld [vmem:[%s5233_s10 + $0xf8] sm:$0xff]  ;;  %v871_v14 = vld [vmem:[%s5233_s10 + $0x108] sm:$0xff]  ;;  %v866_v15 = vld [vmem:[%s5233_s10 + $0xe0] sm:$0xff]  ;;  %vm3645_vm8 = vcmask 785408   ;;  %vm3811_vm13 = vcmask 1040384   ;;  %s7238_s12 = scalar_lea.vmem [#allocation11], %s5229_s0 }
  0xbd   : > { %895 = vmatpush.msra.mxu0 %v880_v8  ;;  %v868_v16 = vld [vmem:[%s5233_s10 + $0xf0] sm:$0xff]  ;;  %v863_v17 = vld [vmem:[%s5233_s10 + $0xc8] sm:$0xff]  ;;  %v865_v18 = vld [vmem:[%s5233_s10 + $0xd8] sm:$0xff]  ;;  %s4964_s0 = smov [#allocation13]   ;;  %p4514_p11 = scmp.eq.s32.totalorder %s5066_s22, 1 }
  0xbe   : > { %925 = vmatpush.msra.mxu1 %v878_v6  ;;  %v860_v19 = vld [vmem:[%s5233_s10 + $0xb0] sm:$0xff]  ;;  %v862_v20 = vld [vmem:[%s5233_s10 + $0xc0] sm:$0xff]  ;;  %v857_v21 = vld [vmem:[%s5233_s10 + $0x98] sm:$0xff] }
  0xbf   : > { %896 = vmatpush.msra.mxu0 %v877_v10  ;;  %v859_v22 = vld [vmem:[%s5233_s10 + $0xa8] sm:$0xff]  ;;  %v854_v23 = vld [vmem:[%s5233_s10 + $0x80] sm:$0xff]  ;;  %v856_v24 = vld [vmem:[%s5233_s10 + $0x90] sm:$0xff] }
  0xc0   : > { %926 = vmatpush.msra.mxu1 %v875_v9  ;;  %v851_v25 = vld [vmem:[%s5233_s10 + $0x68] sm:$0xff]  ;;  %v853_v26 = vld [vmem:[%s5233_s10 + $0x78] sm:$0xff]  ;;  %v848_v27 = vld [vmem:[%s5233_s10 + $0x50] sm:$0xff]  ;;  %s7220_s2 = smov %s7219_s18 }
  0xc1   : > { %897 = vmatpush.msra.mxu0 %v874_v12  ;;  %v850_v28 = vld [vmem:[%s5233_s10 + $0x60] sm:$0xff]  ;;  %v845_v29 = vld [vmem:[%s5233_s10 + $0x38] sm:$0xff]  ;;  %v847_v30 = vld [vmem:[%s5233_s10 + $0x48] sm:$0xff]  ;;  %v4960_v12 = vmov 0  }
  0xc2   : > { %927 = vmatpush.msra.mxu1 %v872_v11  ;;  %v842_v31 = vld [vmem:[%s5233_s10 + $0x20] sm:$0xff]  ;;  %v844_v32 = vld [vmem:[%s5233_s10 + $0x30] sm:$0xff]  ;;  %v885_v33 = vld [vmem:[%s5233_s10 + $0x178] sm:$0xff]  ;;  %4563 = vset.pattern.permute.xlu1 %v4960_v12 }
  0xc3   : > { %898 = vmatpush.msra.mxu0 %v871_v14  ;;  %v882_v34 = vld [vmem:[%s5233_s10 + $0x160] sm:$0xff]  ;;  %v839_v35 = vld [vmem:[%s5233_s10 + $0x8] sm:$0xff]  ;;  %v841_v36 = vld [vmem:[%s5233_s10 + $0x18] sm:$0xff]  ;;  %952 = vmatpush.msra.mxu2 %v885_v33 }
  0xc4   : > { %928 = vmatpush.msra.mxu1 %v869_v13  ;;  %v834_v37 = vld [vmem:[#allocation13] sm:$0xff]  ;;  %v838_v39 = vld [vmem:[%s5233_s10] sm:$0xff]  ;;  %v876_v40 = vld [vmem:[%s5233_s10 + $0x130] sm:$0xff]  ;;  %4562 = vset.pattern.permute.xlu0 %v4960_v12 }
  0xc5   : > { %899 = vmatpush.msra.mxu0 %v868_v16  ;;  %v879_v38 = vld [vmem:[%s5233_s10 + $0x148] sm:$0xff]  ;;  %953 = vmatpush.msra.mxu2 %v882_v34  ;;  %v873_v41 = vld [vmem:[%s5233_s10 + $0x118] sm:$0xff]  ;;  %v870_v42 = vld [vmem:[%s5233_s10 + $0x100] sm:$0xff] }
  0xc6   : > { %929 = vmatpush.msra.mxu1 %v866_v15  ;;  %v835_v43 = vld [vmem:[#allocation13 + $0x8] sm:$0xff]  ;;  %v867_v44 = vld [vmem:[%s5233_s10 + $0xe8] sm:$0xff]  ;;  %v861_v46 = vld [vmem:[%s5233_s10 + $0xb8] sm:$0xff]  ;;  %4564 = vset.pattern.permute.xlu2 %v4960_v12 }
  0xc7   : > { %900 = vmatpush.msra.mxu0 %v865_v18  ;;  %954 = vmatpush.msra.mxu2 %v879_v38  ;;  %v864_v45 = vld [vmem:[%s5233_s10 + $0xd0] sm:$0xff]  ;;  %v858_v47 = vld [vmem:[%s5233_s10 + $0xa0] sm:$0xff]  ;;  %v836_v48 = vld [vmem:[#allocation13 + $0x10] sm:$0xff] }
  0xc8   : > { %930 = vmatpush.msra.mxu1 %v863_v17  ;;  %v855_v49 = vld [vmem:[%s5233_s10 + $0x88] sm:$0xff]  ;;  %v852_v50 = vld [vmem:[%s5233_s10 + $0x70] sm:$0xff]  ;;  %v849_v51 = vld [vmem:[%s5233_s10 + $0x58] sm:$0xff] }
  0xc9   : > { %901 = vmatpush.msra.mxu0 %v862_v20  ;;  %955 = vmatpush.msra.mxu2 %v876_v40  ;;  %v846_v52 = vld [vmem:[%s5233_s10 + $0x40] sm:$0xff]  ;;  %v843_v54 = vld [vmem:[%s5233_s10 + $0x28] sm:$0xff]  ;;  %v840_v55 = vld [vmem:[%s5233_s10 + $0x10] sm:$0xff] }
  0xca   : > { %931 = vmatpush.msra.mxu1 %v860_v19  ;;  %v837_v53 = vld [vmem:[#allocation13 + $0x18] sm:$0xff]  ;;  %v794_v14 = vld [vmem:[%s7220_s2 + $0x8] sm:$0xff]  ;;  %v796_v15 = vld [vmem:[%s7220_s2 + $0x18] sm:$0xff] }
  0xcb   : > { %902 = vmatpush.msra.mxu0 %v859_v22  ;;  %956 = vmatpush.msra.mxu2 %v873_v41  ;;  %v886_v56 = vld [vmem:[%s5241_s8] sm:$0x7]  ;;  %vm7017_vm14 = vmneg %vm3811_vm13  ;;  %s7239_s8 = sld [smem:[#allocation35_spill]] }
  0xcc   : > { %932 = vmatpush.msra.mxu1 %v857_v21  ;;  %v889_v57 = vperm.slane %v886_v56, 1  ;;  %v888_v63 = vperm.slane %v886_v56, 0  ;;  %v793_v11 = vld [vmem:[%s7219_s18] sm:$0xff]  ;;  %v5427_v16 = vperm.slane %v886_v56, 2 }
  0xcd   : > { %903 = vmatpush.msra.mxu0 %v856_v24  ;;  %957 = vmatpush.msra.mxu2 %v870_v42  ;;  %v4961_v24 = vmov 1983009808  }
  0xce   : > { %933 = vmatpush.msra.mxu1 %v854_v23 }
  0xcf   : > { %904 = vmatpush.msra.mxu0 %v853_v26  ;;  %958 = vmatpush.msra.mxu2 %v867_v44 }
  0xd0   : > { %934 = vmatpush.msra.mxu1 %v851_v25  ;;  %v1027_v25 = vunpack.c.l.s4 %v4961_v24 }
  0xd1   : > { %905 = vmatpush.msra.mxu0 %v850_v28  ;;  %959 = vmatpush.msra.mxu2 %v864_v45 }
  0xd2   : > { %935 = vmatpush.msra.mxu1 %v848_v27  ;;  %v795_v27 = vld [vmem:[%s7220_s2 + $0x10] sm:$0xff] }
  0xd3   : > { %906 = vmatpush.msra.mxu0 %v847_v30  ;;  %960 = vmatpush.msra.mxu2 %v861_v46  ;;  %v5447_v30 = vunpack.c.0.s8 %v1027_v25 }
  0xd4   : > { %936 = vmatpush.msra.mxu1 %v845_v29 }
  0xd5   : > { %907 = vmatpush.msra.mxu0 %v844_v32  ;;  %961 = vmatpush.msra.mxu2 %v858_v47  ;;  %v4962_v32 = vmov 1934713408  }
  0xd6   : > { %937 = vmatpush.msra.mxu1 %v842_v31  ;;  %v1051_v33 = vunpack.c.l.s4 %v4962_v32 }
  0xd7   : > { %908 = vmatpush.msra.mxu0 %v841_v36  ;;  %962 = vmatpush.msra.mxu2 %v855_v49 }
  0xd8   : > { %938 = vmatpush.msra.mxu1 %v839_v35  ;;  %v5452_v38 = vunpack.c.0.s8 %v1051_v33 }
  0xd9   : > { %939 = vmatmul.f32.vlgmr.msra.gmra.mxu1 %v834_v37  ;;  %909 = vmatpush.msra.mxu0 %v838_v39 }
  0xda   : > { %910 = vmatmul.f32.vlgmr.msra.gmra.mxu0 %v834_v37  ;;  %963 = vmatpush.msra.mxu2 %v852_v50 }
  0xdc   : > { %964 = vmatpush.msra.mxu2 %v849_v51 }
  0xde   : > { %965 = vmatpush.msra.mxu2 %v846_v52 }
  0xe0   : > { %966 = vmatpush.msra.mxu2 %v843_v54 }
  0xe1   : > { %942 = vmatmul.f32.gmra.mxu1 %v835_v43 }
  0xe2   : > { %913 = vmatmul.f32.gmra.mxu0 %v835_v43  ;;  %967 = vmatpush.msra.mxu2 %v840_v55 }
  0xe3   : > { %968 = vmatmul.f32.vlgmr.msra.gmra.mxu2 %v834_v37 }
  0xe9   : > { %945 = vmatmul.f32.gmra.mxu1 %v836_v48 }
  0xea   : > { %916 = vmatmul.f32.gmra.mxu0 %v836_v48 }
  0xeb   : > { %971 = vmatmul.f32.gmra.mxu2 %v835_v43 }
  0xf1   : > { %948 = vmatmul.f32.gmra.mxu1 %v837_v53 }
  0xf2   : > { %919 = vmatmul.f32.gmra.mxu0 %v837_v53 }
  0xf3   : > { %974 = vmatmul.f32.gmra.mxu2 %v836_v48 }
  0xfb   : > { %977 = vmatmul.f32.gmra.mxu2 %v837_v53 }
 0x156   : > { %v940_v58 = vpop.f32.mrf.mxu1 }
 0x157   : > { %v5354_v59 = vadd.f32 %v940_v58, %v889_v57  ;;  %v911_v62 = vpop.f32.mrf.mxu0 }
 0x158   : > { %v5368_v0 = vadd.f32 %v911_v62, %v888_v63 }
 0x159   : > { %1478 = vrot.lane.b32.xlu2 %v5354_v59, %s4957_s3  ;;  %1466 = vrot.lane.b32.xlu1 %v5354_v59, %s4958_s5  ;;  %v1504_v29 = vrot.slane %v5354_v59, 4 }
 0x15e   : > { %v943_v60 = vpop.f32.mrf.mxu1 }
 0x15f   : > { %v5360_v61 = vadd.f32 %v943_v60, %v889_v57  ;;  %v914_v1 = vpop.f32.mrf.mxu0 }
 0x160   : > { %v5376_v2 = vadd.f32 %v914_v1, %v888_v63 }
 0x161   : > { %1468 = vrot.lane.b32.xlu0 %v5360_v61, %s4958_s5  ;;  %1490 = vrot.lane.b32.xlu2 %v5354_v59, %s4959_s11  ;;  %v1560_v58 = vrot.slane %v5360_v61, 4 }
 0x162   : > { %1492 = vrot.lane.b32.xlu1 %v5360_v61, %s4959_s11  ;;  %v1080_v12 = vrot.slane %v5376_v2, 4 }
 0x166   : > { %v946_v3 = vpop.f32.mrf.mxu1  ;;  %v969_v13 = vpop.f32.mrf.mxu2 }
 0x167   : > { %v5384_v4 = vadd.f32 %v946_v3, %v889_v57  ;;  %v917_v7 = vpop.f32.mrf.mxu0  ;;  %v5430_v18 = vadd.f32 %v969_v13, %v5427_v16 }
 0x168   : > { %v5400_v8 = vadd.f32 %v917_v7, %v888_v63 }
 0x169   : > { %1480 = vrot.lane.b32.xlu0 %v5360_v61, %s4957_s3  ;;  %1009 = vrot.lane.b32.xlu2 %v5368_v0, %s4959_s11 }
 0x16a   : > { %997 = vrot.lane.b32.xlu1 %v5368_v0, %s4957_s3 }
 0x16e   : > { %v949_v5 = vpop.f32.mrf.mxu1  ;;  %v972_v17 = vpop.f32.mrf.mxu2 }
 0x16f   : > { %v5392_v6 = vadd.f32 %v949_v5, %v889_v57  ;;  %v920_v9 = vpop.f32.mrf.mxu0  ;;  %v5433_v19 = vadd.f32 %v972_v17, %v5427_v16  ;;  %v1616_v17 = vrot.slane %v5384_v4, 4 }
 0x170   : > { %v5408_v10 = vadd.f32 %v920_v9, %v888_v63 }
 0x171   : > { %985 = vrot.lane.b32.xlu0 %v5368_v0, %s4958_s5  ;;  %1011 = vrot.lane.b32.xlu2 %v5376_v2, %s4959_s11  ;;  %v4565_v20 = vpack.i.bf16 %v5430_v18, %v5433_v19 }
 0x172   : > { %999 = vrot.lane.b32.xlu1 %v5376_v2, %s4957_s3 }
 0x179   : > { %987 = vrot.lane.b32.xlu0 %v5376_v2, %s4958_s5  ;;  %1494 = vrot.lane.b32.xlu2 %v5384_v4, %s4959_s11 }
 0x17a   : > { %1482 = vrot.lane.b32.xlu1 %v5384_v4, %s4957_s3 }
 0x181   : > { %1470 = vrot.lane.b32.xlu0 %v5384_v4, %s4958_s5  ;;  %1496 = vrot.lane.b32.xlu2 %v5392_v6, %s4959_s11 }
 0x182   : > { %1484 = vrot.lane.b32.xlu1 %v5392_v6, %s4957_s3 }
 0x189   : > { %1472 = vrot.lane.b32.xlu0 %v5392_v6, %s4958_s5  ;;  %1013 = vrot.lane.b32.xlu2 %v5400_v8, %s4959_s11 }
 0x18a   : > { %1001 = vrot.lane.b32.xlu1 %v5400_v8, %s4957_s3 }
 0x191   : > { %989 = vrot.lane.b32.xlu0 %v5400_v8, %s4958_s5  ;;  %1015 = vrot.lane.b32.xlu2 %v5408_v10, %s4959_s11 }
 0x192   : > { %1003 = vrot.lane.b32.xlu1 %v5408_v10, %s4957_s3 }
 0x199   : > { %991 = vrot.lane.b32.xlu0 %v5408_v10, %s4958_s5  ;;  %811 = vperm.xlu2 %4564, %v795_v27  }
 0x19a   : > { %801 = vperm.xlu1 %4563, %v793_v11  }
 0x1a1   : > { %806 = vperm.xlu0 %4562, %v794_v14   ;;  %4576 = vrot.lane.b32.xlu2 %v4565_v20, %s4959_s11 }
 0x1a2   : > { %816 = vperm.xlu1 %4563, %v796_v15  }
 0x1a9   : > { %4566 = vrot.lane.b32.xlu0 %v4565_v20, %s4958_s5 }
 0x1aa   : > { %4571 = vrot.lane.b32.xlu1 %v4565_v20, %s4957_s3 }
 0x1b3   : > { %v1479_v21 = vpop.permute.xlu2 %1478 }
 0x1b4   : > { %v1502_v23 = vrot.slane %v1479_v21, 4  ;;  %v1505_v31 = vsel %vm1022_vm0, %v1479_v21, %v1504_v29  ;;  %v1672_v29 = vrot.slane %v5392_v6, 4 }
 0x1b5   : > { %v1513_v36 = vperm.slane %v1505_v31, %v5447_v30 }
 0x1b6   : > { %v1503_v28 = vsel %vm1022_vm0, %v1502_v23, %v5354_v59  ;;  %v1024_v59 = vrot.slane %v5368_v0, 4 }
 0x1b7   : > { %v1509_v34 = vperm.slane %v1503_v28, %v5447_v30  ;;  %v1540_v45 = vrot.slane %v1513_v36, 4 }
 0x1b9   : > { %v1528_v41 = vrot.slane %v1509_v34, 4 }
 0x1bb   : > { %v1491_v22 = vpop.permute.xlu2 %1490 }
 0x1bc   : > { %v1514_v35 = vrot.slane %v1491_v22, 4 }
 0x1c3   : > { %v5439_v26 = vpop.permute.xlu2 %1009 }
 0x1cb   : > { %v1467_v37 = vpop.permute.xlu1 %1466  ;;  %v5456_v43 = vpop.permute.xlu2 %1011 }
 0x1cc   : > { %v1515_v39 = vsel %vm1022_vm0, %v1514_v35, %v1467_v37  ;;  %v1516_v40 = vrot.slane %v1467_v37, 4 }
 0x1cd   : > { %v1521_v42 = vperm.slane %v1515_v39, %v5447_v30 }
 0x1ce   : > { %v1517_v44 = vsel %vm1022_vm0, %v1491_v22, %v1516_v40 }
 0x1cf   : > { %v1525_v46 = vperm.slane %v1517_v44, %v5447_v30  ;;  %v1526_v47 = vrot.slane %v1521_v42, 4  ;;  %v1529_v48 = vsel %vm1022_vm0, %v1521_v42, %v1528_v41 }
 0x1d0   : > { %v1537_v49 = vperm.slane %v1529_v48, %v5452_v38 }
 0x1d1   : > { %v1527_v50 = vsel %vm1022_vm0, %v1526_v47, %v1509_v34  ;;  %v1538_v51 = vrot.slane %v1525_v46, 4  ;;  %v1541_v52 = vsel %vm1022_vm0, %v1525_v46, %v1540_v45  ;;  %v1034_v34 = vrot.slane %v5439_v26, 4 }
 0x1d2   : > { %v1533_v53 = vperm.slane %v1527_v50, %v5452_v38  ;;  %v1549_v54 = vperm.slane %v1541_v52, %v5452_v38  ;;  %v1552_v55 = vrot.slane %v1537_v49, 4 }
 0x1d3   : > { %v1539_v56 = vsel %vm1022_vm0, %v1538_v51, %v1513_v36  ;;  %v1469_v57 = vpop.permute.xlu0 %1468  ;;  %v5472_v11 = vpop.permute.xlu2 %1494  ;;  %v1136_v36 = vrot.slane %v5400_v8, 4 }
 0x1d4   : > { %v1545_v60 = vperm.slane %v1539_v56, %v5452_v38  ;;  %v1550_v62 = vrot.slane %v1533_v53, 4  ;;  %v1553_v63 = vsel %vm1022_vm0, 0.0, %v1552_v55  ;;  %v1556_v1 = vrot.slane %v1549_v54, 4  ;;  %v1493_v3 = vpop.permute.xlu1 %1492 }
 0x1d5   : > { %v1731_v5 = vrot.slane %v1553_v63, 4  ;;  %v1572_v7 = vrot.slane %v1469_v57, 4  ;;  %v1570_v9 = vrot.slane %v1493_v3, 4  ;;  %v1726_v23 = vsel %vm1022_vm0, %v1552_v55, %v1533_v53 }
 0x1d6   : > { %v1551_v13 = vsel %vm1022_vm0, 0.0, %v1550_v62  ;;  %v1554_v14 = vrot.slane %v1545_v60, 4  ;;  %v1557_v15 = vsel %vm1022_vm0, 0.0, %v1556_v1  ;;  %v1737_v32 = vsel %vm1022_vm0, %v1556_v1, %v1545_v60 }
 0x1d7   : > { %v1742_v20 = vrot.slane %v1557_v15, 4  ;;  %v1571_v21 = vsel %vm1022_vm0, %v1570_v9, %v1469_v57  ;;  %v1573_v22 = vsel %vm1022_vm0, %v1493_v3, %v1572_v7  ;;  %v1732_v28 = vsel %vm1022_vm0, %v1731_v5, %v1551_v13 }
 0x1d8   : > { %v1555_v24 = vsel %vm1022_vm0, 0.0, %v1554_v14  ;;  %v1577_v25 = vperm.slane %v1571_v21, %v5447_v30  ;;  %v1581_v27 = vperm.slane %v1573_v22, %v5447_v30  ;;  %v5487_v31 = vperm.slane %v1732_v28, %v5447_v30 }
 0x1d9   : > { %v1743_v33 = vsel %vm1022_vm0, %v1742_v20, %v1555_v24  ;;  %v5498_v42 = vperm.slane %v1726_v23, %v5447_v30  ;;  %v5503_v48 = vperm.slane %v1737_v32, %v5447_v30  ;;  %v1626_v14 = vrot.slane %v5472_v11, 4 }
 0x1da   : > { %v5493_v35 = vperm.slane %v1743_v33, %v5447_v30  ;;  %v1582_v39 = vrot.slane %v1577_v25, 4  ;;  %v1594_v40 = vrot.slane %v1581_v27, 4  ;;  %v1748_v44 = vrot.slane %v5487_v31, 4 }
 0x1db   : > { %v1481_v41 = vpop.permute.xlu0 %1480  ;;  %v5522_v63 = vpop.permute.xlu2 %1496 }
 0x1dc   : > { %v1558_v45 = vrot.slane %v1481_v41, 4  ;;  %v1561_v46 = vsel %vm1022_vm0, %v1481_v41, %v1560_v58  ;;  %v998_v47 = vpop.permute.xlu1 %997  ;;  %v1760_v49 = vrot.slane %v5493_v35, 4  ;;  %v1749_v53 = vsel %vm1022_vm0, %v1748_v44, %v5498_v42 }
 0x1dd   : > { %v1569_v50 = vperm.slane %v1561_v46, %v5447_v30  ;;  %v1021_v51 = vrot.slane %v998_v47, 4  ;;  %v1025_v52 = vsel %vm1022_vm0, %v998_v47, %v1024_v59  ;;  %v5514_v56 = vperm.slane %v1749_v53, %v5452_v38 }
 0x1de   : > { %v1559_v54 = vsel %vm1022_vm0, %v1558_v45, %v5360_v61  ;;  %v1033_v55 = vperm.slane %v1025_v52, %v5447_v30  ;;  %v1761_v57 = vsel %vm1022_vm0, %v1760_v49, %v5503_v48  ;;  %v1090_v61 = vrot.slane %v5456_v43, 4 }
 0x1df   : > { %v1565_v58 = vperm.slane %v1559_v54, %v5447_v30  ;;  %v1595_v60 = vsel %vm1022_vm0, %v1594_v40, %v1569_v50  ;;  %v1596_v62 = vrot.slane %v1569_v50, 4  ;;  %v1023_v59 = vsel %vm1022_vm0, %v1021_v51, %v5368_v0 }
 0x1e0   : > { %v1601_v1 = vperm.slane %v1595_v60, %v5452_v38  ;;  %v1029_v3 = vperm.slane %v1023_v59, %v5447_v30  ;;  %v5528_v5 = vperm.slane %v1761_v57, %v5452_v38  ;;  %v1682_v15 = vrot.slane %v5522_v63, 4 }
 0x1e1   : > { %v1583_v7 = vsel %vm1022_vm0, %v1582_v39, %v1565_v58  ;;  %v1584_v9 = vrot.slane %v1565_v58, 4  ;;  %v1597_v13 = vsel %vm1022_vm0, %v1581_v27, %v1596_v62  ;;  %v1774_v20 = vrot.slane %v5514_v56, 4 }
 0x1e2   : > { %v1605_v0 = vperm.slane %v1597_v13, %v5452_v38  ;;  %v1589_v23 = vperm.slane %v1583_v7, %v5452_v38  ;;  %v1610_v24 = vrot.slane %v1601_v1, 4  ;;  %v1060_v28 = vrot.slane %v1033_v55, 4 }
 0x1e3   : > { %v1585_v22 = vsel %vm1022_vm0, %v1577_v25, %v1584_v9  ;;  %v986_v32 = vpop.permute.xlu0 %985  ;;  %v1048_v39 = vrot.slane %v1029_v3, 4  ;;  %v1772_v41 = vrot.slane %v5528_v5, 4  ;;  %v5551_v51 = vsel %vm1022_vm0, %v5528_v5, %v1774_v20 }
 0x1e4   : > { %v1593_v33 = vperm.slane %v1585_v22, %v5452_v38  ;;  %v1612_v27 = vrot.slane %v1605_v0, 4  ;;  %v1000_v40 = vpop.permute.xlu1 %999  ;;  %v1035_v46 = vsel %vm1022_vm0, %v1034_v34, %v986_v32  ;;  %v1036_v25 = vrot.slane %v986_v32, 4 }
 0x1e5   : > { %v1078_v44 = vrot.slane %v1000_v40, 4  ;;  %v1081_v45 = vsel %vm1022_vm0, %v1000_v40, %v1080_v12  ;;  %v1041_v34 = vperm.slane %v1035_v46, %v5447_v30  ;;  %v1606_v54 = vrot.slane %v1589_v23, 4 }
 0x1e6   : > { %v1608_v47 = vrot.slane %v1593_v33, 4  ;;  %v1613_v49 = vsel %vm1022_vm0, 0.0, %v1612_v27  ;;  %v5547_v50 = vperm.slane %v1081_v45, %v5447_v30  ;;  %v1037_v12 = vsel %vm1022_vm0, %v5439_v26, %v1036_v25 }
 0x1e7   : > { %v1796_v52 = vrot.slane %v1613_v49, 4  ;;  %v1079_v53 = vsel %vm1022_vm0, %v1078_v44, %v5376_v2  ;;  %v1611_v58 = vsel %vm1022_vm0, 0.0, %v1610_v24  ;;  %v1045_v60 = vperm.slane %v1037_v12, %v5447_v30 }
 0x1e8   : > { %v1609_v57 = vsel %vm1022_vm0, 0.0, %v1608_v47  ;;  %v5562_v62 = vsel %vm1022_vm0, %v1612_v27, %v1601_v1  ;;  %v1085_v59 = vperm.slane %v1079_v53, %v5447_v30  ;;  %v1046_v7 = vrot.slane %v1041_v34, 4 }
 0x1e9   : > { %v1049_v2 = vsel %vm1022_vm0, %v1041_v34, %v1048_v39  ;;  %v1116_v9 = vrot.slane %v5547_v50, 4  ;;  %v1058_v13 = vrot.slane %v1045_v60, 4  ;;  %v1061_v0 = vsel %vm1022_vm0, %v1045_v60, %v1060_v28 }
 0x1ea   : > { %v1057_v26 = vperm.slane %v1049_v2, %v5452_v38  ;;  %v1785_v20 = vrot.slane %v1609_v57, 4  ;;  %v1797_v22 = vsel %vm1022_vm0, %v1796_v52, %v1611_v58  ;;  %v1047_v24 = vsel %vm1022_vm0, %v1046_v7, %v1029_v3 }
 0x1eb   : > { %v1069_v1 = vperm.slane %v1061_v0, %v5452_v38  ;;  %v988_v32 = vpop.permute.xlu0 %987  ;;  %v5573_v33 = vperm.slane %v1047_v24, %v5452_v38  ;;  %v1059_v27 = vsel %vm1022_vm0, %v1058_v13, %v1033_v55  ;;  %v1104_v52 = vrot.slane %v1085_v59, 4 }
 0x1ec   : > { %v5576_v39 = vrot.slane %v1057_v26, 4  ;;  %v1483_v40 = vpop.permute.xlu1 %1482  ;;  %v1091_v44 = vsel %vm1022_vm0, %v1090_v61, %v988_v32  ;;  %v5580_v28 = vperm.slane %v1059_v27, %v5452_v38  ;;  %v1092_v61 = vrot.slane %v988_v32, 4 }
 0x1ed   : > { %v5582_v45 = vrot.slane %v1069_v1, 4  ;;  %v1614_v46 = vrot.slane %v1483_v40, 4  ;;  %v1617_v3 = vsel %vm1022_vm0, %v1483_v40, %v1616_v17  ;;  %v1070_v25 = vrot.slane %v5573_v33, 4 }
 0x1ee   : > { %v5590_v55 = vsel %vm1022_vm0, 0.0, %v5576_v39  ;;  %v5593_v49 = vperm.slane %v1617_v3, %v5447_v30  ;;  %v1074_v53 = vrot.slane %v5580_v28, 4  ;;  %v1607_v58 = vsel %vm1022_vm0, 0.0, %v1606_v54 }
 0x1ef   : > { %v5598_v12 = vsel %vm1022_vm0, 0.0, %v5582_v45  ;;  %v1615_v17 = vsel %vm1022_vm0, %v1614_v46, %v5384_v4  ;;  %v5603_v34 = vsel %vm1022_vm0, 0.0, %v1070_v25  ;;  %v1251_v57 = vrot.slane %v5590_v55, 4 }
 0x1f0   : > { %v1780_v60 = vsel %vm1022_vm0, %v1608_v47, %v1589_v23  ;;  %v1262_v7 = vrot.slane %v5598_v12, 4  ;;  %v1621_v2 = vperm.slane %v1615_v17, %v5447_v30  ;;  %v1093_v26 = vsel %vm1022_vm0, %v5456_v43, %v1092_v61 }
 0x1f1   : > { %v1097_v13 = vperm.slane %v1091_v44, %v5447_v30  ;;  %v5614_v4 = vsel %vm1022_vm0, 0.0, %v1074_v53  ;;  %v1652_v0 = vrot.slane %v5593_v49, 4  ;;  %v1101_v24 = vperm.slane %v1093_v26, %v5447_v30 }
 0x1f2   : > { %v1786_v54 = vsel %vm1022_vm0, %v1785_v20, %v1607_v58  ;;  %v5621_v32 = vperm.slane %v1780_v60, %v5447_v30 }
 0x1f3   : > { %v1102_v1 = vrot.slane %v1097_v13, 4  ;;  %v1105_v23 = vsel %vm1022_vm0, %v1097_v13, %v1104_v52  ;;  %v1471_v47 = vpop.permute.xlu0 %1470  ;;  %v5624_v43 = vperm.slane %v1786_v54, %v5447_v30  ;;  %v1114_v40 = vrot.slane %v1101_v24, 4 }
 0x1f4   : > { %v1113_v27 = vperm.slane %v1105_v23, %v5452_v38  ;;  %v1117_v44 = vsel %vm1022_vm0, %v1101_v24, %v1116_v9  ;;  %v1485_v46 = vpop.permute.xlu1 %1484  ;;  %v1627_v20 = vsel %vm1022_vm0, %v1626_v14, %v1471_v47  ;;  %v5662_v24 = vperm.slane %v1797_v22, %v5447_v30 }
 0x1f5   : > { %v1103_v3 = vsel %vm1022_vm0, %v1102_v1, %v1085_v59  ;;  %v1125_v25 = vperm.slane %v1117_v44, %v5452_v38  ;;  %v1670_v61 = vrot.slane %v1485_v46, 4  ;;  %v1673_v52 = vsel %vm1022_vm0, %v1485_v46, %v1672_v29 }
 0x1f6   : > { %v5637_v53 = vperm.slane %v1103_v3, %v5452_v38  ;;  %v1115_v9 = vsel %vm1022_vm0, %v1114_v40, %v5547_v50  ;;  %v5641_v17 = vrot.slane %v1113_v27, 4  ;;  %v5644_v58 = vperm.slane %v1673_v52, %v5447_v30 }
 0x1f7   : > { %v5647_v14 = vperm.slane %v1115_v9, %v5452_v38  ;;  %v5649_v59 = vrot.slane %v1125_v25, 4  ;;  %v1671_v60 = vsel %vm1022_vm0, %v1670_v61, %v5392_v6  ;;  %v1628_v29 = vrot.slane %v1471_v47, 4 }
 0x1f8   : > { %v1126_v26 = vrot.slane %v5637_v53, 4  ;;  %v5656_v13 = vsel %vm1022_vm0, 0.0, %v5641_v17  ;;  %v5659_v50 = vperm.slane %v1671_v60, %v5447_v30  ;;  %v1640_v54 = vrot.slane %v1621_v2, 4 }
 0x1f9   : > { %v5666_v1 = vsel %vm1022_vm0, 0.0, %v5649_v59  ;;  %v1629_v6 = vsel %vm1022_vm0, %v5472_v11, %v1628_v29  ;;  %v5672_v23 = vperm.slane %v5562_v62, %v5447_v30  ;;  %v1130_v47 = vrot.slane %v5647_v14, 4 }
 0x1fa   : > { %v1708_v22 = vrot.slane %v5644_v58, 4  ;;  %v1633_v40 = vperm.slane %v1627_v20, %v5447_v30  ;;  %v5679_v44 = vsel %vm1022_vm0, 0.0, %v1126_v26  ;;  %v1637_v11 = vperm.slane %v1629_v6, %v5447_v30 }
 0x1fb   : > { %v1802_v3 = vrot.slane %v5624_v43, 4  ;;  %v1696_v62 = vrot.slane %v5659_v50, 4  ;;  %v1814_v52 = vrot.slane %v5662_v24, 4 }
 0x1fc   : > { %v1638_v25 = vrot.slane %v1633_v40, 4  ;;  %v1641_v61 = vsel %vm1022_vm0, %v1633_v40, %v1640_v54  ;;  %v1650_v60 = vrot.slane %v1637_v11, 4  ;;  %v1653_v20 = vsel %vm1022_vm0, %v1637_v11, %v1652_v0 }
 0x1fd   : > { %v1649_v9 = vperm.slane %v1641_v61, %v5452_v38  ;;  %v1803_v29 = vsel %vm1022_vm0, %v1802_v3, %v5621_v32  ;;  %v1661_v6 = vperm.slane %v1653_v20, %v5452_v38  ;;  %v1815_v27 = vsel %vm1022_vm0, %v1814_v52, %v5672_v23  ;;  %v1002_v20 = vpop.permute.xlu1 %1001 }
 0x1fe   : > { %v1639_v26 = vsel %vm1022_vm0, %v1638_v25, %v1621_v2  ;;  %v1809_v46 = vperm.slane %v1803_v29, %v5452_v38  ;;  %v1651_v40 = vsel %vm1022_vm0, %v1650_v60, %v5593_v49  ;;  %v1821_v0 = vperm.slane %v1815_v27, %v5452_v38 }
 0x1ff   : > { %v1645_v54 = vperm.slane %v1639_v26, %v5452_v38  ;;  %v1664_v61 = vrot.slane %v1649_v9, 4  ;;  %v5701_v11 = vsel %vm1022_vm0, 0.0, %v1130_v47  ;;  %v5704_v2 = vperm.slane %v1651_v40, %v5452_v38  ;;  %v1473_v9 = vpop.permute.xlu0 %1472 }
 0x200   : > { %v5706_v3 = vrot.slane %v1661_v6, 4  ;;  %v1826_v26 = vrot.slane %v1821_v0, 4  ;;  %v1828_v49 = vrot.slane %v1809_v46, 4  ;;  %v1816_v60 = vrot.slane %v5672_v23, 4 }
 0x201   : > { %v1662_v52 = vrot.slane %v1645_v54, 4  ;;  %v5710_v29 = vsel %vm1022_vm0, 0.0, %v1664_v61  ;;  %v1666_v27 = vrot.slane %v5704_v2, 4  ;;  %v5714_v47 = vsel %vm1022_vm0, %v1664_v61, %v1645_v54 }
 0x202   : > { %v1773_v6 = vsel %vm1022_vm0, %v1772_v41, %v5514_v56  ;;  %v5723_v40 = vsel %vm1022_vm0, 0.0, %v5706_v3  ;;  %v1839_v21 = vrot.slane %v5710_v29, 4  ;;  %v1827_v37 = vsel %vm1022_vm0, %v1826_v26, %v1809_v46 }
 0x203   : > { %v1134_v25 = vrot.slane %v1002_v20, 4  ;;  %4410 = vmatpush.xpose.msk.msra.mxu3 %vm2422_vm1, %v1827_v37  ;;  %v1137_v23 = vsel %vm1022_vm0, %v1002_v20, %v1136_v36  ;;  %v1683_v5 = vsel %vm1022_vm0, %v1682_v15, %v1473_v9  ;;  %v1684_v56 = vrot.slane %v1473_v9, 4 }
 0x204   : > { %v1246_v41 = vsel %vm1022_vm0, %v5576_v39, %v5573_v33  ;;  %v5738_v54 = vsel %vm1022_vm0, 0.0, %v1662_v52  ;;  %v1829_v46 = vsel %vm1022_vm0, %v1821_v0, %v1828_v49  ;;  %v1689_v61 = vperm.slane %v1683_v5, %v5447_v30 }
 0x205   : > { %v1135_v37 = vsel %vm1022_vm0, %v1134_v25, %v5400_v8  ;;  %v5745_v36 = vperm.slane %v1137_v23, %v5447_v30  ;;  %v1685_v15 = vsel %vm1022_vm0, %v5522_v63, %v1684_v56  ;;  %v1252_v33 = vsel %vm1022_vm0, %v1251_v57, %v5603_v34 }
 0x206   : > { %v1257_v39 = vsel %vm1022_vm0, %v5582_v45, %v5580_v28  ;;  %v1693_v0 = vperm.slane %v1685_v15, %v5447_v30  ;;  %v1694_v8 = vrot.slane %v1689_v61, 4  ;;  %v1697_v25 = vsel %vm1022_vm0, %v1689_v61, %v1696_v62 }
 0x207   : > { %v5759_v20 = vperm.slane %v1246_v41, %v5447_v30  ;;  %4411 = vmatpush.xpose.msk.msra.mxu3 %vm2422_vm1, %v1773_v6  ;;  %v5763_v63 = vperm.slane %v1135_v37, %v5447_v30  ;;  %v1705_v55 = vperm.slane %v1697_v25, %v5452_v38  ;;  %v5767_v34 = vperm.slane %v1252_v33, %v5447_v30 }
 0x208   : > { %v5770_v28 = vperm.slane %v1257_v39, %v5447_v30  ;;  %v1695_v45 = vsel %vm1022_vm0, %v1694_v8, %v5659_v50  ;;  %v1706_v57 = vrot.slane %v1693_v0, 4  ;;  %v1709_v62 = vsel %vm1022_vm0, %v1693_v0, %v1708_v22  ;;  %v1014_v0 = vpop.permute.xlu2 %1013  ;;  %v1004_v8 = vpop.permute.xlu1 %1003 }
 0x209   : > { %v1263_v52 = vsel %vm1022_vm0, %v1262_v7, %v5614_v4  ;;  %v1701_v26 = vperm.slane %v1695_v45, %v5452_v38  ;;  %v1717_v49 = vperm.slane %v1709_v62, %v5452_v38  ;;  %v1720_v9 = vrot.slane %v1705_v55, 4 }
 0x20a   : > { %v5785_v6 = vperm.slane %v1263_v52, %v5447_v30  ;;  %v1850_v50 = vrot.slane %v5723_v40, 4  ;;  %v1172_v23 = vrot.slane %v5745_v36, 4  ;;  %v1707_v22 = vsel %vm1022_vm0, %v1706_v57, %v5644_v58 }
 0x20b   : > { %4414 = vmatpush.xpose.msk.msrb.mxu3 %vm2422_vm1, %v1829_v46  ;;  %v1268_v5 = vrot.slane %v5767_v34, 4  ;;  %v1160_v12 = vrot.slane %v5763_v63, 4  ;;  %v1718_v7 = vrot.slane %v1701_v26, 4  ;;  %v5794_v4 = vsel %vm1022_vm0, 0.0, %v1720_v9 }
 0x20c   : > { %v5796_v56 = vrot.slane %v1717_v49, 4  ;;  %v1280_v37 = vrot.slane %v5785_v6, 4  ;;  %v5806_v58 = vperm.slane %v1707_v22, %v5452_v38  ;;  %v5812_v33 = vsel %vm1022_vm0, %v1720_v9, %v1701_v26  ;;  %v990_v9 = vpop.permute.xlu0 %989 }
 0x20d   : > { %v1269_v41 = vsel %vm1022_vm0, %v1268_v5, %v5759_v20  ;;  %v5809_v15 = vsel %vm1022_vm0, 0.0, %v1718_v7  ;;  %v1893_v39 = vrot.slane %v5794_v4, 4  ;;  %v7221_v55 = vrot.slane %v5621_v32, 4 }
 0x20e   : > { %v5817_v25 = vsel %vm1022_vm0, 0.0, %v5796_v56  ;;  %v1817_v57 = vsel %vm1022_vm0, %v5662_v24, %v1816_v60  ;;  %v5828_v62 = vperm.slane %v1269_v41, %v5452_v38  ;;  %v1146_v32 = vrot.slane %v1014_v0, 4 }
 0x20f   : > { %4415 = vmatpush.xpose.msk.msrb.mxu3 %vm2422_vm1, %v5551_v51  ;;  %v1281_v51 = vsel %vm1022_vm0, %v1280_v37, %v5770_v28  ;;  %v1805_v45 = vsel %vm1022_vm0, %v5624_v43, %v7221_v55  ;;  %v5837_v49 = vperm.slane %v1817_v57, %v5452_v38  ;;  %v1762_v22 = vrot.slane %v5503_v48, 4 }
 0x210   : > { %v5831_v52 = vperm.slane %v1281_v51, %v5452_v38  ;;  %v5834_v26 = vperm.slane %v1805_v45, %v5452_v38  ;;  %v1190_v43 = vrot.slane %v1004_v8, 4  ;;  %v7222_v5 = vrot.slane %v5408_v10, 4 }
 0x211   : > { %v1830_v7 = vrot.slane %v5837_v49, 4  ;;  %v7223_v41 = vrot.slane %v5498_v42, 4  ;;  %v1763_v48 = vsel %vm1022_vm0, %v5493_v35, %v1762_v22  ;;  %v1148_v45 = vrot.slane %v990_v9, 4 }
 0x212   : > { %v1193_v24 = vsel %vm1022_vm0, %v1004_v8, %v7222_v5  ;;  %v1292_v60 = vrot.slane %v5831_v52, 4  ;;  %v1191_v55 = vsel %vm1022_vm0, %v1190_v43, %v5408_v10  ;;  %v1147_v8 = vsel %vm1022_vm0, %v1146_v32, %v990_v9 }
 0x213   : > { %v1751_v37 = vsel %vm1022_vm0, %v5487_v31, %v7223_v41  ;;  %v5850_v51 = vperm.slane %v1193_v24, %v5447_v30  ;;  %v1722_v57 = vrot.slane %v5806_v58, 4  ;;  %v1904_v5 = vrot.slane %v5817_v25, 4 }
 0x214   : > { %v1293_v42 = vsel %vm1022_vm0, %v1292_v60, %v5828_v62  ;;  %v5862_v31 = vperm.slane %v1763_v48, %v5452_v38  ;;  %v1831_v35 = vsel %vm1022_vm0, %v1830_v7, %v5834_v26  ;;  %v5868_v10 = vperm.slane %v1751_v37, %v5452_v38 }
 0x215   : > { %4412 = vmatmul.msk.f32.vlgmr.msra.gmra.mxu3 %vm2422_vm1, %v1293_v42  ;;  %v1149_v9 = vsel %vm1022_vm0, %v1014_v0, %v1148_v45  ;;  %v1153_v32 = vperm.slane %v1147_v8, %v5447_v30  ;;  %v1197_v43 = vperm.slane %v1191_v55, %v5447_v30  ;;  %v1228_v24 = vrot.slane %v5850_v51, 4 }
 0x216   : > { %4418 = vmatpush.xpose.msk.msra.mxu3 %vm2422_vm1, %v1831_v35  ;;  %v1776_v22 = vrot.slane %v5862_v31, 4  ;;  %v1157_v60 = vperm.slane %v1149_v9, %v5447_v30  ;;  %v1300_v37 = vsel %vm1022_vm0, %v5641_v17, %v5637_v53  ;;  %v7224_v0 = vrot.slane %v5656_v13, 4  ;;  %v1016_v9 = vpop.permute.xlu2 %1015 }
 0x217   : > { %v1158_v41 = vrot.slane %v1153_v32, 4  ;;  %v1161_v7 = vsel %vm1022_vm0, %v1153_v32, %v1160_v12  ;;  %v1311_v42 = vsel %vm1022_vm0, %v5649_v59, %v5647_v14  ;;  %v7225_v14 = vrot.slane %v5666_v1, 4 }
 0x218   : > { %v1306_v48 = vsel %vm1022_vm0, %v7224_v0, %v5679_v44  ;;  %v1169_v8 = vperm.slane %v1161_v7, %v5452_v38  ;;  %v1170_v45 = vrot.slane %v1157_v60, 4  ;;  %v1173_v55 = vsel %vm1022_vm0, %v1157_v60, %v1172_v23 }
 0x219   : > { %v1777_v12 = vsel %vm1022_vm0, %v1776_v22, %v5868_v10  ;;  %v1159_v53 = vsel %vm1022_vm0, %v1158_v41, %v5763_v63  ;;  %v1181_v17 = vperm.slane %v1173_v55, %v5452_v38  ;;  %v5896_v13 = vperm.slane %v1306_v48, %v5447_v30 }
 0x21a   : > { %4419 = vmatpush.xpose.msk.msra.mxu3 %vm2422_vm1, %v1777_v12  ;;  %v1165_v44 = vperm.slane %v1159_v53, %v5452_v38  ;;  %v1171_v23 = vsel %vm1022_vm0, %v1170_v45, %v5745_v36  ;;  %v1184_v35 = vrot.slane %v1169_v8, 4  ;;  %v1317_v59 = vsel %vm1022_vm0, %v7225_v14, %v5701_v11  ;;  %v992_v11 = vpop.permute.xlu0 %991 }
 0x21b   : > { %v5907_v63 = vperm.slane %v1171_v23, %v5452_v38  ;;  %v1188_v32 = vrot.slane %v1181_v17, 4  ;;  %v5910_v22 = vperm.slane %v1317_v59, %v5447_v30  ;;  %v1322_v60 = vrot.slane %v5896_v13, 4 }
 0x21c   : > { %v1182_v41 = vrot.slane %v1165_v44, 4  ;;  %v5914_v7 = vsel %vm1022_vm0, 0.0, %v1184_v35  ;;  %v1354_v36 = vsel %vm1022_vm0, %v1184_v35, %v1165_v44  ;;  %v5918_v1 = vperm.slane %v1300_v37, %v5447_v30 }
 0x21d   : > { %v1216_v0 = vrot.slane %v1197_v43, 4  ;;  %v5921_v48 = vsel %vm1022_vm0, 0.0, %v1188_v32  ;;  %v5924_v8 = vperm.slane %v1311_v42, %v5447_v30  ;;  %v1202_v45 = vrot.slane %v1016_v9, 4 }
 0x21e   : > { %v1186_v55 = vrot.slane %v5907_v63, 4  ;;  %v5928_v12 = vperm.slane %v1354_v36, %v5447_v30  ;;  %v1359_v53 = vrot.slane %v5914_v7, 4  ;;  %v1323_v37 = vsel %vm1022_vm0, %v1322_v60, %v5918_v1 }
 0x21f   : > { %v5934_v17 = vsel %vm1022_vm0, 0.0, %v1182_v41  ;;  %v1334_v44 = vrot.slane %v5910_v22, 4  ;;  %v1203_v23 = vsel %vm1022_vm0, %v1202_v45, %v992_v11  ;;  %v1204_v42 = vrot.slane %v992_v11, 4 }
 0x220   : > { %v5940_v35 = vsel %vm1022_vm0, %v1188_v32, %v5907_v63  ;;  %v5944_v59 = vperm.slane %v1323_v37, %v5452_v38  ;;  %v1209_v36 = vperm.slane %v1203_v23, %v5447_v30  ;;  %v1294_v46 = vrot.slane %v5828_v62, 4 }
 0x221   : > { %v1335_v60 = vsel %vm1022_vm0, %v1334_v44, %v5924_v8  ;;  %v1205_v41 = vsel %vm1022_vm0, %v1016_v9, %v1204_v42  ;;  %v1832_v11 = vrot.slane %v5834_v26, 4  ;;  %v1778_v23 = vrot.slane %v5868_v10, 4 }
 0x222   : > { %v5953_v45 = vperm.slane %v1335_v60, %v5452_v38  ;;  %v1213_v32 = vperm.slane %v1205_v41, %v5447_v30  ;;  %v1214_v61 = vrot.slane %v1209_v36, 4  ;;  %v1217_v37 = vsel %vm1022_vm0, %v1209_v36, %v1216_v0 }
 0x223   : > { %v1225_v14 = vperm.slane %v1217_v37, %v5452_v38  ;;  %v1723_v9 = vsel %vm1022_vm0, 0.0, %v1722_v57  ;;  %v1892_v62 = vperm.slane %v5812_v33, %v5447_v30  ;;  %v1894_v57 = vsel %vm1022_vm0, %v1893_v39, %v5809_v15 }
 0x224   : > { %v1346_v26 = vrot.slane %v5953_v45, 4  ;;  %v1215_v44 = vsel %vm1022_vm0, %v1214_v61, %v1197_v43  ;;  %v1226_v42 = vrot.slane %v1213_v32, 4  ;;  %v1229_v60 = vsel %vm1022_vm0, %v1213_v32, %v1228_v24 }
 0x225   : > { %v1221_v0 = vperm.slane %v1215_v44, %v5452_v38  ;;  %v1237_v36 = vperm.slane %v1229_v60, %v5452_v38  ;;  %v1240_v41 = vrot.slane %v1225_v14, 4  ;;  %v1898_v61 = vperm.slane %v1894_v57, %v5447_v30 }
 0x226   : > { %v1347_v33 = vsel %vm1022_vm0, %v1346_v26, %v5944_v59  ;;  %v1227_v10 = vsel %vm1022_vm0, %v1226_v42, %v5850_v51  ;;  %v1899_v43 = vsel %vm1022_vm0, %v5796_v56, %v5806_v58  ;;  %v1295_v51 = vsel %vm1022_vm0, %v5831_v52, %v1294_v46 }
 0x227   : > { %4413 = vmatmul.msk.f32.gmra.mxu3 %vm2422_vm1, %v1347_v33  ;;  %v5983_v24 = vperm.slane %v1227_v10, %v5452_v38  ;;  %v1238_v4 = vrot.slane %v1221_v0, 4  ;;  %v5986_v15 = vsel %vm1022_vm0, 0.0, %v1240_v41  ;;  %v5988_v39 = vrot.slane %v1237_v36, 4 }
 0x228   : > { %v1833_v14 = vsel %vm1022_vm0, %v5837_v49, %v1832_v11  ;;  %v1903_v32 = vperm.slane %v1899_v43, %v5447_v30  ;;  %v1905_v56 = vsel %vm1022_vm0, %v1904_v5, %v1723_v9  ;;  %v5999_v58 = vsel %vm1022_vm0, %v1240_v41, %v1221_v0 }
 0x229   : > { %v1413_v37 = vrot.slane %v5986_v15, 4  ;;  %v1779_v26 = vsel %vm1022_vm0, %v5862_v31, %v1778_v23  ;;  %v1909_v44 = vperm.slane %v1905_v56, %v5447_v30  ;;  %v6006_v46 = vsel %vm1022_vm0, 0.0, %v1238_v4 }
 0x22a   : > { %v1242_v52 = vrot.slane %v5983_v24, 4  ;;  %v1912_v49 = vrot.slane %v1892_v62, 4  ;;  %v1924_v11 = vrot.slane %v1903_v32, 4  ;;  %v6011_v25 = vsel %vm1022_vm0, 0.0, %v5988_v39 }
 0x22b   : > { %v1910_v5 = vrot.slane %v1898_v61, 4  ;;  %v1922_v9 = vrot.slane %v1909_v44, 4  ;;  %v1667_v42 = vsel %vm1022_vm0, 0.0, %v1666_v27  ;;  %v1838_v60 = vperm.slane %v5714_v47, %v5447_v30 }
 0x22c   : > { %v1913_v31 = vsel %vm1022_vm0, %v1898_v61, %v1912_v49  ;;  %v1925_v23 = vsel %vm1022_vm0, %v1909_v44, %v1924_v11  ;;  %v1840_v0 = vsel %vm1022_vm0, %v1839_v21, %v5738_v54  ;;  %v1348_v41 = vrot.slane %v5944_v59, 4 }
 0x22d   : > { %v6025_v36 = vperm.slane %v1925_v23, %v5452_v38  ;;  %v1911_v57 = vsel %vm1022_vm0, %v1910_v5, %v1892_v62  ;;  %v1923_v27 = vsel %vm1022_vm0, %v1922_v9, %v1903_v32  ;;  %v6031_v33 = vperm.slane %v1913_v31, %v5452_v38 }
 0x22e   : > { %v1929_v10 = vperm.slane %v1923_v27, %v5452_v38  ;;  %v1844_v47 = vperm.slane %v1840_v0, %v5447_v30  ;;  %v1845_v21 = vsel %vm1022_vm0, %v5706_v3, %v5704_v2  ;;  %v1917_v54 = vperm.slane %v1911_v57, %v5452_v38 }
 0x22f   : > { %4416 = vmatmul.msk.f32.vlgmr.msrb.gmra.mxu3 %vm2422_vm1, %v1295_v51  ;;  %v1938_v29 = vrot.slane %v6025_v36, 4  ;;  %v1849_v59 = vperm.slane %v1845_v21, %v5447_v30  ;;  %v1851_v62 = vsel %vm1022_vm0, %v1850_v50, %v1667_v42  ;;  %v1424_v61 = vrot.slane %v6011_v25, 4 }
 0x230   : > { %4422 = vmatpush.xpose.msk.msrb.mxu3 %vm2422_vm1, %v1833_v14  ;;  %v1934_v43 = vrot.slane %v1929_v10, 4  ;;  %v1855_v4 = vperm.slane %v1851_v62, %v5447_v30  ;;  %v1858_v2 = vrot.slane %v1838_v60, 4  ;;  %v1349_v51 = vsel %vm1022_vm0, %v5953_v45, %v1348_v41 }
 0x231   : > { %v1939_v3 = vsel %vm1022_vm0, %v1938_v29, %v6031_v33  ;;  %v1870_v32 = vrot.slane %v1849_v59, 4  ;;  %v1856_v56 = vrot.slane %v1844_v47, 4  ;;  %v1940_v40 = vrot.slane %v6031_v33, 4 }
 0x232   : > { %4434 = vmatpush.xpose.msk.msrb.mxu2 %vm2422_vm1, %v1939_v3  ;;  %v1935_v50 = vsel %vm1022_vm0, %v1934_v43, %v1917_v54  ;;  %v1868_v44 = vrot.slane %v1855_v4, 4  ;;  %v1187_v14 = vsel %vm1022_vm0, 0.0, %v1186_v55  ;;  %v1936_v49 = vrot.slane %v1917_v54, 4  ;;  %v6114_v3 = vpop.permute.xlu1 %801 }
 0x233   : > { %4426 = vmatpush.xpose.msk.msrb.mxu1 %vm2422_vm1, %v1935_v50  ;;  %v1859_v11 = vsel %vm1022_vm0, %v1844_v47, %v1858_v2  ;;  %v1871_v45 = vsel %vm1022_vm0, %v1855_v4, %v1870_v32  ;;  %v1360_v5 = vsel %vm1022_vm0, %v1359_v53, %v5934_v17  ;;  %v1857_v63 = vsel %vm1022_vm0, %v1856_v56, %v1838_v60 }
 0x234   : > { %4423 = vmatpush.xpose.msk.msrb.mxu3 %vm2422_vm1, %v1779_v26  ;;  %v6067_v9 = vperm.slane %v1871_v45, %v5452_v38  ;;  %v1869_v55 = vsel %vm1022_vm0, %v1868_v44, %v1849_v59  ;;  %v1364_v42 = vperm.slane %v1360_v5, %v5447_v30  ;;  %v1369_v23 = vperm.slane %v5940_v35, %v5447_v30 }
 0x235   : > { %v1875_v31 = vperm.slane %v1869_v55, %v5452_v38  ;;  %v7226_v7 = vrot.slane %v5921_v48, 4  ;;  %v1378_v17 = vrot.slane %v5928_v12, 4  ;;  %v6080_v26 = vperm.slane %v1859_v11, %v5452_v38 }
 0x236   : > { %v1884_v60 = vrot.slane %v6067_v9, 4  ;;  %v7227_v41 = vrot.slane %v5770_v28, 4  ;;  %v1863_v48 = vperm.slane %v1857_v63, %v5452_v38  ;;  %v1390_v27 = vrot.slane %v1369_v23, 4 }
 0x237   : > { %v1371_v53 = vsel %vm1022_vm0, %v7226_v7, %v1187_v14  ;;  %4417 = vmatmul.msk.f32.gmra.mxu3 %vm2422_vm1, %v1349_v51  ;;  %v1880_v35 = vrot.slane %v1875_v31, 4  ;;  %v7228_v33 = vrot.slane %v5759_v20, 4  ;;  %v1379_v29 = vsel %vm1022_vm0, %v1364_v42, %v1378_v17 }
 0x238   : > { %v1375_v0 = vperm.slane %v1371_v53, %v5447_v30  ;;  %v1283_v57 = vsel %vm1022_vm0, %v5785_v6, %v7227_v41  ;;  %v1885_v21 = vsel %vm1022_vm0, %v1884_v60, %v6080_v26  ;;  %v1376_v6 = vrot.slane %v1364_v42, 4 }
 0x239   : > { %v1271_v47 = vsel %vm1022_vm0, %v5767_v34, %v7228_v33  ;;  %v6098_v28 = vperm.slane %v1283_v57, %v5452_v38  ;;  %4435 = vmatpush.xpose.msk.msrb.mxu2 %vm2422_vm1, %v1885_v21  ;;  %v1881_v54 = vsel %vm1022_vm0, %v1880_v35, %v1863_v48  ;;  %v1937_v59 = vsel %vm1022_vm0, %v1929_v10, %v1936_v49 }
 0x23a   : > { %v1391_v20 = vsel %vm1022_vm0, %v1375_v0, %v1390_v27  ;;  %v1388_v62 = vrot.slane %v1375_v0, 4  ;;  %4427 = vmatpush.xpose.msk.msrb.mxu1 %vm2422_vm1, %v1881_v54  ;;  %v6109_v43 = vperm.slane %v1271_v47, %v5452_v38  ;;  %v1377_v2 = vsel %vm1022_vm0, %v1376_v6, %v5928_v12  ;;  %v6170_v17 = vpop.permute.xlu1 %816 }
 0x23b   : > { %v6106_v34 = vperm.slane %v1391_v20, %v5452_v38  ;;  %v1296_v4 = vrot.slane %v6098_v28, 4  ;;  %v6118_v10 = vperm.slane %v1379_v29, %v5452_v38  ;;  %v1941_v32 = vsel %vm1022_vm0, %v6025_v36, %v1940_v40  ;;  %v6194_v29 = vpop.permute.xlu2 %811 }
 0x23c   : > { %v1389_v51 = vsel %vm1022_vm0, %v1388_v62, %v1369_v23  ;;  %v1882_v56 = vrot.slane %v1863_v48, 4  ;;  %v6125_v44 = vperm.slane %v1377_v2, %v5452_v38  ;;  %v1243_v14 = vsel %vm1022_vm0, 0.0, %v1242_v52 }
 0x23d   : > { %v1404_v50 = vrot.slane %v6106_v34, 4  ;;  %v6128_v12 = vperm.slane %v1389_v51, %v5452_v38  ;;  %v1297_v49 = vsel %vm1022_vm0, %v1296_v4, %v6109_v43  ;;  %v1886_v36 = vrot.slane %v6080_v26, 4 }
 0x23e   : > { %4430 = vmatpush.xpose.msk.msra.mxu1 %vm2422_vm1, %v1937_v59  ;;  %v1883_v11 = vsel %vm1022_vm0, %v1875_v31, %v1882_v56  ;;  %v1412_v40 = vperm.slane %v5999_v58, %v5447_v30  ;;  %v1414_v52 = vsel %vm1022_vm0, %v1413_v37, %v6006_v46  ;;  %v1419_v63 = vsel %vm1022_vm0, %v5988_v39, %v5983_v24  ;;  %v6163_v46 = vpop.permute.xlu0 %806 }
 0x23f   : > { %v1405_v45 = vsel %vm1022_vm0, %v1404_v50, %v6118_v10  ;;  %v1400_v5 = vrot.slane %v6128_v12, 4  ;;  %4420 = vmatmul.msk.f32.vlgmr.msra.gmra.mxu3 %vm2422_vm1, %v1297_v49  ;;  %v1418_v58 = vperm.slane %v1414_v52, %v5447_v30  ;;  %v1423_v55 = vperm.slane %v1419_v63, %v5447_v30 }
 0x240   : > { %4436 = vmatmul.msk.f32.vlgmr.msrb.gmra.mxu2 %vm2422_vm1, %v1405_v45  ;;  %v1425_v42 = vsel %vm1022_vm0, %v1424_v61, %v1243_v14  ;;  %v1432_v31 = vrot.slane %v1412_v40, 4  ;;  %4438 = vmatpush.xpose.msk.msra.mxu3 %vm2422_vm1, %v1941_v32  ;;  %v1324_v39 = vrot.slane %v5918_v1, 4  ;;  %v1336_v37 = vrot.slane %v5924_v8, 4 }
 0x241   : > { %v1401_v15 = vsel %vm1022_vm0, %v1400_v5, %v6125_v44  ;;  %v1429_v24 = vperm.slane %v1425_v42, %v5447_v30  ;;  %v1444_v25 = vrot.slane %v1423_v55, 4  ;;  %v1430_v61 = vrot.slane %v1418_v58, 4 }
 0x242   : > { %4431 = vmatpush.xpose.msk.msra.mxu1 %vm2422_vm1, %v1883_v11  ;;  %v1325_v23 = vsel %vm1022_vm0, %v5896_v13, %v1324_v39  ;;  %v1337_v7 = vsel %vm1022_vm0, %v5910_v22, %v1336_v37  ;;  %v1887_v1 = vsel %vm1022_vm0, %v6067_v9, %v1886_v36  ;;  %v1433_v8 = vsel %vm1022_vm0, %v1418_v58, %v1432_v31  ;;  %v4572_v4 = vpop.permute.xlu1 %4571 }
 0x243   : > { %4428 = vmatmul.msk.f32.vlgmr.msrb.gmra.mxu1 %vm2422_vm1, %v1401_v15  ;;  %v1442_v53 = vrot.slane %v1429_v24, 4  ;;  %v1445_v26 = vsel %vm1022_vm0, %v1429_v24, %v1444_v25  ;;  %v1345_v60 = vperm.slane %v1337_v7, %v5452_v38  ;;  %v1431_v13 = vsel %vm1022_vm0, %v1430_v61, %v1412_v40  ;;  %v4577_v42 = vpop.permute.xlu2 %4576 }
 0x244   : > { %4439 = vmatpush.xpose.msk.msra.mxu3 %vm2422_vm1, %v1887_v1  ;;  %v6179_v0 = vperm.slane %v1445_v26, %v5452_v38  ;;  %v1333_v41 = vperm.slane %v1325_v23, %v5452_v38  ;;  %v6186_v48 = vperm.slane %v1433_v8, %v5452_v38  ;;  %v1437_v33 = vperm.slane %v1431_v13, %v5452_v38 }
 0x245   : > { %v1443_v22 = vsel %vm1022_vm0, %v1442_v53, %v1423_v55  ;;  %v1350_v57 = vrot.slane %v1345_v60, 4  ;;  %v1984_v59 = vrot.slane %v5430_v18, 4  ;;  %v2040_v20 = vrot.slane %v5433_v19, 4 }
 0x246   : > { %v1449_v9 = vperm.slane %v1443_v22, %v5452_v38  ;;  %v1458_v35 = vrot.slane %v6179_v0, 4  ;;  %v4567_v6 = vpop.permute.xlu0 %4566  ;;  %v1298_v62 = vrot.slane %v6109_v43, 4  ;;  %v4574_v32 = vunpack.i.h.bf16 %v4572_v4 }
 0x247   : > { %v1351_v27 = vsel %vm1022_vm0, %v1350_v57, %v1333_v41  ;;  %v4569_v2 = vunpack.i.h.bf16 %v4567_v6  ;;  %v4568_v51 = vunpack.i.l.bf16 %v4567_v6  ;;  %v4573_v56 = vunpack.i.l.bf16 %v4572_v4 }
 0x248   : > { %v1454_v47 = vrot.slane %v1449_v9, 4  ;;  %v1459_v21 = vsel %vm1022_vm0, %v1458_v35, %v6186_v48  ;;  %4421 = vmatmul.msk.f32.gmra.mxu3 %vm2422_vm1, %v1351_v27  ;;  %v1402_v50 = vrot.slane %v6125_v44, 4  ;;  %v1982_v14 = vrot.slane %v4574_v32, 4 }
 0x249   : > { %4437 = vmatmul.msk.f32.gmra.mxu2 %vm2422_vm1, %v1459_v21  ;;  %v1985_v49 = vsel %vm1022_vm0, %v4574_v32, %v1984_v59  ;;  %v2038_v11 = vrot.slane %v4573_v56, 4  ;;  %v2041_v36 = vsel %vm1022_vm0, %v4573_v56, %v2040_v20  ;;  %v1406_v40 = vrot.slane %v6118_v10, 4 }
 0x24a   : > { %v1455_v54 = vsel %vm1022_vm0, %v1454_v47, %v1437_v33  ;;  %v1299_v45 = vsel %vm1022_vm0, %v6098_v28, %v1298_v62  ;;  %v1993_v43 = vperm.slane %v1985_v49, %v5447_v30  ;;  %v2049_v5 = vperm.slane %v2041_v36, %v5447_v30 }
 0x24b   : > { %4429 = vmatmul.msk.f32.gmra.mxu1 %vm2422_vm1, %v1455_v54  ;;  %v1996_v52 = vrot.slane %v4569_v2, 4  ;;  %v2052_v63 = vrot.slane %v4568_v51, 4  ;;  %v1983_v44 = vsel %vm1022_vm0, %v1982_v14, %v5430_v18  ;;  %v2039_v58 = vsel %vm1022_vm0, %v2038_v11, %v5433_v19 }
 0x24c   : > { %v1403_v10 = vsel %vm1022_vm0, %v6128_v12, %v1402_v50  ;;  %v1352_v55 = vrot.slane %v1333_v41, 4  ;;  %v1989_v28 = vperm.slane %v1983_v44, %v5447_v30  ;;  %v1456_v31 = vrot.slane %v1437_v33, 4 }
 0x24d   : > { %v2045_v15 = vperm.slane %v2039_v58, %v5447_v30  ;;  %v4579_v24 = vunpack.i.h.bf16 %v4577_v42  ;;  %v4578_v39 = vunpack.i.l.bf16 %v4577_v42  ;;  %v1407_v18 = vsel %vm1022_vm0, %v6106_v34, %v1406_v40 }
 0x24e   : > { %v1460_v19 = vrot.slane %v6186_v48, 4  ;;  %v2020_v37 = vrot.slane %v1993_v43, 4  ;;  %v2076_v25 = vrot.slane %v2049_v5, 4  ;;  %v1353_v53 = vsel %vm1022_vm0, %v1345_v60, %v1352_v55 }
 0x24f   : > { %v1994_v61 = vrot.slane %v4579_v24, 4  ;;  %v1997_v12 = vsel %vm1022_vm0, %v4579_v24, %v1996_v52  ;;  %v2050_v23 = vrot.slane %v4578_v39, 4  ;;  %v2053_v7 = vsel %vm1022_vm0, %v4578_v39, %v2052_v63 }
 0x250   : > { %4424 = vmatmul.msk.f32.vlgmr.msrb.gmra.mxu3 %vm2422_vm1, %v1299_v45  ;;  %v2008_v1 = vrot.slane %v1989_v28, 4  ;;  %v2005_v8 = vperm.slane %v1997_v12, %v5447_v30  ;;  %v2061_v26 = vperm.slane %v2053_v7, %v5447_v30  ;;  %v1457_v13 = vsel %vm1022_vm0, %v1449_v9, %v1456_v31 }
 0x251   : > { %v2064_v34 = vrot.slane %v2045_v15, 4  ;;  %v1995_v22 = vsel %vm1022_vm0, %v1994_v61, %v4569_v2  ;;  %v2051_v41 = vsel %vm1022_vm0, %v2050_v23, %v4568_v51  ;;  %v6236_v60 = vsel %vm1022_vm0, %v6179_v0, %v1460_v19 }
 0x252   : > { %v2001_v57 = vperm.slane %v1995_v22, %v5447_v30  ;;  %v2018_v48 = vrot.slane %v2005_v8, 4  ;;  %v2021_v35 = vsel %vm1022_vm0, %v2005_v8, %v2020_v37  ;;  %v2057_v27 = vperm.slane %v2051_v41, %v5447_v30 }
 0x253   : > { %4432 = vmatmul.msk.f32.vlgmr.msra.gmra.mxu1 %vm2422_vm1, %v1403_v10  ;;  %v2029_v33 = vperm.slane %v2021_v35, %v5452_v38  ;;  %v2074_v47 = vrot.slane %v2061_v26, 4  ;;  %v2077_v9 = vsel %vm1022_vm0, %v2061_v26, %v2076_v25 }
 0x254   : > { %v2006_v21 = vrot.slane %v2001_v57, 4  ;;  %v2009_v6 = vsel %vm1022_vm0, %v2001_v57, %v2008_v1  ;;  %v2019_v54 = vsel %vm1022_vm0, %v2018_v48, %v1993_v43  ;;  %v2062_v59 = vrot.slane %v2057_v27, 4 }
 0x255   : > { %v2017_v20 = vperm.slane %v2009_v6, %v5452_v38  ;;  %v2025_v62 = vperm.slane %v2019_v54, %v5452_v38  ;;  %v2036_v4 = vrot.slane %v2029_v33, 4  ;;  %v2065_v0 = vsel %vm1022_vm0, %v2057_v27, %v2064_v34 }
 0x256   : > { %v2007_v2 = vsel %vm1022_vm0, %v2006_v21, %v1989_v28  ;;  %v2063_v51 = vsel %vm1022_vm0, %v2062_v59, %v2045_v15  ;;  %v2073_v32 = vperm.slane %v2065_v0, %v5452_v38  ;;  %v2075_v56 = vsel %vm1022_vm0, %v2074_v47, %v2049_v5 }
 0x257   : > { %v2013_v50 = vperm.slane %v2007_v2, %v5452_v38  ;;  %v2032_v14 = vrot.slane %v2017_v20, 4  ;;  %v2034_v49 = vrot.slane %v2025_v62, 4  ;;  %v2037_v11 = vsel %vm1022_vm0, 0.0, %v2036_v4 }
 0x258   : > { %4425 = vmatmul.msk.f32.gmra.mxu3 %vm2422_vm1, %v1353_v53  ;;  %v2069_v36 = vperm.slane %v2063_v51, %v5452_v38  ;;  %v2081_v40 = vperm.slane %v2075_v56, %v5452_v38  ;;  %v2085_v45 = vperm.slane %v2077_v9, %v5452_v38  ;;  %v2088_v43 = vrot.slane %v2073_v32, 4 }
 0x259   : > { %v2030_v52 = vrot.slane %v2013_v50, 4  ;;  %v2033_v63 = vsel %vm1022_vm0, 0.0, %v2032_v14  ;;  %v2035_v44 = vsel %vm1022_vm0, 0.0, %v2034_v49  ;;  %v2222_v58 = vrot.slane %v2037_v11, 4 }
 0x25a   : > { %v2086_v5 = vrot.slane %v2069_v36, 4  ;;  %v2089_v10 = vsel %vm1022_vm0, 0.0, %v2088_v43  ;;  %v2090_v55 = vrot.slane %v2081_v40, 4  ;;  %v2092_v28 = vrot.slane %v2085_v45, 4 }
 0x25b   : > { %4433 = vmatmul.msk.f32.gmra.mxu1 %vm2422_vm1, %v1457_v13  ;;  %v2211_v42 = vrot.slane %v2033_v63, 4  ;;  %v2265_v31 = vrot.slane %v2089_v10, 4  ;;  %v2260_v15 = vsel %vm1022_vm0, %v2088_v43, %v2069_v36  ;;  %v2031_v24 = vsel %vm1022_vm0, 0.0, %v2030_v52 }
 0x25c   : > { %v2091_v39 = vsel %vm1022_vm0, 0.0, %v2090_v55  ;;  %v2093_v19 = vsel %vm1022_vm0, 0.0, %v2092_v28  ;;  %v2087_v37 = vsel %vm1022_vm0, 0.0, %v2086_v5  ;;  %v2264_v25 = vperm.slane %v2260_v15, %v5447_v30 }
 0x25d   : > { %v2276_v61 = vrot.slane %v2093_v19, 4  ;;  %v2266_v12 = vsel %vm1022_vm0, %v2265_v31, %v2087_v37  ;;  %v2271_v23 = vsel %vm1022_vm0, %v2092_v28, %v2081_v40  ;;  %v2206_v7 = vsel %vm1022_vm0, %v2032_v14, %v2013_v50  ;;  %v4600_v37 = vld [vmem:[%s7229_s7] ss:$0 sm:$0xff] }
 0x25e   : > { %v2270_v53 = vperm.slane %v2266_v12, %v5447_v30  ;;  %v2275_v1 = vperm.slane %v2271_v23, %v5447_v30  ;;  %v2212_v8 = vsel %vm1022_vm0, %v2211_v42, %v2031_v24  ;;  %v2217_v34 = vsel %vm1022_vm0, %v2036_v4, %v2025_v62 }
 0x25f   : > { %v2277_v26 = vsel %vm1022_vm0, %v2276_v61, %v2091_v39  ;;  %v2216_v13 = vperm.slane %v2212_v8, %v5447_v30  ;;  %v2223_v22 = vsel %vm1022_vm0, %v2222_v58, %v2035_v44  ;;  %v2221_v48 = vperm.slane %v2217_v34, %v5447_v30 }
 0x260   : > { %4440 = vmatmul.msk.f32.vlgmr.msra.gmra.mxu3 %vm2422_vm1, %v1407_v18  ;;  %v2210_v18 = vperm.slane %v2206_v7, %v5447_v30  ;;  %v2281_v41 = vperm.slane %v2277_v26, %v5447_v30  ;;  %v2282_v57 = vrot.slane %v2270_v53, 4  ;;  %v2227_v35 = vperm.slane %v2223_v22, %v5447_v30 }
 0x261   : > { %v2228_v27 = vrot.slane %v2216_v13, 4  ;;  %v2284_v33 = vrot.slane %v2264_v25, 4  ;;  %v2296_v47 = vrot.slane %v2275_v1, 4  ;;  %v2242_v59 = vrot.slane %v2221_v48, 4 }
 0x262   : > { %v2230_v9 = vrot.slane %v2210_v18, 4  ;;  %v2283_v21 = vsel %vm1022_vm0, %v2282_v57, %v2264_v25  ;;  %v2294_v6 = vrot.slane %v2281_v41, 4  ;;  %v2240_v54 = vrot.slane %v2227_v35, 4 }
 0x263   : > { %v2289_v20 = vperm.slane %v2283_v21, %v5452_v38  ;;  %v2229_v62 = vsel %vm1022_vm0, %v2228_v27, %v2210_v18  ;;  %v2285_v4 = vsel %vm1022_vm0, %v2270_v53, %v2284_v33  ;;  %v2297_v0 = vsel %vm1022_vm0, %v2281_v41, %v2296_v47 }
 0x264   : > { %v2295_v2 = vsel %vm1022_vm0, %v2294_v6, %v2275_v1  ;;  %v2235_v51 = vperm.slane %v2229_v62, %v5452_v38  ;;  %v2241_v32 = vsel %vm1022_vm0, %v2240_v54, %v2221_v48  ;;  %v2293_v56 = vperm.slane %v2285_v4, %v5452_v38 }
 0x265   : > { %v2301_v50 = vperm.slane %v2295_v2, %v5452_v38  ;;  %v2247_v14 = vperm.slane %v2241_v32, %v5452_v38  ;;  %v2308_v49 = vrot.slane %v2289_v20, 4  ;;  %v2305_v11 = vperm.slane %v2297_v0, %v5452_v38 }
 0x266   : > { %v2254_v36 = vrot.slane %v2235_v51, 4  ;;  %v2231_v40 = vsel %vm1022_vm0, %v2216_v13, %v2230_v9  ;;  %v2312_v45 = vrot.slane %v2293_v56, 4  ;;  %v6310_v25 = vmul.f32 %v4600_v37, %v6114_v3  ;;  %v6329_v13 = vpop.f32.mrf.mxu2 }
 0x267   : > { %v2306_v43 = vrot.slane %v2301_v50, 4  ;;  %v2252_v52 = vrot.slane %v2247_v14, 4  ;;  %v2309_v63 = vsel %vm1022_vm0, %v2301_v50, %v2308_v49  ;;  %v2310_v44 = vrot.slane %v2305_v11, 4 }
 0x268   : > { %4441 = vmatmul.msk.f32.gmra.mxu3 %vm2422_vm1, %v6236_v60  ;;  %v2243_v60 = vsel %vm1022_vm0, %v2227_v35, %v2242_v59  ;;  %2965 = vmatpush.msrb.mxu1 %v2309_v63  ;;  %v2255_v58 = vsel %vm1022_vm0, %v2247_v14, %v2254_v36  ;;  %v2239_v5 = vperm.slane %v2231_v40, %v5452_v38  ;;  %vm2719_vm2 = vcmp.eq.f32.partialorder %v6310_v25, 0.0  ;;  %v4601_v35 = vld [vmem:[%s7229_s7 + $0x1] ss:$0 sm:$0xff] }
 0x269   : > { %v2251_v10 = vperm.slane %v2243_v60, %v5452_v38  ;;  %v2313_v55 = vsel %vm1022_vm0, %v2305_v11, %v2312_v45  ;;  %v2307_v28 = vsel %vm1022_vm0, %v2306_v43, %v2289_v20  ;;  %v2253_v42 = vsel %vm1022_vm0, %v2252_v52, %v2235_v51 }
 0x26a   : > { %3023 = vmatpush.msrb.mxu3 %v2313_v55  ;;  %4468 = vmatpush.msra.mxu2 %v2307_v28  ;;  %v2311_v31 = vsel %vm1022_vm0, %v2310_v44, %v2293_v56  ;;  %v2258_v24 = vrot.slane %v2239_v5, 4  ;;  %v6320_v53 = vmul.f32 %v4600_v37, %v6163_v46  ;;  %v6343_v33 = vmul.f32 %v4601_v35, %v6194_v29 }
 0x26b   : > { %2936 = vmatpush.msrb.mxu0 %v2307_v28  ;;  %v2256_v15 = vrot.slane %v2251_v10, 4  ;;  %2966 = vmatpush.msrb.mxu1 %v2255_v58  ;;  %v828_v62 = vmul.f32 %v4601_v35, %v6170_v17 }
 0x26c   : > { %4469 = vmatpush.msra.mxu2 %v2253_v42  ;;  %v2259_v19 = vsel %vm1022_vm0, %v2251_v10, %v2258_v24  ;;  %vm2720_vm4 = vcmp.eq.f32.partialorder %v6320_v53, 0.0  ;;  %vm2721_vm5 = vcmp.eq.f32.partialorder %v6343_v33, 0.0  ;;  %v6418_v53 = vadd.f32 %v6329_v13, %v5427_v16 }
 0x26d   : > { %2937 = vmatpush.msrb.mxu0 %v2253_v42  ;;  %v2257_v39 = vsel %vm1022_vm0, %v2256_v15, %v2239_v5  ;;  %3024 = vmatpush.msrb.mxu3 %v2259_v19  ;;  %vm2722_vm6 = vcmp.eq.f32.partialorder %v828_v62, 0.0 }
 0x26e   : > { %2994 = vmatpush.msrb.mxu2 %v2311_v31  ;;  %v6337_v48 = vpop.f32.mrf.mxu2 }
 0x270   : > { %2995 = vmatpush.msrb.mxu2 %v2257_v39 }
 0x298   : > { %v2452_v61 = vpop.f32.mrf.mxu3 }
 0x299   : > { %v2703_v12 = vmul.f32 0.35355338, %v2452_v61 }
 0x29b   : > { %v6315_v23 = vsel %vm2719_vm2, -10000.0, %v2703_v12 }
 0x29c   : > { %v2740_v7 = vsel %vm2739_vm3, %v6315_v23, -inf }
 0x29d   : > { %2741 = vmax.xlane.f32.xlu2 %v2740_v7 }
 0x2aa   : > { %v2455_v1 = vpop.f32.mrf.mxu3 }
 0x2ab   : > { %v2704_v18 = vmul.f32 0.35355338, %v2455_v1 }
 0x2ad   : > { %v6325_v8 = vsel %vm2720_vm4, -10000.0, %v2704_v18 }
 0x2ae   : > { %v2743_v26 = vsel %vm2739_vm3, %v6325_v8, -inf }
 0x2af   : > { %2744 = vmax.xlane.f32.xlu2 %v2743_v26 }
 0x2b2   : > { %v2487_v34 = vpop.f32.mrf.mxu3 }
 0x2b3   : > { %v2705_v22 = vmul.f32 0.35355338, %v2487_v34 }
 0x2b5   : > { %v6333_v41 = vsel %vm2719_vm2, -10000.0, %v2705_v22 }
 0x2b6   : > { %v2746_v57 = vsel %vm2739_vm3, %v6333_v41, -inf }
 0x2b7   : > { %2747 = vmax.xlane.f32.xlu0 %v2746_v57 }
 0x2ba   : > { %v2490_v27 = vpop.f32.mrf.mxu3 }
 0x2bb   : > { %v2706_v5 = vmul.f32 0.35355338, %v2490_v27 }
 0x2bd   : > { %v6383_v28 = vsel %vm2720_vm4, -10000.0, %v2706_v5 }
 0x2be   : > { %v2749_v15 = vsel %vm2739_vm3, %v6383_v28, -inf }
 0x2c0   : > { %v2592_v47 = vpop.f32.mrf.mxu1 }
 0x2c1   : > { %v2711_v9 = vmul.f32 0.35355338, %v2592_v47 }
 0x2c2   : > { %v2522_v59 = vpop.f32.mrf.mxu3 }
 0x2c3   : > { %v6348_v21 = vsel %vm2721_vm5, -10000.0, %v2711_v9  ;;  %v2662_v6 = vpop.f32.mrf.mxu2  ;;  %v2707_v39 = vmul.f32 0.35355338, %v2522_v59  ;;  %v6422_v9 = vadd.f32 %v6337_v48, %v5427_v16 }
 0x2c4   : > { %v2764_v54 = vsel %vm2739_vm3, %v6348_v21, -inf  ;;  %v2715_v20 = vmul.f32 0.35355338, %v2662_v6 }
 0x2c5   : > { %2765 = vmax.xlane.f32.xlu2 %v2764_v54  ;;  %v2727_v61 = vsel %vm2719_vm2, -10000.0, %v2707_v39  ;;  %v4585_v54 = vpack.i.bf16 %v6418_v53, %v6422_v9 }
 0x2c6   : > { %v6355_v0 = vsel %vm2721_vm5, -10000.0, %v2715_v20  ;;  %v2752_v7 = vsel %vm2739_vm3, %v2727_v61, -inf }
 0x2c7   : > { %v2776_v51 = vsel %vm2739_vm3, %v6355_v0, -inf }
 0x2c8   : > { %v2595_v4 = vpop.f32.mrf.mxu1 }
 0x2c9   : > { %v2712_v2 = vmul.f32 0.35355338, %v2595_v4 }
 0x2cb   : > { %v6360_v32 = vsel %vm2722_vm6, -10000.0, %v2712_v2  ;;  %v2525_v50 = vpop.f32.mrf.mxu3 }
 0x2cc   : > { %v2767_v56 = vsel %vm2739_vm3, %v6360_v32, -inf  ;;  %v2665_v14 = vpop.f32.mrf.mxu2  ;;  %v2708_v49 = vmul.f32 0.35355338, %v2525_v50 }
 0x2cd   : > { %2777 = vmax.xlane.f32.xlu2 %v2776_v51  ;;  %2768 = vmax.xlane.f32.xlu0 %v2767_v56  ;;  %v2716_v11 = vmul.f32 0.35355338, %v2665_v14 }
 0x2ce   : > { %v6366_v40 = vsel %vm2720_vm4, -10000.0, %v2708_v49 }
 0x2cf   : > { %v6369_v45 = vsel %vm2722_vm6, -10000.0, %v2716_v11  ;;  %v2755_v52 = vsel %vm2739_vm3, %v6366_v40, -inf }
 0x2d0   : > { %v2627_v36 = vpop.f32.mrf.mxu1  ;;  %v2779_v44 = vsel %vm2739_vm3, %v6369_v45, -inf }
 0x2d1   : > { %v2713_v60 = vmul.f32 0.35355338, %v2627_v36 }
 0x2d3   : > { %v6373_v43 = vsel %vm2721_vm5, -10000.0, %v2713_v60  ;;  %v2557_v58 = vpop.f32.mrf.mxu3 }
 0x2d4   : > { %v2770_v63 = vsel %vm2739_vm3, %v6373_v43, -inf  ;;  %v2709_v19 = vmul.f32 0.35355338, %v2557_v58 }
 0x2d5   : > { %2756 = vmax.xlane.f32.xlu2 %v2755_v52  ;;  %2771 = vmax.xlane.f32.xlu1 %v2770_v63 }
 0x2d6   : > { %2780 = vmax.xlane.f32.xlu0 %v2779_v44  ;;  %v6394_v37 = vsel %vm2719_vm2, -10000.0, %v2709_v19 }
 0x2d7   : > { %v2758_v12 = vsel %vm2739_vm3, %v6394_v37, -inf }
 0x2d8   : > { %v2630_v10 = vpop.f32.mrf.mxu1 }
 0x2d9   : > { %v2714_v55 = vmul.f32 0.35355338, %v2630_v10 }
 0x2db   : > { %v6386_v42 = vsel %vm2722_vm6, -10000.0, %v2714_v55  ;;  %v2560_v24 = vpop.f32.mrf.mxu3 }
 0x2dc   : > { %v2773_v31 = vsel %vm2739_vm3, %v6386_v42, -inf  ;;  %v2710_v18 = vmul.f32 0.35355338, %v2560_v24 }
 0x2dd   : > { %2774 = vmax.xlane.f32.xlu1 %v2773_v31 }
 0x2de   : > { %2750 = vmax.xlane.f32.xlu0 %v2749_v15  ;;  %v6403_v26 = vsel %vm2720_vm4, -10000.0, %v2710_v18 }
 0x2df   : > { %v2761_v34 = vsel %vm2739_vm3, %v6403_v26, -inf }
 0x2e3   : > { %v2697_v1 = vpop.f32.mrf.mxu3 }
 0x2e4   : > { %v2717_v57 = vmul.f32 0.35355338, %v2697_v1 }
 0x2e5   : > { %2759 = vmax.xlane.f32.xlu1 %v2758_v12 }
 0x2e6   : > { %2753 = vmax.xlane.f32.xlu0 %v2752_v7  ;;  %v6414_v47 = vsel %vm2721_vm5, -10000.0, %v2717_v57  ;;  %vm3832_vm5 = vcmask 1046528  }
 0x2e7   : > { %v2782_v6 = vsel %vm2739_vm3, %v6414_v47, -inf }
 0x2eb   : > { %v2700_v22 = vpop.f32.mrf.mxu3 }
 0x2ec   : > { %v2718_v25 = vmul.f32 0.35355338, %v2700_v22 }
 0x2ed   : > { %2762 = vmax.xlane.f32.xlu1 %v2761_v34 }
 0x2ee   : > { %v6408_v35 = vsel %vm2722_vm6, -10000.0, %v2718_v25  ;;  %vm3847_vm6 = vcmask 1045504  }
 0x2ef   : > { %v2785_v27 = vsel %vm2739_vm3, %v6408_v35, -inf }
 0x2f0   : > { %2786 = vmax.xlane.f32.xlu2 %v2785_v27 }
 0x2f5   : > { %2783 = vmax.xlane.f32.xlu1 %v2782_v6 }
 0x2fa   : > { %4586 = vrot.lane.b32.xlu0 %v4585_v54, %s4957_s3 }
 0x30e   : > { %4581 = vrot.lane.b32.xlu1 %v4585_v54, %s4958_s5 }
 0x310   : > { %v2742_v33 = vpop.xlane.xlu2 %2741 }
 0x311   : > { %v2788_v59 = vsub.f32 %v6315_v23, %v2742_v33 }
 0x313   : > { %v2804_v13 = vmul.f32 1.442695, %v2788_v59 }
 0x315   : > { %4609 = vpow2.f32 %v2804_v13 }
 0x31b   : > { %v6431_v20 = vpop.eup %4609 }
 0x31c   : > { %v2836_v16 = vsel %vm2739_vm3, %v6431_v20, 0.0 }
 0x322   : > { %v2745_v48 = vpop.xlane.xlu2 %2744 }
 0x323   : > { %v2789_v62 = vsub.f32 %v6325_v8, %v2745_v48 }
 0x324   : > { %2837 = vadd.xlane.f32.xlu0 %v2836_v16 }
 0x325   : > { %v2806_v4 = vmul.f32 1.442695, %v2789_v62 }
 0x327   : > { %4611 = vpow2.f32 %v2806_v4 }
 0x32a   : > { %v2748_v56 = vpop.xlane.xlu0 %2747 }
 0x32b   : > { %v2790_v22 = vsub.f32 %v6333_v41, %v2748_v56 }
 0x32d   : > { %v6436_v2 = vpop.eup %4611  ;;  %v2808_v6 = vmul.f32 1.442695, %v2790_v22  ;;  %v2152_v22 = vrot.slane %v6422_v9, 4 }
 0x32e   : > { %v2839_v51 = vsel %vm2739_vm3, %v6436_v2, 0.0 }
 0x32f   : > { %2840 = vadd.xlane.f32.xlu2 %v2839_v51 }
 0x338   : > { %v2766_v23 = vpop.xlane.xlu2 %2765 }
 0x340   : > { %v2778_v50 = vpop.xlane.xlu2 %2777  ;;  %v6440_v14 = vpop.xlane.xlu0 %2768 }
 0x341   : > { %v2800_v8 = vsub.f32 %v6355_v0, %v2778_v50 }
 0x343   : > { %v2828_v63 = vmul.f32 1.442695, %v2800_v8 }
 0x347   : > { %4591 = vrot.lane.b32.xlu2 %v4585_v54, %s4959_s11 }
 0x348   : > { %v2757_v49 = vpop.xlane.xlu2 %2756  ;;  %v2772_v60 = vpop.xlane.xlu1 %2771 }
 0x349   : > { %v2793_v11 = vsub.f32 %v6366_v40, %v2757_v49  ;;  %v2781_v36 = vpop.xlane.xlu0 %2780 }
 0x34b   : > { %v2814_v52 = vmul.f32 1.442695, %v2793_v11 }
 0x34d   : > { %4613 = vpow2.f32 %v2814_v52 }
 0x34e   : > { %4615 = vpow2.f32 %v2828_v63 }
 0x350   : > { %v2775_v58 = vpop.xlane.xlu1 %2774 }
 0x351   : > { %v2751_v44 = vpop.xlane.xlu0 %2750  ;;  %v2799_v4 = vsub.f32 %v6386_v42, %v2775_v58 }
 0x352   : > { %v2791_v1 = vsub.f32 %v6383_v28, %v2751_v44  ;;  %v2798_v28 = vsub.f32 %v6373_v43, %v2772_v60  ;;  %v2797_v43 = vsub.f32 %v6360_v32, %v6440_v14 }
 0x353   : > { %v6445_v5 = vpop.eup %4613  ;;  %v2826_v32 = vmul.f32 1.442695, %v2799_v4 }
 0x354   : > { %v2851_v10 = vsel %vm2739_vm3, %v6445_v5, 0.0  ;;  %v6449_v55 = vpop.eup %4615  ;;  %v2810_v57 = vmul.f32 1.442695, %v2791_v1  ;;  %v2824_v13 = vmul.f32 1.442695, %v2798_v28 }
 0x355   : > { %2852 = vadd.xlane.f32.xlu1 %v2851_v10  ;;  %v2872_v0 = vsel %vm2739_vm3, %v6449_v55, 0.0  ;;  %v2822_v50 = vmul.f32 1.442695, %v2797_v43 }
 0x358   : > { %v2760_v31 = vpop.xlane.xlu1 %2759 }
 0x359   : > { %v2754_v40 = vpop.xlane.xlu0 %2753  ;;  %v2794_v39 = vsub.f32 %v6394_v37, %v2760_v31 }
 0x35a   : > { %v2792_v15 = vsub.f32 %v2727_v61, %v2754_v40 }
 0x35b   : > { %v2816_v18 = vmul.f32 1.442695, %v2794_v39 }
 0x35c   : > { %v2812_v24 = vmul.f32 1.442695, %v2792_v15 }
 0x35d   : > { %2873 = vadd.xlane.f32.xlu1 %v2872_v0 }
 0x35e   : > { %4617 = vpow2.f32 %v2812_v24 }
 0x360   : > { %v2763_v19 = vpop.xlane.xlu1 %2762 }
 0x361   : > { %v2795_v12 = vsub.f32 %v6403_v26, %v2763_v19  ;;  %v2801_v26 = vsub.f32 %v6369_v45, %v2781_v36 }
 0x363   : > { %v2818_v34 = vmul.f32 1.442695, %v2795_v12  ;;  %v2830_v41 = vmul.f32 1.442695, %v2801_v26  ;;  %v2787_v51 = vpop.xlane.xlu2 %2786 }
 0x364   : > { %v6455_v7 = vpop.eup %4617  ;;  %v2803_v14 = vsub.f32 %v6408_v35, %v2787_v51 }
 0x365   : > { %v2848_v61 = vsel %vm2739_vm3, %v6455_v7, 0.0  ;;  %4619 = vpow2.f32 %v2818_v34  ;;  %v2096_v34 = vrot.slane %v6418_v53, 4 }
 0x366   : > { %2849 = vadd.xlane.f32.xlu0 %v2848_v61  ;;  %4621 = vpow2.f32 %v2816_v18  ;;  %v2834_v36 = vmul.f32 1.442695, %v2803_v14 }
 0x367   : > { %4623 = vpow2.f32 %v2810_v57 }
 0x368   : > { %v2784_v25 = vpop.xlane.xlu1 %2783 }
 0x369   : > { %v2802_v37 = vsub.f32 %v6414_v47, %v2784_v25  ;;  %v2796_v47 = vsub.f32 %v6348_v21, %v2766_v23 }
 0x36b   : > { %v6463_v27 = vpop.eup %4619  ;;  %v2832_v54 = vmul.f32 1.442695, %v2802_v37  ;;  %v2820_v62 = vmul.f32 1.442695, %v2796_v47 }
 0x36c   : > { %v2857_v33 = vsel %vm2739_vm3, %v6463_v27, 0.0  ;;  %v6468_v59 = vpop.eup %4621  ;;  %v4587_v15 = vpop.permute.xlu0 %4586 }
 0x36d   : > { %4625 = vpow2.f32 %v2832_v54  ;;  %v2854_v45 = vsel %vm2739_vm3, %v6468_v59, 0.0  ;;  %v6473_v16 = vpop.eup %4623  ;;  %v4589_v19 = vunpack.i.h.bf16 %v4587_v15  ;;  %v4588_v12 = vunpack.i.l.bf16 %v4587_v15 }
 0x36e   : > { %2858 = vadd.xlane.f32.xlu0 %v2857_v33  ;;  %4627 = vpow2.f32 %v2808_v6  ;;  %v2845_v21 = vsel %vm2739_vm3, %v6473_v16, 0.0 }
 0x36f   : > { %4629 = vpow2.f32 %v2830_v41  ;;  %v2094_v18 = vrot.slane %v4589_v19, 4  ;;  %v2150_v57 = vrot.slane %v4588_v12, 4  ;;  %v2097_v25 = vsel %vm1022_vm0, %v4589_v19, %v2096_v34 }
 0x370   : > { %2855 = vadd.xlane.f32.xlu2 %v2854_v45  ;;  %4631 = vpow2.f32 %v2824_v13  ;;  %v2105_v41 = vperm.slane %v2097_v25, %v5447_v30 }
 0x371   : > { %4633 = vpow2.f32 %v2820_v62  ;;  %v2095_v37 = vsel %vm1022_vm0, %v2094_v18, %v6418_v53  ;;  %v2151_v54 = vsel %vm1022_vm0, %v2150_v57, %v6422_v9 }
 0x372   : > { %4635 = vpow2.f32 %v2822_v50  ;;  %v2101_v33 = vperm.slane %v2095_v37, %v5447_v30  ;;  %v2157_v51 = vperm.slane %v2151_v54, %v5447_v30 }
 0x373   : > { %v6477_v48 = vpop.eup %4625  ;;  %4637 = vpow2.f32 %v2826_v32  ;;  %v2132_v32 = vrot.slane %v2105_v41, 4 }
 0x374   : > { %v2878_v23 = vsel %vm2739_vm3, %v6477_v48, 0.0  ;;  %v6484_v56 = vpop.eup %4627  ;;  %4639 = vpow2.f32 %v2834_v36  ;;  %v2176_v15 = vrot.slane %v2157_v51, 4 }
 0x375   : > { %2879 = vadd.xlane.f32.xlu1 %v2878_v23  ;;  %v6487_v49 = vpop.eup %4629  ;;  %v2842_v42 = vsel %vm2739_vm3, %v6484_v56, 0.0 }
 0x376   : > { %2846 = vadd.xlane.f32.xlu0 %v2845_v21  ;;  %v6491_v11 = vpop.eup %4631  ;;  %v2875_v60 = vsel %vm2739_vm3, %v6487_v49, 0.0 }
 0x377   : > { %v2866_v8 = vsel %vm2739_vm3, %v6491_v11, 0.0  ;;  %v6497_v52 = vpop.eup %4633 }
 0x378   : > { %2843 = vadd.xlane.f32.xlu2 %v2842_v42  ;;  %v6499_v35 = vpop.eup %4635  ;;  %v2860_v63 = vsel %vm2739_vm3, %v6497_v52, 0.0  ;;  %v2120_v42 = vrot.slane %v2101_v33, 4 }
 0x379   : > { %v6503_v44 = vpop.eup %4637  ;;  %v2863_v58 = vsel %vm2739_vm3, %v6499_v35, 0.0 }
 0x37a   : > { %v2869_v10 = vsel %vm2739_vm3, %v6503_v44, 0.0  ;;  %v6509_v40 = vpop.eup %4639 }
 0x37b   : > { %v2881_v31 = vsel %vm2739_vm3, %v6509_v40, 0.0 }
 0x37d   : > { %2867 = vadd.xlane.f32.xlu1 %v2866_v8 }
 0x37e   : > { %2876 = vadd.xlane.f32.xlu0 %v2875_v60 }
 0x380   : > { %2861 = vadd.xlane.f32.xlu2 %v2860_v63  ;;  %v4582_v61 = vpop.permute.xlu1 %4581 }
 0x381   : > { %v4584_v26 = vunpack.i.h.bf16 %v4582_v61  ;;  %v4583_v6 = vunpack.i.l.bf16 %v4582_v61 }
 0x383   : > { %v2108_v43 = vrot.slane %v4584_v26, 4  ;;  %v2164_v62 = vrot.slane %v4583_v6, 4 }
 0x385   : > { %2870 = vadd.xlane.f32.xlu1 %v2869_v10 }
 0x386   : > { %2864 = vadd.xlane.f32.xlu0 %v2863_v58 }
 0x388   : > { %2882 = vadd.xlane.f32.xlu2 %v2881_v31 }
 0x397   : > { %v2838_v24 = vpop.xlane.xlu0 %2837 }
 0x398   : > { %4641 = vrcp.f32 %v2838_v24 }
 0x39e   : > { %v4642_v0 = vpop.eup %4641 }
 0x39f   : > { %v2900_v39 = vmul.f32 %v4642_v0, %v6431_v20  ;;  %v2153_v20 = vsel %vm1022_vm0, %v4588_v12, %v2152_v22 }
 0x3a0   : > { %v2161_v47 = vperm.slane %v2153_v20, %v5447_v30 }
 0x3a1   : > { %4442 = vmatmul.msk.f32.vlgmr.msrb.gmra.mxu0 %vm2739_vm3, %v2900_v39 }
 0x3a2   : > { %v2841_v1 = vpop.xlane.xlu2 %2840  ;;  %v2188_v36 = vrot.slane %v2161_v47, 4 }
 0x3a3   : > { %4643 = vrcp.f32 %v2841_v1 }
 0x3a9   : > { %v4644_v28 = vpop.eup %4643 }
 0x3aa   : > { %v2901_v13 = vmul.f32 %v4644_v28, %v6436_v2  ;;  %v4592_v45 = vpop.permute.xlu2 %4591 }
 0x3ab   : > { %v4594_v53 = vunpack.i.h.bf16 %v4592_v45  ;;  %v4593_v4 = vunpack.i.l.bf16 %v4592_v45 }
 0x3ac   : > { %4443 = vmatmul.msk.f32.vlgmr.msra.gmra.mxu2 %vm2739_vm3, %v2901_v13 }
 0x3ad   : > { %v2106_v21 = vrot.slane %v4594_v53, 4  ;;  %v2109_v9 = vsel %vm1022_vm0, %v4594_v53, %v2108_v43  ;;  %v2162_v23 = vrot.slane %v4593_v4, 4  ;;  %v2165_v50 = vsel %vm1022_vm0, %v4593_v4, %v2164_v62 }
 0x3ae   : > { %v2117_v14 = vperm.slane %v2109_v9, %v5447_v30  ;;  %v2173_v2 = vperm.slane %v2165_v50, %v5447_v30 }
 0x3af   : > { %v2107_v60 = vsel %vm1022_vm0, %v2106_v21, %v4584_v26  ;;  %v2163_v8 = vsel %vm1022_vm0, %v2162_v23, %v4583_v6 }
 0x3b0   : > { %v2113_v63 = vperm.slane %v2107_v60, %v5447_v30  ;;  %v2130_v58 = vrot.slane %v2117_v14, 4  ;;  %v2133_v10 = vsel %vm1022_vm0, %v2117_v14, %v2132_v32  ;;  %v2169_v31 = vperm.slane %v2163_v8, %v5447_v30 }
 0x3b1   : > { %v2141_v24 = vperm.slane %v2133_v10, %v5452_v38  ;;  %v2186_v0 = vrot.slane %v2173_v2, 4  ;;  %v2189_v39 = vsel %vm1022_vm0, %v2173_v2, %v2188_v36 }
 0x3b2   : > { %v2118_v19 = vrot.slane %v2113_v63, 4  ;;  %v2121_v12 = vsel %vm1022_vm0, %v2113_v63, %v2120_v42  ;;  %v2131_v1 = vsel %vm1022_vm0, %v2130_v58, %v2105_v41  ;;  %v2174_v18 = vrot.slane %v2169_v31, 4 }
 0x3b3   : > { %v2129_v34 = vperm.slane %v2121_v12, %v5452_v38  ;;  %v2137_v61 = vperm.slane %v2131_v1, %v5452_v38  ;;  %v2148_v22 = vrot.slane %v2141_v24, 4  ;;  %v2177_v57 = vsel %vm1022_vm0, %v2169_v31, %v2176_v15 }
 0x3b4   : > { %v2119_v25 = vsel %vm1022_vm0, %v2118_v19, %v2101_v33  ;;  %v2175_v37 = vsel %vm1022_vm0, %v2174_v18, %v2157_v51  ;;  %v2185_v20 = vperm.slane %v2177_v57, %v5452_v38  ;;  %v2187_v26 = vsel %vm1022_vm0, %v2186_v0, %v2161_v47 }
 0x3b5   : > { %v2125_v6 = vperm.slane %v2119_v25, %v5452_v38  ;;  %v2144_v28 = vrot.slane %v2129_v34, 4  ;;  %v2146_v54 = vrot.slane %v2137_v61, 4  ;;  %v2149_v41 = vsel %vm1022_vm0, 0.0, %v2148_v22 }
 0x3b6   : > { %v2181_v13 = vperm.slane %v2175_v37, %v5452_v38  ;;  %v2193_v45 = vperm.slane %v2187_v26, %v5452_v38  ;;  %v2197_v43 = vperm.slane %v2189_v39, %v5452_v38  ;;  %v2200_v62 = vrot.slane %v2185_v20, 4 }
 0x3b7   : > { %v2145_v33 = vsel %vm1022_vm0, 0.0, %v2144_v28  ;;  %v2330_v53 = vrot.slane %v2149_v41, 4  ;;  %v2142_v4 = vrot.slane %v2125_v6, 4  ;;  %v2147_v51 = vsel %vm1022_vm0, 0.0, %v2146_v54 }
 0x3b8   : > { %v2201_v47 = vsel %vm1022_vm0, 0.0, %v2200_v62  ;;  %v2202_v21 = vrot.slane %v2193_v45, 4  ;;  %v2204_v9 = vrot.slane %v2197_v43, 4  ;;  %v2198_v23 = vrot.slane %v2181_v13, 4 }
 0x3b9   : > { %v2373_v50 = vrot.slane %v2201_v47, 4  ;;  %v2368_v32 = vsel %vm1022_vm0, %v2200_v62, %v2181_v13  ;;  %v2143_v14 = vsel %vm1022_vm0, 0.0, %v2142_v4  ;;  %v2314_v2 = vsel %vm1022_vm0, %v2144_v28, %v2125_v6 }
 0x3ba   : > { %v2205_v42 = vsel %vm1022_vm0, 0.0, %v2204_v9  ;;  %v2379_v36 = vsel %vm1022_vm0, %v2204_v9, %v2193_v45  ;;  %v2199_v60 = vsel %vm1022_vm0, 0.0, %v2198_v23  ;;  %v2203_v8 = vsel %vm1022_vm0, 0.0, %v2202_v21 }
 0x3bb   : > { %v2384_v63 = vrot.slane %v2205_v42, 4  ;;  %v2372_v58 = vperm.slane %v2368_v32, %v5447_v30  ;;  %v2374_v10 = vsel %vm1022_vm0, %v2373_v50, %v2199_v60  ;;  %v2383_v31 = vperm.slane %v2379_v36, %v5447_v30 }
 0x3bc   : > { %v2378_v15 = vperm.slane %v2374_v10, %v5447_v30  ;;  %v2318_v24 = vperm.slane %v2314_v2, %v5447_v30  ;;  %v2319_v0 = vrot.slane %v2145_v33, 4  ;;  %v2325_v39 = vsel %vm1022_vm0, %v2148_v22, %v2137_v61 }
 0x3bd   : > { %v2385_v19 = vsel %vm1022_vm0, %v2384_v63, %v2203_v8  ;;  %v2392_v12 = vrot.slane %v2372_v58, 4  ;;  %v2404_v1 = vrot.slane %v2383_v31, 4  ;;  %v2329_v18 = vperm.slane %v2325_v39, %v5447_v30 }
 0x3be   : > { %v2389_v34 = vperm.slane %v2385_v19, %v5447_v30  ;;  %v2390_v57 = vrot.slane %v2378_v15, 4  ;;  %v2320_v25 = vsel %vm1022_vm0, %v2319_v0, %v2143_v14  ;;  %v2331_v37 = vsel %vm1022_vm0, %v2330_v53, %v2147_v51 }
 0x3bf   : > { %v2393_v20 = vsel %vm1022_vm0, %v2378_v15, %v2392_v12  ;;  %v2324_v26 = vperm.slane %v2320_v25, %v5447_v30  ;;  %v2335_v6 = vperm.slane %v2331_v37, %v5447_v30  ;;  %v2338_v61 = vrot.slane %v2318_v24, 4 }
 0x3c0   : > { %v2401_v22 = vperm.slane %v2393_v20, %v5452_v38  ;;  %v2405_v28 = vsel %vm1022_vm0, %v2389_v34, %v2404_v1  ;;  %v2391_v54 = vsel %vm1022_vm0, %v2390_v57, %v2372_v58  ;;  %v2402_v41 = vrot.slane %v2389_v34, 4 }
 0x3c1   : > { %v2413_v13 = vperm.slane %v2405_v28, %v5452_v38  ;;  %v2397_v45 = vperm.slane %v2391_v54, %v5452_v38  ;;  %v2339_v43 = vsel %vm1022_vm0, %v2324_v26, %v2338_v61  ;;  %v2350_v62 = vrot.slane %v2329_v18, 4 }
 0x3c2   : > { %v2403_v33 = vsel %vm1022_vm0, %v2402_v41, %v2383_v31  ;;  %v2347_v53 = vperm.slane %v2339_v43, %v5452_v38  ;;  %v2420_v4 = vrot.slane %v2401_v22, 4  ;;  %v2336_v51 = vrot.slane %v2324_v26, 4 }
 0x3c3   : > { %v2418_v47 = vrot.slane %v2413_v13, 4  ;;  %v2409_v21 = vperm.slane %v2403_v33, %v5452_v38  ;;  %v2351_v9 = vsel %vm1022_vm0, %v2335_v6, %v2350_v62  ;;  %v2348_v23 = vrot.slane %v2335_v6, 4 }
 0x3c4   : > { %v2359_v50 = vperm.slane %v2351_v9, %v5452_v38  ;;  %v2421_v32 = vsel %vm1022_vm0, %v2413_v13, %v2420_v4  ;;  %v2337_v14 = vsel %vm1022_vm0, %v2336_v51, %v2318_v24  ;;  %v2416_v2 = vrot.slane %v2397_v45, 4 }
 0x3c5   : > { %v2419_v42 = vsel %vm1022_vm0, %v2418_v47, %v2401_v22  ;;  %v2414_v36 = vrot.slane %v2409_v21, 4  ;;  %3139 = vmatpush.msra.mxu3 %v2421_v32  ;;  %v2343_v60 = vperm.slane %v2337_v14, %v5452_v38  ;;  %v2349_v8 = vsel %vm1022_vm0, %v2348_v23, %v2329_v18 }
 0x3c6   : > { %3110 = vmatpush.msra.mxu2 %v2419_v42  ;;  %v2364_v63 = vrot.slane %v2359_v50, 4  ;;  %v2355_v58 = vperm.slane %v2349_v8, %v5452_v38  ;;  %v2417_v10 = vsel %vm1022_vm0, %v2409_v21, %v2416_v2  ;;  %v2366_v31 = vrot.slane %v2347_v53, 4 }
 0x3c7   : > { %v2415_v15 = vsel %vm1022_vm0, %v2414_v36, %v2397_v45  ;;  %3081 = vmatpush.msra.mxu1 %v2417_v10  ;;  %v2362_v24 = vrot.slane %v2343_v60, 4 }
 0x3c8   : > { %3052 = vmatpush.msra.mxu0 %v2415_v15  ;;  %v2365_v0 = vsel %vm1022_vm0, %v2364_v63, %v2347_v53  ;;  %v2360_v39 = vrot.slane %v2355_v58, 4  ;;  %v2367_v19 = vsel %vm1022_vm0, %v2359_v50, %v2366_v31  ;;  %v2853_v34 = vpop.xlane.xlu1 %2852 }
 0x3c9   : > { %3111 = vmatpush.msra.mxu2 %v2365_v0  ;;  %3140 = vmatpush.msra.mxu3 %v2367_v19  ;;  %v2363_v12 = vsel %vm1022_vm0, %v2355_v58, %v2362_v24 }
 0x3ca   : > { %v2361_v1 = vsel %vm1022_vm0, %v2360_v39, %v2343_v60  ;;  %3082 = vmatpush.msra.mxu1 %v2363_v12 }
 0x3cb   : > { %3053 = vmatpush.msra.mxu0 %v2361_v1 }
 0x3d0   : > { %v2874_v20 = vpop.xlane.xlu1 %2873 }
 0x3d9   : > { %v2850_v18 = vpop.xlane.xlu0 %2849 }
 0x3da   : > { %4645 = vrcp.f32 %v2850_v18 }
 0x3db   : > { %4647 = vrcp.f32 %v2853_v34 }
 0x3e0   : > { %v4646_v57 = vpop.eup %4645 }
 0x3e1   : > { %v2904_v25 = vmul.f32 %v4646_v57, %v6455_v7  ;;  %v2859_v37 = vpop.xlane.xlu0 %2858  ;;  %v4648_v6 = vpop.eup %4647 }
 0x3e2   : > { %v2905_v22 = vmul.f32 %v4648_v6, %v6445_v5 }
 0x3e3   : > { %4446 = vmatmul.msk.f32.vlgmr.msrb.gmra.mxu2 %vm2739_vm3, %v2904_v25  ;;  %v2856_v26 = vpop.xlane.xlu2 %2855 }
 0x3e4   : > { %4649 = vrcp.f32 %v2856_v26 }
 0x3e5   : > { %4651 = vrcp.f32 %v2874_v20 }
 0x3e6   : > { %4653 = vrcp.f32 %v2859_v37 }
 0x3e8   : > { %v2880_v41 = vpop.xlane.xlu1 %2879 }
 0x3e9   : > { %v2847_v61 = vpop.xlane.xlu0 %2846 }
 0x3ea   : > { %v4650_v28 = vpop.eup %4649 }
 0x3eb   : > { %4447 = vmatmul.msk.f32.gmra.mxu2 %vm2739_vm3, %v2905_v22  ;;  %v2906_v54 = vmul.f32 %v4650_v28, %v6468_v59  ;;  %v2844_v13 = vpop.xlane.xlu2 %2843  ;;  %v4652_v7 = vpop.eup %4651 }
 0x3ec   : > { %4655 = vrcp.f32 %v2844_v13  ;;  %v2912_v45 = vmul.f32 %v4652_v7, %v6449_v55  ;;  %v4654_v62 = vpop.eup %4653 }
 0x3ed   : > { %4448 = vmatmul.msk.f32.vlgmr.msrb.gmra.mxu3 %vm2739_vm3, %v2906_v54  ;;  %v2907_v59 = vmul.f32 %v4654_v62, %v6463_v27 }
 0x3f0   : > { %v2868_v4 = vpop.xlane.xlu1 %2867 }
 0x3f1   : > { %v2877_v43 = vpop.xlane.xlu0 %2876 }
 0x3f2   : > { %4657 = vrcp.f32 %v2877_v43  ;;  %v4656_v5 = vpop.eup %4655 }
 0x3f3   : > { %4454 = vmatmul.msk.f32.vlgmr.msra.gmra.mxu2 %vm2739_vm3, %v2912_v45  ;;  %4659 = vrcp.f32 %v2847_v61  ;;  %v2902_v33 = vmul.f32 %v4656_v5, %v6484_v56  ;;  %v2862_v53 = vpop.xlane.xlu2 %2861 }
 0x3f4   : > { %4661 = vrcp.f32 %v2880_v41 }
 0x3f5   : > { %4663 = vrcp.f32 %v2862_v53  ;;  %4444 = vmatmul.msk.f32.vlgmr.msrb.gmra.mxu1 %vm2739_vm3, %v2902_v33  ;;  %4449 = vmatmul.msk.f32.gmra.mxu3 %vm2739_vm3, %v2907_v59 }
 0x3f6   : > { %4665 = vrcp.f32 %v2868_v4 }
 0x3f8   : > { %v4658_v55 = vpop.eup %4657  ;;  %v2871_v14 = vpop.xlane.xlu1 %2870 }
 0x3f9   : > { %v2865_v51 = vpop.xlane.xlu0 %2864  ;;  %v2913_v47 = vmul.f32 %v4658_v55, %v6487_v49  ;;  %v4660_v21 = vpop.eup %4659 }
 0x3fa   : > { %v4662_v9 = vpop.eup %4661  ;;  %4667 = vrcp.f32 %v2865_v51  ;;  %v2903_v50 = vmul.f32 %v4660_v21, %v6473_v16 }
 0x3fb   : > { %4455 = vmatmul.msk.f32.gmra.mxu2 %vm2739_vm3, %v2913_v47  ;;  %v4664_v23 = vpop.eup %4663  ;;  %v2883_v27 = vpop.xlane.xlu2 %2882  ;;  %v2914_v32 = vmul.f32 %v4662_v9, %v6477_v48 }
 0x3fc   : > { %v2908_v56 = vmul.f32 %v4664_v23, %v6497_v52  ;;  %4669 = vrcp.f32 %v2883_v27  ;;  %v4666_v49 = vpop.eup %4665 }
 0x3fd   : > { %4445 = vmatmul.msk.f32.gmra.mxu1 %vm2739_vm3, %v2903_v50  ;;  %4456 = vmatmul.msk.f32.vlgmr.msra.gmra.mxu3 %vm2739_vm3, %v2914_v32  ;;  %4671 = vrcp.f32 %v2871_v14  ;;  %v2910_v36 = vmul.f32 %v4666_v49, %v6491_v11 }
 0x3fe   : > { %4450 = vmatmul.msk.f32.vlgmr.msra.gmra.mxu0 %vm2739_vm3, %v2908_v56 }
 0x400   : > { %v4668_v2 = vpop.eup %4667 }
 0x401   : > { %v2909_v52 = vmul.f32 %v4668_v2, %v6499_v35 }
 0x402   : > { %v4670_v42 = vpop.eup %4669 }
 0x403   : > { %v2915_v16 = vmul.f32 %v4670_v42, %v6509_v40  ;;  %v4672_v48 = vpop.eup %4671 }
 0x404   : > { %v2911_v60 = vmul.f32 %v4672_v48, %v6503_v44 }
 0x405   : > { %4452 = vmatmul.msk.f32.vlgmr.msra.gmra.mxu1 %vm2739_vm3, %v2910_v36  ;;  %4457 = vmatmul.msk.f32.gmra.mxu3 %vm2739_vm3, %v2915_v16 }
 0x406   : > { %4451 = vmatmul.msk.f32.gmra.mxu0 %vm2739_vm3, %v2909_v52 }
 0x40d   : > { %4453 = vmatmul.msk.f32.gmra.mxu1 %vm2739_vm3, %v2911_v60 }
 0x41e   : > { %v2939_v58 = vpop.f32.mrf.mxu0 }
 0x41f   : > { %v3150_v11 = vrot.slane %v2939_v58, 4 }
 0x42f   : > { %v2942_v8 = vpop.f32.mrf.mxu2 }
 0x430   : > { %v3206_v0 = vrot.slane %v2942_v8, 4 }
 0x466   : > { %v2997_v63 = vpop.f32.mrf.mxu2 }
 0x467   : > { %v3148_v10 = vrot.slane %v2997_v63, 4  ;;  %v3151_v40 = vsel %vm1022_vm0, %v2997_v63, %v3150_v11 }
 0x468   : > { %v3159_v39 = vperm.slane %v3151_v40, %v5447_v30 }
 0x469   : > { %v3149_v35 = vsel %vm1022_vm0, %v3148_v10, %v2939_v58 }
 0x46a   : > { %v3155_v15 = vperm.slane %v3149_v35, %v5447_v30  ;;  %v3186_v20 = vrot.slane %v3159_v39, 4 }
 0x46c   : > { %v3174_v57 = vrot.slane %v3155_v15, 4 }
 0x46e   : > { %v3000_v31 = vpop.f32.mrf.mxu2 }
 0x46f   : > { %v3204_v19 = vrot.slane %v3000_v31, 4  ;;  %v3207_v1 = vsel %vm1022_vm0, %v3000_v31, %v3206_v0 }
 0x470   : > { %v3026_v24 = vpop.f32.mrf.mxu3  ;;  %v3215_v61 = vperm.slane %v3207_v1, %v5447_v30 }
 0x471   : > { %v3160_v44 = vrot.slane %v3026_v24, 4  ;;  %v3205_v26 = vsel %vm1022_vm0, %v3204_v19, %v2942_v8 }
 0x472   : > { %v2968_v12 = vpop.f32.mrf.mxu1  ;;  %v3211_v13 = vperm.slane %v3205_v26, %v5447_v30  ;;  %v3242_v4 = vrot.slane %v3215_v61, 4 }
 0x473   : > { %v3161_v18 = vsel %vm1022_vm0, %v3160_v44, %v2968_v12  ;;  %v3162_v34 = vrot.slane %v2968_v12, 4 }
 0x474   : > { %v3167_v37 = vperm.slane %v3161_v18, %v5447_v30  ;;  %v3230_v27 = vrot.slane %v3211_v13, 4 }
 0x475   : > { %v3163_v6 = vsel %vm1022_vm0, %v3026_v24, %v3162_v34 }
 0x476   : > { %v3113_v25 = vpop.f32.mrf.mxu2  ;;  %v3171_v22 = vperm.slane %v3163_v6, %v5447_v30  ;;  %v3172_v28 = vrot.slane %v3167_v37, 4  ;;  %v3175_v54 = vsel %vm1022_vm0, %v3167_v37, %v3174_v57 }
 0x477   : > { %v3183_v41 = vperm.slane %v3175_v54, %v5452_v38  ;;  %v3260_v14 = vrot.slane %v3113_v25, 4 }
 0x478   : > { %v3173_v7 = vsel %vm1022_vm0, %v3172_v28, %v3155_v15  ;;  %v3184_v45 = vrot.slane %v3171_v22, 4  ;;  %v3187_v43 = vsel %vm1022_vm0, %v3171_v22, %v3186_v20  ;;  %v3029_v62 = vpop.f32.mrf.mxu3 }
 0x479   : > { %v3179_v5 = vperm.slane %v3173_v7, %v5452_v38  ;;  %v3195_v33 = vperm.slane %v3187_v43, %v5452_v38  ;;  %v3198_v53 = vrot.slane %v3183_v41, 4  ;;  %v3216_v59 = vrot.slane %v3029_v62, 4 }
 0x47a   : > { %v3185_v55 = vsel %vm1022_vm0, %v3184_v45, %v3159_v39  ;;  %v2971_v51 = vpop.f32.mrf.mxu1 }
 0x47b   : > { %v3055_v47 = vpop.f32.mrf.mxu0  ;;  %v3191_v21 = vperm.slane %v3185_v55, %v5452_v38  ;;  %v3196_v9 = vrot.slane %v3179_v5, 4  ;;  %v3199_v23 = vsel %vm1022_vm0, 0.0, %v3198_v53  ;;  %v3202_v56 = vrot.slane %v3195_v33, 4 }
 0x47c   : > { %v3372_v50 = vsel %vm1022_vm0, %v3198_v53, %v3179_v5  ;;  %v3217_v32 = vsel %vm1022_vm0, %v3216_v59, %v2971_v51  ;;  %v3218_v49 = vrot.slane %v2971_v51, 4  ;;  %v3377_v36 = vrot.slane %v3199_v23, 4 }
 0x47d   : > { %v3197_v2 = vsel %vm1022_vm0, 0.0, %v3196_v9  ;;  %v3203_v42 = vsel %vm1022_vm0, 0.0, %v3202_v56  ;;  %v3200_v16 = vrot.slane %v3191_v21, 4  ;;  %v6655_v48 = vperm.slane %v3372_v50, %v5447_v30 }
 0x47e   : > { %v3116_v52 = vpop.f32.mrf.mxu2  ;;  %v3219_v60 = vsel %vm1022_vm0, %v3029_v62, %v3218_v49  ;;  %v3223_v8 = vperm.slane %v3217_v32, %v5447_v30  ;;  %v3388_v63 = vrot.slane %v3203_v42, 4  ;;  %v3261_v10 = vsel %vm1022_vm0, %v3260_v14, %v3055_v47 }
 0x47f   : > { %v3227_v58 = vperm.slane %v3219_v60, %v5447_v30  ;;  %v3262_v11 = vrot.slane %v3055_v47, 4  ;;  %v3316_v31 = vrot.slane %v3116_v52, 4  ;;  %v3267_v15 = vperm.slane %v3261_v10, %v5447_v30 }
 0x480   : > { %v3228_v35 = vrot.slane %v3223_v8, 4  ;;  %v3231_v40 = vsel %vm1022_vm0, %v3223_v8, %v3230_v27  ;;  %v3142_v44 = vpop.f32.mrf.mxu3  ;;  %v3201_v57 = vsel %vm1022_vm0, 0.0, %v3200_v16  ;;  %v3378_v41 = vsel %vm1022_vm0, %v3377_v36, %v3197_v2 }
 0x481   : > { %v3239_v24 = vperm.slane %v3231_v40, %v5452_v38  ;;  %v3240_v0 = vrot.slane %v3227_v58, 4  ;;  %v3243_v39 = vsel %vm1022_vm0, %v3227_v58, %v3242_v4  ;;  %v3263_v19 = vsel %vm1022_vm0, %v3113_v25, %v3262_v11 }
 0x482   : > { %v3229_v12 = vsel %vm1022_vm0, %v3228_v35, %v3211_v13  ;;  %v3251_v1 = vperm.slane %v3243_v39, %v5452_v38  ;;  %v3271_v18 = vperm.slane %v3263_v19, %v5447_v30  ;;  %v3272_v6 = vrot.slane %v3142_v44, 4  ;;  %v3084_v54 = vpop.f32.mrf.mxu1 }
 0x483   : > { %v3058_v34 = vpop.f32.mrf.mxu0  ;;  %v3235_v37 = vperm.slane %v3229_v12, %v5452_v38  ;;  %v3241_v20 = vsel %vm1022_vm0, %v3240_v0, %v3215_v61  ;;  %v3254_v26 = vrot.slane %v3239_v24, 4  ;;  %v3286_v45 = vrot.slane %v3267_v15, 4 }
 0x484   : > { %v6673_v22 = vperm.slane %v3241_v20, %v5452_v38  ;;  %v6675_v25 = vrot.slane %v3251_v1, 4  ;;  %v3317_v28 = vsel %vm1022_vm0, %v3316_v31, %v3058_v34  ;;  %v3318_v43 = vrot.slane %v3058_v34, 4 }
 0x485   : > { %v3252_v13 = vrot.slane %v3235_v37, 4  ;;  %v6680_v7 = vsel %vm1022_vm0, 0.0, %v3254_v26  ;;  %v3426_v5 = vsel %vm1022_vm0, %v3254_v26, %v3235_v37  ;;  %v3298_v33 = vrot.slane %v3271_v18, 4 }
 0x486   : > { %v3256_v61 = vrot.slane %v6673_v22, 4  ;;  %v6685_v62 = vsel %vm1022_vm0, 0.0, %v6675_v25  ;;  %v3431_v53 = vrot.slane %v6680_v7, 4  ;;  %v3319_v59 = vsel %vm1022_vm0, %v3116_v52, %v3318_v43 }
 0x487   : > { %v6691_v4 = vperm.slane %v3317_v28, %v5447_v30  ;;  %v3273_v55 = vsel %vm1022_vm0, %v3272_v6, %v3084_v54  ;;  %v3253_v51 = vsel %vm1022_vm0, 0.0, %v3252_v13  ;;  %v3442_v47 = vrot.slane %v6685_v62, 4 }
 0x488   : > { %v3274_v9 = vrot.slane %v3084_v54, 4  ;;  %v3279_v23 = vperm.slane %v3273_v55, %v5447_v30  ;;  %v6698_v27 = vperm.slane %v3378_v41, %v5447_v30  ;;  %v3383_v50 = vsel %vm1022_vm0, %v3202_v56, %v3191_v21  ;;  %v3145_v14 = vpop.f32.mrf.mxu3 }
 0x489   : > { %v3389_v32 = vsel %vm1022_vm0, %v3388_v63, %v3201_v57  ;;  %v3396_v49 = vrot.slane %v6655_v48, 4  ;;  %v6704_v2 = vperm.slane %v3319_v59, %v5447_v30  ;;  %v3342_v16 = vrot.slane %v6691_v4, 4 }
 0x48a   : > { %v3275_v42 = vsel %vm1022_vm0, %v3142_v44, %v3274_v9  ;;  %v3284_v36 = vrot.slane %v3279_v23, 4  ;;  %v3287_v52 = vsel %vm1022_vm0, %v3279_v23, %v3286_v45  ;;  %v6712_v21 = vperm.slane %v3383_v50, %v5447_v30  ;;  %v3087_v19 = vpop.f32.mrf.mxu1 }
 0x48b   : > { %v3283_v60 = vperm.slane %v3275_v42, %v5447_v30  ;;  %v3295_v8 = vperm.slane %v3287_v52, %v5452_v38  ;;  %v6716_v63 = vperm.slane %v3389_v32, %v5447_v30  ;;  %v3397_v58 = vsel %vm1022_vm0, %v6698_v27, %v3396_v49 }
 0x48c   : > { %v3285_v56 = vsel %vm1022_vm0, %v3284_v36, %v3267_v15  ;;  %v3328_v10 = vrot.slane %v3145_v14, 4  ;;  %v3354_v24 = vrot.slane %v6704_v2, 4  ;;  %v3405_v39 = vperm.slane %v3397_v58, %v5452_v38 }
 0x48d   : > { %v3291_v11 = vperm.slane %v3285_v56, %v5452_v38  ;;  %v3296_v31 = vrot.slane %v3283_v60, 4  ;;  %v3299_v35 = vsel %vm1022_vm0, %v3283_v60, %v3298_v33  ;;  %v3310_v40 = vrot.slane %v3295_v8, 4 }
 0x48e   : > { %v3307_v0 = vperm.slane %v3299_v35, %v5452_v38  ;;  %v3408_v15 = vrot.slane %v6712_v21, 4  ;;  %v3394_v34 = vrot.slane %v6698_v27, 4  ;;  %v3406_v20 = vrot.slane %v6716_v63, 4 }
 0x48f   : > { %v3297_v44 = vsel %vm1022_vm0, %v3296_v31, %v3271_v18  ;;  %v3308_v12 = vrot.slane %v3291_v11, 4  ;;  %v6728_v1 = vsel %vm1022_vm0, 0.0, %v3310_v40  ;;  %v6734_v37 = vsel %vm1022_vm0, %v3310_v40, %v3291_v11 }
 0x490   : > { %v6731_v57 = vrot.slane %v3307_v0, 4  ;;  %v3409_v26 = vsel %vm1022_vm0, %v6716_v63, %v3408_v15  ;;  %v6740_v6 = vperm.slane %v3297_v44, %v5452_v38  ;;  %v3424_v28 = vrot.slane %v3405_v39, 4 }
 0x491   : > { %v3417_v18 = vperm.slane %v3409_v26, %v5452_v38  ;;  %v3329_v54 = vsel %vm1022_vm0, %v3328_v10, %v3087_v19  ;;  %v3309_v41 = vsel %vm1022_vm0, 0.0, %v3308_v12  ;;  %v3485_v13 = vrot.slane %v6728_v1, 4 }
 0x492   : > { %v3330_v45 = vrot.slane %v3087_v19, 4  ;;  %v3335_v43 = vperm.slane %v3329_v54, %v5447_v30  ;;  %v6749_v33 = vsel %vm1022_vm0, 0.0, %v6731_v57  ;;  %v3257_v9 = vsel %vm1022_vm0, 0.0, %v3256_v61 }
 0x493   : > { %v3425_v59 = vsel %vm1022_vm0, %v3417_v18, %v3424_v28  ;;  %v3422_v55 = vrot.slane %v3417_v18, 4  ;;  %v3430_v32 = vperm.slane %v3426_v5, %v5447_v30  ;;  %v3432_v52 = vsel %vm1022_vm0, %v3431_v53, %v3253_v51  ;;  %v3665_v18 = vld [vmem:[%s5248_s17 + $0x78] sm:$0xff]  ;;  %v3664_v28 = vld [vmem:[%s5248_s17 + $0x70] sm:$0xff] }
 0x494   : > { %3624 = vrot.lane.b32.xlu1 %v3425_v59, %s4958_s5  ;;  %v3331_v23 = vsel %vm1022_vm0, %v3145_v14, %v3330_v45  ;;  %v3340_v27 = vrot.slane %v3335_v43, 4  ;;  %v3343_v50 = vsel %vm1022_vm0, %v3335_v43, %v3342_v16  ;;  %v3436_v14 = vperm.slane %v3432_v52, %v5447_v30  ;;  %3670 = vmatpush.msrb.mxu0 %v3665_v18  ;;  %v3662_v52 = vld [vmem:[%s5248_s17 + $0x60] sm:$0xff] }
 0x495   : > { %v3423_v49 = vsel %vm1022_vm0, %v3422_v55, %v3405_v39  ;;  %v3339_v42 = vperm.slane %v3331_v23, %v5447_v30  ;;  %v3351_v36 = vperm.slane %v3343_v50, %v5452_v38  ;;  %v3437_v5 = vsel %vm1022_vm0, %v6675_v25, %v6673_v22 }
 0x496   : > { %3608 = vrot.lane.b32.xlu0 %v3423_v49, %s4957_s3  ;;  %v3341_v61 = vsel %vm1022_vm0, %v3340_v27, %v6691_v4  ;;  %v3443_v16 = vsel %vm1022_vm0, %v3442_v47, %v3257_v9  ;;  %v3312_v8 = vrot.slane %v6740_v6, 4  ;;  %v3496_v4 = vrot.slane %v6749_v33, 4  ;;  %v3663_v27 = vld [vmem:[%s5248_s17 + $0x68] sm:$0xff]  ;;  %3671 = vmatpush.msrb.mxu0 %v3664_v28 }
 0x497   : > { %v3347_v60 = vperm.slane %v3341_v61, %v5452_v38  ;;  %v3352_v7 = vrot.slane %v3339_v42, 4  ;;  %v3355_v53 = vsel %vm1022_vm0, %v3339_v42, %v3354_v24  ;;  %v3366_v51 = vrot.slane %v3351_v36, 4 }
 0x498   : > { %v3363_v56 = vperm.slane %v3355_v53, %v5452_v38  ;;  %v3441_v63 = vperm.slane %v3437_v5, %v5447_v30  ;;  %v3447_v47 = vperm.slane %v3443_v16, %v5447_v30  ;;  %v3448_v11 = vrot.slane %v3436_v14, 4  ;;  %3672 = vmatpush.msrb.mxu0 %v3663_v27  ;;  %v3661_v53 = vld [vmem:[%s5248_s17 + $0x58] sm:$0xff] }
 0x499   : > { %v3353_v22 = vsel %vm1022_vm0, %v3352_v7, %v6704_v2  ;;  %v3364_v25 = vrot.slane %v3347_v60, 4  ;;  %v6782_v62 = vsel %vm1022_vm0, 0.0, %v3366_v51  ;;  %v3450_v31 = vrot.slane %v3430_v32, 4 }
 0x49a   : > { %v6786_v58 = vperm.slane %v3353_v22, %v5452_v38  ;;  %v6788_v10 = vrot.slane %v3363_v56, 4  ;;  %v3534_v35 = vsel %vm1022_vm0, %v3366_v51, %v3347_v60  ;;  %v3462_v40 = vrot.slane %v3441_v63, 4  ;;  %3673 = vmatpush.msrb.mxu0 %v3662_v52 }
 0x49b   : > { %v3395_v2 = vsel %vm1022_vm0, %v3394_v34, %v6655_v48  ;;  %v3407_v24 = vsel %vm1022_vm0, %v3406_v20, %v6712_v21  ;;  %v3365_v0 = vsel %vm1022_vm0, 0.0, %v3364_v25  ;;  %v3539_v15 = vrot.slane %v6782_v62, 4 }
 0x49c   : > { %v3368_v39 = vrot.slane %v6786_v58, 4  ;;  %v6799_v19 = vperm.slane %v3395_v2, %v5452_v38  ;;  %v3371_v44 = vsel %vm1022_vm0, 0.0, %v6788_v10  ;;  %v3451_v12 = vsel %vm1022_vm0, %v3436_v14, %v3450_v31  ;;  %3674 = vmatpush.msrb.mxu0 %v3661_v53  ;;  %v3650_v53 = vld [vmem:[%s5248_s17] sm:$0xff] }
 0x49d   : > { %v3463_v1 = vsel %vm1022_vm0, %v3447_v47, %v3462_v40  ;;  %v6806_v48 = vperm.slane %v3407_v24, %v5452_v38  ;;  %v3449_v20 = vsel %vm1022_vm0, %v3448_v11, %v3430_v32  ;;  %v3460_v26 = vrot.slane %v3447_v47, 4  ;;  %v3660_v47 = vld [vmem:[%s5248_s17 + $0x50] sm:$0xff] }
 0x49e   : > { %v6809_v21 = vperm.slane %v3463_v1, %v5452_v38  ;;  %v3420_v34 = vrot.slane %v6799_v19, 4  ;;  %v6816_v54 = vperm.slane %v3449_v20, %v5452_v38  ;;  %v3313_v45 = vsel %vm1022_vm0, 0.0, %v3312_v8  ;;  %3675 = vmatpush.msrb.mxu0 %v3660_v47 }
 0x49f   : > { %v3484_v43 = vperm.slane %v6734_v37, %v5447_v30  ;;  %v3486_v33 = vsel %vm1022_vm0, %v3485_v13, %v3309_v41  ;;  %v6823_v59 = vperm.slane %v3451_v12, %v5452_v38  ;;  %v3461_v9 = vsel %vm1022_vm0, %v3460_v26, %v3441_v63 }
 0x4a0   : > { %v3476_v55 = vrot.slane %v6809_v21, 4  ;;  %v3490_v23 = vperm.slane %v3486_v33, %v5447_v30  ;;  %v6830_v50 = vperm.slane %v3461_v9, %v5452_v38  ;;  %v3474_v32 = vrot.slane %v6816_v54, 4 }
 0x4a1   : > { %v3491_v37 = vsel %vm1022_vm0, %v6731_v57, %v6740_v6  ;;  %v3497_v41 = vsel %vm1022_vm0, %v3496_v4, %v3313_v45  ;;  %v3504_v36 = vrot.slane %v3484_v43, 4  ;;  %v3550_v61 = vrot.slane %v3371_v44, 4 }
 0x4a2   : > { %v3477_v13 = vsel %vm1022_vm0, %v3476_v55, %v6823_v59  ;;  %v3495_v49 = vperm.slane %v3491_v37, %v5447_v30  ;;  %v3501_v42 = vperm.slane %v3497_v41, %v5447_v30  ;;  %v3421_v14 = vsel %vm1022_vm0, %v6806_v48, %v3420_v34 }
 0x4a3   : > { %3610 = vrot.lane.b32.xlu0 %v3477_v13, %s4957_s3  ;;  %v3475_v57 = vsel %vm1022_vm0, %v6830_v50, %v3474_v32  ;;  %v3502_v6 = vrot.slane %v3490_v23, 4  ;;  %v3478_v7 = vrot.slane %v6823_v59, 4  ;;  %v3505_v51 = vsel %vm1022_vm0, %v3490_v23, %v3504_v36 }
 0x4a4   : > { %v4595_v5 = vpack.i.bf16 %v3475_v57, %v3421_v14  ;;  %v3516_v16 = vrot.slane %v3495_v49, 4  ;;  %v3514_v60 = vrot.slane %v3501_v42, 4  ;;  %v3369_v4 = vsel %vm1022_vm0, 0.0, %v3368_v39  ;;  %v3657_v14 = vld [vmem:[%s5248_s17 + $0x38] sm:$0xff]  ;;  %v3656_v57 = vld [vmem:[%s5248_s17 + $0x30] sm:$0xff] }
 0x4a5   : > { %v3503_v8 = vsel %vm1022_vm0, %v3502_v6, %v3484_v43  ;;  %v3538_v56 = vperm.slane %v3534_v35, %v5447_v30  ;;  %v3540_v62 = vsel %vm1022_vm0, %v3539_v15, %v3365_v0  ;;  %v3545_v35 = vsel %vm1022_vm0, %v6788_v10, %v6786_v58  ;;  %v3659_v0 = vld [vmem:[%s5248_s17 + $0x48] sm:$0xff]  ;;  %v3658_v58 = vld [vmem:[%s5248_s17 + $0x40] sm:$0xff] }
 0x4a6   : > { %4596 = vrot.lane.b32.xlu2 %v4595_v5, %s4959_s11  ;;  %v3517_v63 = vsel %vm1022_vm0, %v3501_v42, %v3516_v16  ;;  %v3509_v22 = vperm.slane %v3503_v8, %v5452_v38  ;;  %v3515_v25 = vsel %vm1022_vm0, %v3514_v60, %v3495_v49  ;;  %v3544_v40 = vperm.slane %v3540_v62, %v5447_v30  ;;  %v3655_v6 = vld [vmem:[%s5248_s17 + $0x28] sm:$0xff]  ;;  %v3654_v5 = vld [vmem:[%s5248_s17 + $0x20] sm:$0xff]  ;;  %v3653_v16 = vld [vmem:[%s5248_s17 + $0x18] sm:$0xff] }
 0x4a7   : > { %v3525_v11 = vperm.slane %v3517_v63, %v5452_v38  ;;  %v3521_v31 = vperm.slane %v3515_v25, %v5452_v38  ;;  %v3549_v24 = vperm.slane %v3545_v35, %v5447_v30  ;;  %v3551_v39 = vsel %vm1022_vm0, %v3550_v61, %v3369_v4  ;;  %3676 = vmatpush.msrb.mxu0 %v3659_v0  ;;  %v3652_v60 = vld [vmem:[%s5248_s17 + $0x10] sm:$0xff] }
 0x4a8   : > { %v3528_v2 = vrot.slane %v3509_v22, 4  ;;  %v3558_v44 = vrot.slane %v3538_v56, 4  ;;  %v3513_v15 = vperm.slane %v3505_v51, %v5452_v38  ;;  %v3555_v1 = vperm.slane %v3551_v39, %v5447_v30 }
 0x4a9   : > { %v3530_v12 = vrot.slane %v3525_v11, 4  ;;  %v3556_v34 = vrot.slane %v3544_v40, 4  ;;  %v3526_v20 = vrot.slane %v3521_v31, 4  ;;  %v3570_v18 = vrot.slane %v3549_v24, 4  ;;  %3677 = vmatpush.msrb.mxu0 %v3658_v58 }
 0x4aa   : > { %v3529_v26 = vsel %vm1022_vm0, %v3521_v31, %v3528_v2  ;;  %v3568_v45 = vrot.slane %v3555_v1, 4  ;;  %v3559_v43 = vsel %vm1022_vm0, %v3544_v40, %v3558_v44  ;;  %v3418_v59 = vrot.slane %v6806_v48, 4 }
 0x4ab   : > { %v3531_v10 = vsel %vm1022_vm0, %v3530_v12, %v3513_v15  ;;  %3596 = vrot.lane.b32.xlu1 %v3529_v26, %s4959_s11  ;;  %v3557_v28 = vsel %vm1022_vm0, %v3556_v34, %v3538_v56  ;;  %v3571_v30 = vsel %vm1022_vm0, %v3555_v1, %v3570_v18  ;;  %v3479_v55 = vsel %vm1022_vm0, %v6809_v21, %v3478_v7  ;;  %v3651_v7 = vld [vmem:[%s5248_s17 + $0x8] sm:$0xff]  ;;  %s4181_s17 = sshll.u32 %s7239_s8, 4  ;;  %s4182_s17 = int_to_ptr.hbm [resolvable:$true] %s4181_s17 }
 0x4ac   : > { %3612 = vrot.lane.b32.xlu0 %v3531_v10, %s4957_s3  ;;  %v3563_v33 = vperm.slane %v3557_v28, %v5452_v38  ;;  %v3579_v9 = vperm.slane %v3571_v30, %v5452_v38  ;;  %v3569_v23 = vsel %vm1022_vm0, %v3568_v45, %v3549_v24  ;;  %v3472_v27 = vrot.slane %v6830_v50, 4  ;;  %3678 = vmatpush.msrb.mxu0 %v3657_v14  ;;  %v4689_v45 = vld [vmem:[#allocation13] sm:$0xff] }
 0x4ad   : > { %v3575_v32 = vperm.slane %v3569_v23, %v5452_v38  ;;  %v3419_v41 = vsel %vm1022_vm0, %v3418_v59, %v6799_v19  ;;  %v3527_v48 = vsel %vm1022_vm0, %v3526_v20, %v3509_v22  ;;  %v3567_v21 = vperm.slane %v3559_v43, %v5452_v38  ;;  %v4690_v59 = vld [vmem:[#allocation13 + $0x8] sm:$0xff] }
 0x4ae   : > { %3626 = vrot.lane.b32.xlu2 %v3479_v55, %s4958_s5  ;;  %v3582_v37 = vrot.slane %v3563_v33, 4  ;;  %v3584_v13 = vrot.slane %v3579_v9, 4  ;;  %v3473_v49 = vsel %vm1022_vm0, %v3472_v27, %v6816_v54  ;;  %v3532_v52 = vrot.slane %v3513_v15, 4  ;;  %3679 = vmatpush.msrb.mxu0 %v3656_v57  ;;  %v4691_v27 = vld [vmem:[#allocation13 + $0x10] sm:$0xff] }
 0x4af   : > { %v3580_v50 = vrot.slane %v3575_v32, 4  ;;  %v3586_v54 = vrot.slane %v3567_v21, 4 }
 0x4b0   : > { %v3583_v42 = vsel %vm1022_vm0, %v3575_v32, %v3582_v37  ;;  %v3585_v36 = vsel %vm1022_vm0, %v3584_v13, %v3567_v21  ;;  %v3533_v38 = vsel %vm1022_vm0, %v3525_v11, %v3532_v52  ;;  %3680 = vmatpush.msrb.mxu0 %v3655_v6  ;;  %v829_v13 = vlaneseq }
 0x4b1   : > { %v3581_v19 = vsel %vm1022_vm0, %v3580_v50, %v3563_v33  ;;  %v3587_v61 = vsel %vm1022_vm0, %v3579_v9, %v3586_v54 }
 0x4b2   : > { %3681 = vmatpush.msrb.mxu0 %v3654_v5 }
 0x4b3   : > { %3598 = vrot.lane.b32.xlu1 %v3583_v42, %s4959_s11 }
 0x4b4   : > { %3614 = vrot.lane.b32.xlu0 %v3585_v36, %s4957_s3  ;;  %3682 = vmatpush.msrb.mxu0 %v3653_v16  ;;  %v4963_v36 = vmov 0.0   ;;  %s4965_s3 = smov 128  }
 0x4b6   : > { %3628 = vrot.lane.b32.xlu2 %v3533_v38, %s4958_s5  ;;  %3683 = vmatpush.msrb.mxu0 %v3652_v60 }
 0x4b8   : > { %3684 = vmatpush.msrb.mxu0 %v3651_v7 }
 0x4ba   : > { %3685 = vmatpush.msrb.mxu0 %v3650_v53 }
 0x4be   : > { %3630 = vrot.lane.b32.xlu2 %v3587_v61, %s4958_s5  ;;  %s7230_s5 = scalar_lea.vmem %s7163_s6, %s5266_s9  ;;  %s4179_s9 = sshll.u32 %s4964_s0, 4  ;;  %s4180_s9 = int_to_ptr.vmem [resolvable:$true] %s4179_s9 }
 0x4bf   : > { %v4602_v58 = vld [vmem:[%s7230_s5] ss:$0 sm:$0xff]  ;;  %s4966_s5 = smov 8  }
 0x500   : > { %v4597_v51 = vpop.permute.xlu2 %4596 }
 0x501   : > { %v4598_v8 = vunpack.i.l.bf16 %v4597_v51  ;;  %v4599_v62 = vunpack.i.h.bf16 %v4597_v51 }
 0x503   : > { %v3636_v56 = vsel %vm2422_vm1, %v3419_v41, %v4598_v8  ;;  %v3637_v31 = vsel %vm2422_vm1, %v3473_v49, %v4599_v62  ;;  %v830_v49 = vand.u32 127, %v829_v13  ;;  %v3876_v62 = vld [vmem:[%s5250_s30 + $0x70] sm:$0xff] }
 0x505   : > { %vm831_vm9 = vcmp.lt.s32.totalorder %v830_v49, 32  ;;  %v3865_v49 = vld [vmem:[%s5250_s30 + $0x18] sm:$0xff] }
 0x506   : > { %v3625_v63 = vpop.permute.xlu1 %3624  ;;  %v6927_v52 = vsel %vm831_vm9, 1.0, %v4963_v36 }
 0x508   : > { %v3609_v4 = vpop.permute.xlu0 %3608  ;;  %v3627_v47 = vpop.permute.xlu2 %3626 }
 0x509   : > { %v3641_v22 = vsel %vm3640_vm7, %v3636_v56, %v3609_v4 }
 0x50a   : > { %v3646_v25 = vsel %vm3645_vm8, %v3641_v22, %v3625_v63 }
 0x50b   : > { %3686 = vmatmul.f32.vlgmr.msrb.gmra.mxu0 %v3646_v25  ;;  %v3877_v25 = vld [vmem:[%s5250_s30 + $0x78] sm:$0xff] }
 0x50c   : > { %3914 = vmatpush.msrb.mxu1 %v3877_v25  ;;  %v3862_v25 = vld [vmem:[%s5250_s30] sm:$0xff] }
 0x50e   : > { %3915 = vmatpush.msrb.mxu1 %v3876_v62  ;;  %v3900_v62 = vld [vmem:[%s5250_s30 + $0x130] sm:$0xff] }
 0x510   : > { %v3629_v2 = vpop.permute.xlu2 %3628 }
 0x515   : > { %v3611_v11 = vpop.permute.xlu0 %3610 }
 0x516   : > { %v3642_v40 = vsel %vm3640_vm7, %v3637_v31, %v3611_v11  ;;  %v3874_v11 = vld [vmem:[%s5250_s30 + $0x60] sm:$0xff] }
 0x517   : > { %v3647_v35 = vsel %vm3645_vm8, %v3642_v40, %v3627_v47  ;;  %v3875_v47 = vld [vmem:[%s5250_s30 + $0x68] sm:$0xff] }
 0x518   : > { %3689 = vmatmul.f32.gmra.mxu0 %v3647_v35  ;;  %v3631_v20 = vpop.permute.xlu2 %3630  ;;  %3916 = vmatpush.msrb.mxu1 %v3875_v47 }
 0x51a   : > { %3917 = vmatpush.msrb.mxu1 %v3874_v11 }
 0x51d   : > { %v3597_v24 = vpop.permute.xlu1 %3596 }
 0x51e   : > { %v3613_v39 = vpop.permute.xlu0 %3612  ;;  %v3638_v44 = vsel %vm2422_vm1, %v3527_v48, %v3597_v24  ;;  %v4692_v48 = vld [vmem:[#allocation13 + $0x18] sm:$0xff]  ;;  %v3872_v24 = vld [vmem:[%s5250_s30 + $0x50] sm:$0xff] }
 0x51f   : > { %v3643_v0 = vsel %vm3640_vm7, %v3638_v44, %v3613_v39  ;;  %v3893_v39 = vld [vmem:[%s5250_s30 + $0xf8] sm:$0xff] }
 0x520   : > { %v3648_v15 = vsel %vm3645_vm8, %v3643_v0, %v3629_v2  ;;  %v3873_v2 = vld [vmem:[%s5250_s30 + $0x58] sm:$0xff]  ;;  %v3871_v0 = vld [vmem:[%s5250_s30 + $0x48] sm:$0xff]  ;;  %3943 = vmatpush.msrb.mxu2 %v3893_v39 }
 0x521   : > { %3692 = vmatmul.f32.gmra.mxu0 %v3648_v15  ;;  %3918 = vmatpush.msrb.mxu1 %v3873_v2  ;;  %v3909_v44 = vld [vmem:[%s5250_s30 + $0x178] sm:$0xff]  ;;  %v3892_v15 = vld [vmem:[%s5250_s30 + $0xf0] sm:$0xff] }
 0x522   : > { %3972 = vmatpush.msrb.mxu3 %v3909_v44  ;;  %3944 = vmatpush.msrb.mxu2 %v3892_v15 }
 0x523   : > { %3919 = vmatpush.msrb.mxu1 %v3872_v24  ;;  %v3882_v24 = vld [vmem:[%s5250_s30 + $0xa0] sm:$0xff] }
 0x525   : > { %v3599_v12 = vpop.permute.xlu1 %3598  ;;  %3920 = vmatpush.msrb.mxu1 %v3871_v0  ;;  %v3898_v0 = vld [vmem:[%s5250_s30 + $0x120] sm:$0xff] }
 0x526   : > { %v3615_v1 = vpop.permute.xlu0 %3614  ;;  %v3639_v34 = vsel %vm2422_vm1, %v3581_v19, %v3599_v12  ;;  %v3908_v12 = vld [vmem:[%s5250_s30 + $0x170] sm:$0xff] }
 0x527   : > { %v3644_v26 = vsel %vm3640_vm7, %v3639_v34, %v3615_v1  ;;  %v3870_v1 = vld [vmem:[%s5250_s30 + $0x40] sm:$0xff]  ;;  %3973 = vmatpush.msrb.mxu3 %v3908_v12 }
 0x528   : > { %v3649_v18 = vsel %vm3645_vm8, %v3644_v26, %v3631_v20  ;;  %3921 = vmatpush.msrb.mxu1 %v3870_v1 }
 0x529   : > { %3695 = vmatmul.f32.gmra.mxu0 %v3649_v18  ;;  %v3869_v18 = vld [vmem:[%s5250_s30 + $0x38] sm:$0xff] }
 0x52a   : > { %3922 = vmatpush.msrb.mxu1 %v3869_v18 }
 0x588   : > { %v3687_v10 = vpop.f32.mrf.mxu0 }
 0x589   : > { %v3688_v28 = vadd.f32 %v4602_v58, %v3687_v10 }
 0x58b   : > { %v3699_v43 = vadd.f32 %v4689_v45, %v3688_v28  ;;  %v3907_v45 = vld [vmem:[%s5250_s30 + $0x168] sm:$0xff] }
 0x58c   : > { %3974 = vmatpush.msrb.mxu3 %v3907_v45  ;;  %v3896_v45 = vld [vmem:[%s5250_s30 + $0x110] sm:$0xff] }
 0x58d   : > { %3705 = vadd.xlane.f32.xlu1 %v3699_v43 }
 0x595   : > { %v3690_v30 = vpop.f32.mrf.mxu0 }
 0x596   : > { %v3691_v33 = vadd.f32 %v4602_v58, %v3690_v30  ;;  %v3890_v30 = vld [vmem:[%s5250_s30 + $0xe0] sm:$0xff] }
 0x598   : > { %v3700_v55 = vadd.f32 %v4690_v59, %v3691_v33  ;;  %v3906_v33 = vld [vmem:[%s5250_s30 + $0x160] sm:$0xff]  ;;  %v3867_v59 = vld [vmem:[%s5250_s30 + $0x28] sm:$0xff] }
 0x599   : > { %3975 = vmatpush.msrb.mxu3 %v3906_v33 }
 0x59a   : > { %3707 = vadd.xlane.f32.xlu0 %v3700_v55 }
 0x59e   : > { %v3693_v9 = vpop.f32.mrf.mxu0 }
 0x59f   : > { %v3694_v23 = vadd.f32 %v4602_v58, %v3693_v9 }
 0x5a1   : > { %v3701_v32 = vadd.f32 %v4691_v27, %v3694_v23  ;;  %v3905_v27 = vld [vmem:[%s5250_s30 + $0x158] sm:$0xff] }
 0x5a2   : > { %3976 = vmatpush.msrb.mxu3 %v3905_v27 }
 0x5a3   : > { %3709 = vadd.xlane.f32.xlu2 %v3701_v32 }
 0x5a6   : > { %v3696_v37 = vpop.f32.mrf.mxu0 }
 0x5a7   : > { %v3697_v41 = vadd.f32 %v4602_v58, %v3696_v37  ;;  %v3891_v58 = vld [vmem:[%s5250_s30 + $0xe8] sm:$0xff]  ;;  %v3888_v37 = vld [vmem:[%s5250_s30 + $0xd0] sm:$0xff] }
 0x5a8   : > { %3945 = vmatpush.msrb.mxu2 %v3891_v58 }
 0x5a9   : > { %v3702_v21 = vadd.f32 %v4692_v48, %v3697_v41  ;;  %v3904_v48 = vld [vmem:[%s5250_s30 + $0x150] sm:$0xff] }
 0x5aa   : > { %3946 = vmatpush.msrb.mxu2 %v3890_v30  ;;  %3977 = vmatpush.msrb.mxu3 %v3904_v48  ;;  %v3879_v30 = vld [vmem:[%s5250_s30 + $0x88] sm:$0xff] }
 0x5ab   : > { %3711 = vadd.xlane.f32.xlu1 %v3702_v21 }
 0x600   : > { %v3706_v50 = vpop.xlane.xlu1 %3705 }
 0x601   : > { %v3713_v42 = vmul.f32 0.03125, %v3706_v50  ;;  %v3887_v50 = vld [vmem:[%s5250_s30 + $0xc8] sm:$0xff] }
 0x603   : > { %v3717_v19 = vsub.f32 %v3699_v43, %v3713_v42  ;;  %v3868_v43 = vld [vmem:[%s5250_s30 + $0x30] sm:$0xff]  ;;  %v3903_v42 = vld [vmem:[%s5250_s30 + $0x148] sm:$0xff] }
 0x604   : > { %3923 = vmatpush.msrb.mxu1 %v3868_v43  ;;  %3978 = vmatpush.msrb.mxu3 %v3903_v42  ;;  %v4024_v42 = vld [vmem:[%s5256_s15 + $0x78] sm:$0xff] }
 0x605   : > { %v6930_v38 = vmul.f32 %v6927_v52, %v3717_v19  ;;  %4029 = vmatpush.msra.mxu0 %v4024_v42  ;;  %v4009_v42 = vld [vmem:[%s5256_s15] sm:$0xff] }
 0x606   : > { %3924 = vmatpush.msrb.mxu1 %v3867_v59 }
 0x607   : > { %v3725_v54 = vmul.f32 %v6930_v38, %v6930_v38 }
 0x609   : > { %3729 = vadd.xlane.f32.xlu0 %v3725_v54  ;;  %v3864_v54 = vld [vmem:[%s5250_s30 + $0x10] sm:$0xff] }
 0x60d   : > { %v3708_v61 = vpop.xlane.xlu0 %3707 }
 0x60e   : > { %v3714_v14 = vmul.f32 0.03125, %v3708_v61  ;;  %v3886_v61 = vld [vmem:[%s5250_s30 + $0xc0] sm:$0xff] }
 0x610   : > { %v3718_v57 = vsub.f32 %v3700_v55, %v3714_v14  ;;  %v3889_v55 = vld [vmem:[%s5250_s30 + $0xd8] sm:$0xff]  ;;  %v3902_v14 = vld [vmem:[%s5250_s30 + $0x140] sm:$0xff] }
 0x611   : > { %3947 = vmatpush.msrb.mxu2 %v3889_v55  ;;  %3979 = vmatpush.msrb.mxu3 %v3902_v14  ;;  %v3895_v55 = vld [vmem:[%s5250_s30 + $0x108] sm:$0xff] }
 0x612   : > { %v6935_v6 = vmul.f32 %v6927_v52, %v3718_v57  ;;  %v6994_v57 = vld [vmem:[%s771_s29] ss:$0 sm:$0xff] }
 0x613   : > { %3948 = vmatpush.msrb.mxu2 %v3888_v37 }
 0x614   : > { %v3726_v5 = vmul.f32 %v6935_v6, %v6935_v6 }
 0x615   : > { %3949 = vmatpush.msrb.mxu2 %v3887_v50 }
 0x616   : > { %v3710_v16 = vpop.xlane.xlu2 %3709  ;;  %3731 = vadd.xlane.f32.xlu2 %v3726_v5 }
 0x617   : > { %v3715_v60 = vmul.f32 0.03125, %v3710_v16  ;;  %3950 = vmatpush.msrb.mxu2 %v3886_v61 }
 0x619   : > { %v3719_v7 = vsub.f32 %v3701_v32, %v3715_v60  ;;  %v3866_v32 = vld [vmem:[%s5250_s30 + $0x20] sm:$0xff]  ;;  %v3863_v60 = vld [vmem:[%s5250_s30 + $0x8] sm:$0xff] }
 0x61a   : > { %3925 = vmatpush.msrb.mxu1 %v3866_v32  ;;  %v3894_v32 = vld [vmem:[%s5250_s30 + $0x100] sm:$0xff] }
 0x61b   : > { %v6940_v53 = vmul.f32 %v6927_v52, %v3719_v7  ;;  %v3885_v7 = vld [vmem:[%s5250_s30 + $0xb8] sm:$0xff] }
 0x61c   : > { %3926 = vmatpush.msrb.mxu1 %v3865_v49  ;;  %3951 = vmatpush.msrb.mxu2 %v3885_v7 }
 0x61d   : > { %v3727_v51 = vmul.f32 %v6940_v53, %v6940_v53 }
 0x61e   : > { %v3712_v8 = vpop.xlane.xlu1 %3711  ;;  %3927 = vmatpush.msrb.mxu1 %v3864_v54 }
 0x61f   : > { %v3716_v4 = vmul.f32 0.03125, %v3712_v8  ;;  %3733 = vadd.xlane.f32.xlu1 %v3727_v51  ;;  %v3901_v8 = vld [vmem:[%s5250_s30 + $0x138] sm:$0xff] }
 0x620   : > { %3928 = vmatpush.msrb.mxu1 %v3863_v60  ;;  %3980 = vmatpush.msrb.mxu3 %v3901_v8 }
 0x621   : > { %v3720_v56 = vsub.f32 %v3702_v21, %v3716_v4  ;;  %v6981_v21 = vld [vmem:[%s768_s27] ss:$0 sm:$0xff] }
 0x622   : > { %3929 = vmatpush.msrb.mxu1 %v3862_v25  ;;  %3981 = vmatpush.msrb.mxu3 %v3900_v62 }
 0x623   : > { %v6945_v63 = vmul.f32 %v6927_v52, %v3720_v56 }
 0x625   : > { %v3728_v22 = vmul.f32 %v6945_v63, %v6945_v63 }
 0x627   : > { %3735 = vadd.xlane.f32.xlu0 %v3728_v22 }
 0x67c   : > { %v3730_v31 = vpop.xlane.xlu0 %3729 }
 0x67d   : > { %v3737_v40 = vmul.f32 0.03125, %v3730_v31  ;;  %v3883_v31 = vld [vmem:[%s5250_s30 + $0xa8] sm:$0xff] }
 0x67f   : > { %v3741_v35 = vadd.f32 1e-05, %v3737_v40  ;;  %v3899_v40 = vld [vmem:[%s5250_s30 + $0x128] sm:$0xff] }
 0x680   : > { %3982 = vmatpush.msrb.mxu3 %v3899_v40 }
 0x681   : > { %4673 = vrsqrt.f32 %v3741_v35  ;;  %vm3751_vm11 = vweird.f32 %v3741_v35 }
 0x682   : > { %3983 = vmatpush.msrb.mxu3 %v3898_v0 }
 0x687   : > { %v4674_v34 = vpop.eup %4673 }
 0x688   : > { %v3746_v20 = vmul.f32 %v4674_v34, %v3741_v35  ;;  %vm3752_vm10 = vweird.f32 %v4674_v34 }
 0x689   : > { %v3732_v26 = vpop.xlane.xlu2 %3731  ;;  %vm3753_vm12 = vmor %vm3751_vm11, %vm3752_vm10 }
 0x68a   : > { %v3747_v10 = vmul.f32 %v4674_v34, %v3746_v20  ;;  %v3738_v28 = vmul.f32 0.03125, %v3732_v26  ;;  %v3897_v20 = vld [vmem:[%s5250_s30 + $0x118] sm:$0xff] }
 0x68b   : > { %3984 = vmatpush.msrb.mxu3 %v3897_v20 }
 0x68c   : > { %v3748_v9 = vmul.f32 0.5, %v3747_v10  ;;  %v6969_v23 = vadd.f32 1e-05, %v3738_v28  ;;  %v3880_v10 = vld [vmem:[%s5250_s30 + $0x90] sm:$0xff] }
 0x68d   : > { %3985 = vmatpush.msrb.mxu3 %v3896_v45 }
 0x68e   : > { %v3749_v41 = vsub.f32 1.5, %v3748_v9  ;;  %4675 = vrsqrt.f32 %v6969_v23  ;;  %vm3761_vm0 = vweird.f32 %v6969_v23  ;;  %v3878_v9 = vld [vmem:[%s5250_s30 + $0x80] sm:$0xff] }
 0x68f   : > { %3986 = vmatpush.msrb.mxu3 %v3895_v55  ;;  %v4020_v55 = vld [vmem:[%s5256_s15 + $0x58] sm:$0xff] }
 0x690   : > { %v3750_v13 = vmul.f32 %v4674_v34, %v3749_v41 }
 0x691   : > { %3987 = vmatpush.msrb.mxu3 %v3894_v32  ;;  %v4016_v32 = vld [vmem:[%s5256_s15 + $0x38] sm:$0xff] }
 0x692   : > { %v3754_v36 = vsel %vm3753_vm12, %v4674_v34, %v3750_v13  ;;  %v3734_v19 = vpop.xlane.xlu1 %3733  ;;  %v3881_v34 = vld [vmem:[%s5250_s30 + $0x98] sm:$0xff] }
 0x693   : > { %v3785_v5 = vmul.f32 %v3754_v36, %v6930_v38  ;;  %v3739_v16 = vmul.f32 0.03125, %v3734_v19  ;;  %v3884_v38 = vld [vmem:[%s5250_s30 + $0xb0] sm:$0xff] }
 0x694   : > { %v4676_v51 = vpop.eup %4675  ;;  %3952 = vmatpush.msrb.mxu2 %v3884_v38  ;;  %v4023_v36 = vld [vmem:[%s5256_s15 + $0x70] sm:$0xff] }
 0x695   : > { %v3792_v4 = vmul.f32 %v6981_v21, %v3785_v5  ;;  %v3756_v56 = vmul.f32 %v4676_v51, %v6969_v23  ;;  %v7002_v22 = vadd.f32 1e-05, %v3739_v16  ;;  %vm3762_vm15 = vweird.f32 %v4676_v51  ;;  %4030 = vmatpush.msra.mxu0 %v4023_v36 }
 0x696   : > { %3953 = vmatpush.msrb.mxu2 %v3883_v31  ;;  %vm3763_vm1 = vmor %vm3761_vm0, %vm3762_vm15 }
 0x697   : > { %v7008_v47 = vadd.f32 %v6994_v57, %v3792_v4  ;;  %v3757_v11 = vmul.f32 %v4676_v51, %v3756_v56  ;;  %4677 = vrsqrt.f32 %v7002_v22  ;;  %vm3771_vm3 = vweird.f32 %v7002_v22 }
 0x698   : > { %3954 = vmatpush.msrb.mxu2 %v3882_v24 }
 0x699   : > { %v3758_v35 = vmul.f32 0.5, %v3757_v11  ;;  %v3803_v2 = vmul.f32 %v7008_v47, %v6114_v3 }
 0x69a   : > { %v3736_v39 = vpop.xlane.xlu0 %3735  ;;  %3955 = vmatpush.msrb.mxu2 %v3881_v34 }
 0x69b   : > { %v3759_v15 = vsub.f32 1.5, %v3758_v35  ;;  %v3740_v12 = vmul.f32 0.03125, %v3736_v39  ;;  %v3812_v1 = vrot.slane %v3803_v2, 7 }
 0x69c   : > { %3956 = vmatpush.msrb.mxu2 %v3880_v10 }
 0x69d   : > { %v4678_v26 = vpop.eup %4677  ;;  %v3760_v18 = vmul.f32 %v4676_v51, %v3759_v15  ;;  %v7025_v58 = vadd.f32 1e-05, %v3740_v12  ;;  %4459 = vmatmul.msk.f32.vlgmr.msrb.gmra.mxu1 %vm7017_vm14, %v3812_v1  ;;  %v3824_v50 = vsel %vm3811_vm13, 0.0, %v3812_v1 }
 0x69e   : > { %v3766_v28 = vmul.f32 %v4678_v26, %v7002_v22  ;;  %3957 = vmatpush.msrb.mxu2 %v3879_v30  ;;  %vm3772_vm2 = vweird.f32 %v4678_v26  ;;  %v3833_v60 = vrot.slane %v3824_v50, 1  ;;  %v3848_v8 = vrot.slane %v3824_v50, 2  ;;  %v4010_v50 = vld [vmem:[%s5256_s15 + $0x8] sm:$0xff] }
 0x69f   : > { %v3764_v43 = vsel %vm3763_vm1, %v4676_v51, %v3760_v18  ;;  %4679 = vrsqrt.f32 %v7025_v58  ;;  %vm3773_vm4 = vmor %vm3771_vm3, %vm3772_vm2  ;;  %vm3781_vm8 = vweird.f32 %v7025_v58 }
 0x6a0   : > { %v3786_v33 = vmul.f32 %v3764_v43, %v6935_v6  ;;  %v3767_v59 = vmul.f32 %v4678_v26, %v3766_v28  ;;  %3958 = vmatpush.msrb.mxu2 %v3878_v9  ;;  %v4019_v9 = vld [vmem:[%s5256_s15 + $0x50] sm:$0xff] }
 0x6a2   : > { %v3768_v23 = vmul.f32 0.5, %v3767_v59  ;;  %v3793_v27 = vmul.f32 %v6981_v21, %v3786_v33  ;;  %v4022_v33 = vld [vmem:[%s5256_s15 + $0x68] sm:$0xff]  ;;  %v4021_v59 = vld [vmem:[%s5256_s15 + $0x60] sm:$0xff] }
 0x6a3   : > { %4031 = vmatpush.msra.mxu0 %v4022_v33 }
 0x6a4   : > { %v3769_v37 = vsub.f32 1.5, %v3768_v23  ;;  %v7040_v41 = vadd.f32 %v6994_v57, %v3793_v27  ;;  %v4018_v23 = vld [vmem:[%s5256_s15 + $0x48] sm:$0xff]  ;;  %v4017_v27 = vld [vmem:[%s5256_s15 + $0x40] sm:$0xff] }
 0x6a5   : > { %v4680_v6 = vpop.eup %4679  ;;  %4032 = vmatpush.msra.mxu0 %v4021_v59 }
 0x6a6   : > { %v3770_v48 = vmul.f32 %v4678_v26, %v3769_v37  ;;  %v3776_v13 = vmul.f32 %v4680_v6, %v7025_v58  ;;  %v3804_v49 = vmul.f32 %v7040_v41, %v6163_v46  ;;  %vm3782_vm7 = vweird.f32 %v4680_v6  ;;  %v4015_v37 = vld [vmem:[%s5256_s15 + $0x30] sm:$0xff] }
 0x6a7   : > { %vm3783_vm9 = vmor %vm3781_vm8, %vm3782_vm7  ;;  %4033 = vmatpush.msra.mxu0 %v4020_v55 }
 0x6a8   : > { %v3774_v19 = vsel %vm3773_vm4, %v4678_v26, %v3770_v48  ;;  %v3777_v54 = vmul.f32 %v4680_v6, %v3776_v13  ;;  %v3813_v61 = vrot.slane %v3804_v49, 7  ;;  %v4013_v48 = vld [vmem:[%s5256_s15 + $0x20] sm:$0xff]  ;;  %v4012_v13 = vld [vmem:[%s5256_s15 + $0x18] sm:$0xff]  ;;  %v4011_v49 = vld [vmem:[%s5256_s15 + $0x10] sm:$0xff] }
 0x6a9   : > { %v3787_v14 = vmul.f32 %v3774_v19, %v6940_v53  ;;  %4034 = vmatpush.msra.mxu0 %v4019_v9  ;;  %v4605_v19 = vld [vmem:[%s774_s13] ss:$0 sm:$0xff] }
 0x6aa   : > { %v3778_v5 = vmul.f32 0.5, %v3777_v54  ;;  %v3814_v16 = vsel %vm3811_vm13, %v3812_v1, %v3813_v61  ;;  %v3826_v62 = vsel %vm3811_vm13, %v3813_v61, 0.0 }
 0x6ab   : > { %v3834_v7 = vrot.slane %v3814_v16, 1  ;;  %v3849_v51 = vrot.slane %v3814_v16, 2  ;;  %3933 = vmatmul.f32.gmra.mxu1 %v3814_v16  ;;  %v3794_v4 = vmul.f32 %v6981_v21, %v3787_v14  ;;  %v3836_v2 = vrot.slane %v3826_v62, 1  ;;  %4035 = vmatpush.msra.mxu0 %v4018_v23 }
 0x6ac   : > { %v3779_v56 = vsub.f32 1.5, %v3778_v5  ;;  %v3851_v24 = vrot.slane %v3826_v62, 2 }
 0x6ad   : > { %v3835_v22 = vsel %vm3832_vm5, %v3833_v60, %v3834_v7  ;;  %v3850_v25 = vsel %vm3847_vm6, %v3848_v8, %v3849_v51  ;;  %v7055_v53 = vadd.f32 %v6994_v57, %v3794_v4  ;;  %v3837_v0 = vsel %vm3832_vm5, %v3834_v7, %v3836_v2  ;;  %4036 = vmatpush.msra.mxu0 %v4017_v27 }
 0x6ae   : > { %v3780_v38 = vmul.f32 %v4680_v6, %v3779_v56  ;;  %3959 = vmatmul.f32.vlgmr.msrb.gmra.mxu2 %v3835_v22  ;;  %3988 = vmatmul.f32.vlgmr.msrb.gmra.mxu3 %v3850_v25  ;;  %v3852_v15 = vsel %vm3847_vm6, %v3849_v51, %v3851_v24 }
 0x6af   : > { %v3805_v11 = vmul.f32 %v7055_v53, %v6194_v29  ;;  %4037 = vmatpush.msra.mxu0 %v4016_v32 }
 0x6b0   : > { %v3784_v31 = vsel %vm3783_vm9, %v4680_v6, %v3780_v38  ;;  %v4014_v6 = vld [vmem:[%s5256_s15 + $0x28] sm:$0xff] }
 0x6b1   : > { %v3788_v40 = vmul.f32 %v3784_v31, %v6945_v63  ;;  %v3815_v35 = vrot.slane %v3805_v11, 7  ;;  %4038 = vmatpush.msra.mxu0 %v4015_v37 }
 0x6b3   : > { %4461 = vmatmul.msk.f32.gmra.mxu1 %vm7017_vm14, %v3815_v35  ;;  %v3795_v39 = vmul.f32 %v6981_v21, %v3788_v40  ;;  %v3825_v34 = vsel %vm3811_vm13, 0.0, %v3815_v35  ;;  %4039 = vmatpush.msra.mxu0 %v4014_v6 }
 0x6b4   : > { %v3838_v26 = vrot.slane %v3825_v34, 1  ;;  %v3853_v18 = vrot.slane %v3825_v34, 2 }
 0x6b5   : > { %v7068_v12 = vadd.f32 %v6994_v57, %v3795_v39  ;;  %4040 = vmatpush.msra.mxu0 %v4013_v48 }
 0x6b6   : > { %3962 = vmatmul.f32.gmra.mxu2 %v3837_v0  ;;  %3991 = vmatmul.f32.gmra.mxu3 %v3852_v15 }
 0x6b7   : > { %v3806_v63 = vmul.f32 %v7068_v12, %v6170_v17  ;;  %4041 = vmatpush.msra.mxu0 %v4012_v13 }
 0x6b9   : > { %v3816_v1 = vrot.slane %v3806_v63, 7  ;;  %4042 = vmatpush.msra.mxu0 %v4011_v49 }
 0x6bb   : > { %v3817_v44 = vsel %vm3811_vm13, %v3815_v35, %v3816_v1  ;;  %v3827_v10 = vsel %vm3811_vm13, %v3816_v1, 0.0  ;;  %4043 = vmatpush.msra.mxu0 %v4010_v50 }
 0x6bc   : > { %v3839_v20 = vrot.slane %v3817_v44, 1  ;;  %v3854_v21 = vrot.slane %v3817_v44, 2  ;;  %3939 = vmatmul.f32.gmra.mxu1 %v3817_v44  ;;  %v3841_v28 = vrot.slane %v3827_v10, 1  ;;  %v3856_v45 = vrot.slane %v3827_v10, 2 }
 0x6bd   : > { %4044 = vmatpush.msra.mxu0 %v4009_v42 }
 0x6be   : > { %v3840_v57 = vsel %vm3832_vm5, %v3838_v26, %v3839_v20  ;;  %v3855_v58 = vsel %vm3847_vm6, %v3853_v18, %v3854_v21  ;;  %v3842_v43 = vsel %vm3832_vm5, %v3839_v20, %v3841_v28  ;;  %v3857_v30 = vsel %vm3847_vm6, %v3854_v21, %v3856_v45  ;;  %v4606_v18 = vld [vmem:[%s777_s26] ss:$0 sm:$0xff] }
 0x6bf   : > { %3965 = vmatmul.f32.gmra.mxu2 %v3840_v57  ;;  %3994 = vmatmul.f32.gmra.mxu3 %v3855_v58 }
 0x6c7   : > { %3968 = vmatmul.f32.gmra.mxu2 %v3842_v43  ;;  %3997 = vmatmul.f32.gmra.mxu3 %v3857_v30 }
 0x71a   : > { %v3931_v36 = vpop.f32.mrf.mxu1 }
 0x71b   : > { %v3932_v54 = vadd.f32 %v4605_v19, %v3931_v36 }
 0x728   : > { %v3934_v5 = vpop.f32.mrf.mxu1 }
 0x729   : > { %v3935_v51 = vadd.f32 %v4605_v19, %v3934_v5 }
 0x730   : > { %v3937_v25 = vpop.f32.mrf.mxu1 }
 0x731   : > { %v3960_v61 = vpop.f32.mrf.mxu2  ;;  %v3989_v14 = vpop.f32.mrf.mxu3  ;;  %v3938_v31 = vadd.f32 %v4605_v19, %v3937_v25 }
 0x732   : > { %v3961_v16 = vadd.f32 %v3960_v61, %v3932_v54 }
 0x734   : > { %v3990_v60 = vadd.f32 %v3989_v14, %v3961_v16 }
 0x736   : > { %v4001_v7 = vmax.f32 %v3990_v60, 0.0 }
 0x738   : > { %v4005_v8 = vmul.f32 %v4001_v7, %v6114_v3 }
 0x739   : > { %v3963_v4 = vpop.f32.mrf.mxu2  ;;  %v3992_v22 = vpop.f32.mrf.mxu3 }
 0x73a   : > { %v3964_v56 = vadd.f32 %v3963_v4, %v3935_v51  ;;  %4045 = vmatmul.f32.vlgmr.msra.gmra.mxu0 %v4005_v8  ;;  %v3940_v39 = vpop.f32.mrf.mxu1 }
 0x73b   : > { %v3941_v15 = vadd.f32 %v4605_v19, %v3940_v39 }
 0x73c   : > { %v3993_v38 = vadd.f32 %v3992_v22, %v3964_v56 }
 0x73e   : > { %v4002_v62 = vmax.f32 %v3993_v38, 0.0 }
 0x740   : > { %v4006_v11 = vmul.f32 %v4002_v62, %v6163_v46 }
 0x742   : > { %v3966_v40 = vpop.f32.mrf.mxu2  ;;  %v3995_v35 = vpop.f32.mrf.mxu3  ;;  %4048 = vmatmul.f32.gmra.mxu0 %v4006_v11 }
 0x743   : > { %v3967_v2 = vadd.f32 %v3966_v40, %v3938_v31 }
 0x745   : > { %v3996_v24 = vadd.f32 %v3995_v35, %v3967_v2 }
 0x747   : > { %v4003_v0 = vmax.f32 %v3996_v24, 0.0 }
 0x749   : > { %v4007_v63 = vmul.f32 %v4003_v0, %v6194_v29 }
 0x74a   : > { %v3969_v1 = vpop.f32.mrf.mxu2  ;;  %v3998_v44 = vpop.f32.mrf.mxu3 }
 0x74b   : > { %v3970_v34 = vadd.f32 %v3969_v1, %v3941_v15  ;;  %4051 = vmatmul.f32.gmra.mxu0 %v4007_v63  ;;  %v4607_v1 = vld [vmem:[%s780_s24] ss:$0 sm:$0xff] }
 0x74d   : > { %v3999_v20 = vadd.f32 %v3998_v44, %v3970_v34 }
 0x74f   : > { %v4004_v21 = vmax.f32 %v3999_v20, 0.0  ;;  %v4608_v20 = vld [vmem:[%s7238_s12] ss:$0 sm:$0xff] }
 0x751   : > { %v4008_v26 = vmul.f32 %v4004_v21, %v6170_v17 }
 0x753   : > { %4054 = vmatmul.f32.gmra.mxu0 %v4008_v26 }
 0x7b7   : > { %v4046_v57 = vpop.f32.mrf.mxu0 }
 0x7b8   : > { %v4047_v58 = vadd.f32 %v4606_v18, %v4046_v57 }
 0x7ba   : > { %v4058_v10 = vmul.f32 %v4047_v58, %v6114_v3 }
 0x7bc   : > { %v4062_v28 = vadd.f32 %v4058_v10, %v7008_v47 }
 0x7be   : > { %4068 = vadd.xlane.f32.xlu2 %v4062_v28 }
 0x7bf   : > { %v4049_v45 = vpop.f32.mrf.mxu0 }
 0x7c0   : > { %v4050_v43 = vadd.f32 %v4606_v18, %v4049_v45 }
 0x7c2   : > { %v4059_v30 = vmul.f32 %v4050_v43, %v6163_v46 }
 0x7c4   : > { %v4063_v33 = vadd.f32 %v4059_v30, %v7040_v41 }
 0x7c6   : > { %4070 = vadd.xlane.f32.xlu1 %v4063_v33 }
 0x7c8   : > { %v4052_v59 = vpop.f32.mrf.mxu0 }
 0x7c9   : > { %v4053_v55 = vadd.f32 %v4606_v18, %v4052_v59 }
 0x7cb   : > { %v4060_v9 = vmul.f32 %v4053_v55, %v6194_v29 }
 0x7cd   : > { %v4064_v23 = vadd.f32 %v4060_v9, %v7055_v53 }
 0x7cf   : > { %4072 = vadd.xlane.f32.xlu0 %v4064_v23 }
 0x7d0   : > { %v4055_v27 = vpop.f32.mrf.mxu0 }
 0x7d1   : > { %v4056_v32 = vadd.f32 %v4606_v18, %v4055_v27 }
 0x7d3   : > { %v4061_v37 = vmul.f32 %v4056_v32, %v6170_v17 }
 0x7d5   : > { %v4065_v47 = vadd.f32 %v4061_v37, %v7068_v12 }
 0x7d7   : > { %4074 = vadd.xlane.f32.xlu2 %v4065_v47 }
 0x831   : > { %v4069_v6 = vpop.xlane.xlu2 %4068 }
 0x832   : > { %v4076_v48 = vmul.f32 0.03125, %v4069_v6 }
 0x834   : > { %v4080_v13 = vsub.f32 %v4062_v28, %v4076_v48 }
 0x836   : > { %v4084_v41 = vmul.f32 %v6927_v52, %v4080_v13 }
 0x838   : > { %v4088_v49 = vmul.f32 %v4084_v41, %v4084_v41 }
 0x839   : > { %v4071_v50 = vpop.xlane.xlu1 %4070 }
 0x83a   : > { %v4077_v42 = vmul.f32 0.03125, %v4071_v50  ;;  %4092 = vadd.xlane.f32.xlu1 %v4088_v49 }
 0x83c   : > { %v4081_v36 = vsub.f32 %v4063_v33, %v4077_v42 }
 0x83e   : > { %v4085_v53 = vmul.f32 %v6927_v52, %v4081_v36 }
 0x840   : > { %v4089_v19 = vmul.f32 %v4085_v53, %v4085_v53 }
 0x842   : > { %v4073_v54 = vpop.xlane.xlu0 %4072  ;;  %4094 = vadd.xlane.f32.xlu0 %v4089_v19 }
 0x843   : > { %v4078_v61 = vmul.f32 0.03125, %v4073_v54 }
 0x845   : > { %v4082_v14 = vsub.f32 %v4064_v23, %v4078_v61 }
 0x847   : > { %v7118_v12 = vmul.f32 %v6927_v52, %v4082_v14 }
 0x849   : > { %v4090_v5 = vmul.f32 %v7118_v12, %v7118_v12 }
 0x84a   : > { %v4075_v16 = vpop.xlane.xlu2 %4074 }
 0x84b   : > { %v4079_v60 = vmul.f32 0.03125, %v4075_v16  ;;  %4096 = vadd.xlane.f32.xlu2 %v4090_v5 }
 0x84d   : > { %v4083_v7 = vsub.f32 %v4065_v47, %v4079_v60 }
 0x84f   : > { %v7123_v51 = vmul.f32 %v6927_v52, %v4083_v7 }
 0x851   : > { %v4091_v8 = vmul.f32 %v7123_v51, %v7123_v51 }
 0x853   : > { %4098 = vadd.xlane.f32.xlu1 %v4091_v8 }
 0x8ad   : > { %v4093_v4 = vpop.xlane.xlu1 %4092 }
 0x8ae   : > { %v4100_v56 = vmul.f32 0.03125, %v4093_v4 }
 0x8b0   : > { %v4104_v22 = vadd.f32 1e-05, %v4100_v56 }
 0x8b2   : > { %4681 = vrsqrt.f32 %v4104_v22  ;;  %vm4114_vm11 = vweird.f32 %v4104_v22 }
 0x8b5   : > { %v4095_v25 = vpop.xlane.xlu0 %4094 }
 0x8b6   : > { %v4101_v38 = vmul.f32 0.03125, %v4095_v25 }
 0x8b8   : > { %v4682_v62 = vpop.eup %4681  ;;  %v4105_v11 = vadd.f32 1e-05, %v4101_v38 }
 0x8b9   : > { %v4109_v31 = vmul.f32 %v4682_v62, %v4104_v22  ;;  %vm4115_vm10 = vweird.f32 %v4682_v62 }
 0x8ba   : > { %4683 = vrsqrt.f32 %v4105_v11  ;;  %vm4116_vm12 = vmor %vm4114_vm11, %vm4115_vm10  ;;  %vm4124_vm14 = vweird.f32 %v4105_v11 }
 0x8bb   : > { %v4110_v40 = vmul.f32 %v4682_v62, %v4109_v31 }
 0x8bd   : > { %v4111_v35 = vmul.f32 0.5, %v4110_v40 }
 0x8be   : > { %v4097_v52 = vpop.xlane.xlu2 %4096 }
 0x8bf   : > { %v4112_v2 = vsub.f32 1.5, %v4111_v35  ;;  %v4102_v24 = vmul.f32 0.03125, %v4097_v52 }
 0x8c0   : > { %v4684_v39 = vpop.eup %4683 }
 0x8c1   : > { %v4113_v0 = vmul.f32 %v4682_v62, %v4112_v2  ;;  %v4119_v15 = vmul.f32 %v4684_v39, %v4105_v11  ;;  %v4106_v63 = vadd.f32 1e-05, %v4102_v24  ;;  %vm4125_vm13 = vweird.f32 %v4684_v39 }
 0x8c2   : > { %vm4126_vm15 = vmor %vm4124_vm14, %vm4125_vm13 }
 0x8c3   : > { %v4117_v34 = vsel %vm4116_vm12, %v4682_v62, %v4113_v0  ;;  %v4120_v44 = vmul.f32 %v4684_v39, %v4119_v15  ;;  %4685 = vrsqrt.f32 %v4106_v63  ;;  %vm4134_vm1 = vweird.f32 %v4106_v63 }
 0x8c4   : > { %v4148_v21 = vmul.f32 %v4117_v34, %v4084_v41 }
 0x8c5   : > { %v4121_v26 = vmul.f32 0.5, %v4120_v44 }
 0x8c6   : > { %v4155_v18 = vmul.f32 %v4607_v1, %v4148_v21  ;;  %v4099_v57 = vpop.xlane.xlu1 %4098 }
 0x8c7   : > { %v4122_v58 = vsub.f32 1.5, %v4121_v26  ;;  %v4103_v10 = vmul.f32 0.03125, %v4099_v57 }
 0x8c8   : > { %v4162_v28 = vadd.f32 %v4608_v20, %v4155_v18 }
 0x8c9   : > { %v4686_v45 = vpop.eup %4685  ;;  %v4123_v43 = vmul.f32 %v4684_v39, %v4122_v58  ;;  %v4107_v30 = vadd.f32 1e-05, %v4103_v10 }
 0x8ca   : > { %v4166_v33 = vmul.f32 %v4162_v28, %v6114_v3  ;;  %v4129_v59 = vmul.f32 %v4686_v45, %v4106_v63  ;;  %vm4135_vm0 = vweird.f32 %v4686_v45 }
 0x8cb   : > { %v4127_v55 = vsel %vm4126_vm15, %v4684_v39, %v4123_v43  ;;  %4687 = vrsqrt.f32 %v4107_v30  ;;  %vm4136_vm2 = vmor %vm4134_vm1, %vm4135_vm0  ;;  %vm4144_vm4 = vweird.f32 %v4107_v30 }
 0x8cc   : > { %4170 = vst [vmem:[#allocation13] sm:$0xff] %v4166_v33  ;;  %v4149_v9 = vmul.f32 %v4127_v55, %v4085_v53  ;;  %v4130_v23 = vmul.f32 %v4686_v45, %v4129_v59 }
 0x8ce   : > { %v4156_v27 = vmul.f32 %v4607_v1, %v4149_v9  ;;  %v4131_v32 = vmul.f32 0.5, %v4130_v23 }
 0x8d0   : > { %v4163_v37 = vadd.f32 %v4608_v20, %v4156_v27  ;;  %v4132_v47 = vsub.f32 1.5, %v4131_v32 }
 0x8d1   : > { %v4688_v6 = vpop.eup %4687 }
 0x8d2   : > { %v4167_v48 = vmul.f32 %v4163_v37, %v6163_v46  ;;  %v4133_v13 = vmul.f32 %v4686_v45, %v4132_v47  ;;  %v4139_v41 = vmul.f32 %v4688_v6, %v4107_v30  ;;  %vm4145_vm3 = vweird.f32 %v4688_v6 }
 0x8d3   : > { %vm4146_vm5 = vmor %vm4144_vm4, %vm4145_vm3 }
 0x8d4   : > { %4171 = vst [vmem:[#allocation13 + $0x8] sm:$0xff] %v4167_v48  ;;  %v4137_v3 = vsel %vm4136_vm2, %v4686_v45, %v4133_v13  ;;  %v4140_v49 = vmul.f32 %v4688_v6, %v4139_v41 }
 0x8d5   : > { %v4150_v50 = vmul.f32 %v4137_v3, %v7118_v12 }
 0x8d6   : > { %v4141_v42 = vmul.f32 0.5, %v4140_v49 }
 0x8d7   : > { %v4157_v36 = vmul.f32 %v4607_v1, %v4150_v50 }
 0x8d8   : > { %v4142_v53 = vsub.f32 1.5, %v4141_v42 }
 0x8d9   : > { %v4164_v19 = vadd.f32 %v4608_v20, %v4157_v36 }
 0x8da   : > { %v4143_v54 = vmul.f32 %v4688_v6, %v4142_v53 }
 0x8db   : > { %v4168_v61 = vmul.f32 %v4164_v19, %v6194_v29 }
 0x8dc   : > { %v4147_v46 = vsel %vm4146_vm5, %v4688_v6, %v4143_v54 }
 0x8dd   : > { %4172 = vst [vmem:[#allocation13 + $0x10] sm:$0xff] %v4168_v61  ;;  %v4151_v14 = vmul.f32 %v4147_v46, %v7123_v51 }
 0x8df   : > { %v4158_v5 = vmul.f32 %v4607_v1, %v4151_v14 }
 0x8e1   : > { %v4165_v12 = vadd.f32 %v4608_v20, %v4158_v5 }
 0x8e3   : > { %v4169_v16 = vmul.f32 %v4165_v12, %v6170_v17 }
 0x8e5   : > { %4173 = vst [vmem:[#allocation13 + $0x18] sm:$0xff] %v4169_v16 }
 0x8e6   : > { %4491 = dma.vmem_to_hbm [thread:$0]  (%p4514_p11), %s4180_s9, 512, %s4182_s17, [#allocation4], %s4965_s3, %s4965_s3, %s4966_s5  }
 0x8e7   : > { %4934 = dma.done.wait (%p4514_p11), [#allocation4], 512  }
 0x8e8   : > { %4936 = vsyncadd (%p4514_p11), [#allocation4], 4294966784 }
 0x8e9 PF: > { %s7240_s21 = sld [smem:[#allocation20_spill]]  ;;  %s7243_s18 = smov %s4943_s19 }
 0x8ea   : > { %s7241_s11 = sld [smem:[#allocation19_spill]] }
 0x8eb   : > { %s7242_s20 = sld [smem:[#allocation21_spill]] }
 0x8ef   : > { %p35_p5 = scmp.ge.s32.totalorder %s7240_s21, 4  }
 0x8f0   : > { %s7244_s19 = smov %s7241_s11 }
 0x8f1   :  { %37 = sbr.rel (!%p35_p5) target bundleno = 25 (0x19), region = 200 }
 0x8f6   :  { %4198 = vsyncpa [#allocation3], 1 }
 0x8f7   :  { %4200 = vsyncpa [#allocation3 + $0x1], 1 }
 0x8f8   :  { %4201 = vsyncpa [#allocation6], 1 }
 0x8f9   :  { %4203 = vsyncpa [#allocation6 + $0x1], 1 }
 0x8fa   :  { %4204 = vsyncpa [#allocation9], 1 }
 0x8fb   :  { %4206 = vsyncpa [#allocation9 + $0x1], 1 }
 0x8fc   :  { %4207 = vsyncpa [#allocation12], 1 }
 0x8fd   :  { %4209 = vsyncpa [#allocation12 + $0x1], 1 }
 0x8fe   :  { %4210 = vsyncpa [#allocation4], 1 }
 0x8ff   :  { %4212 = vsyncpa [#allocation4 + $0x1], 1 }

</bundles_post_ra>
